<compile_context>
chip_gen: v7x
topology: tpu7x:2x2x1
jax: 0.10.0
libtpu: 0.0.40
codegen_flags: <defaults>
</compile_context>

<pallas_src>
import functools

import jax
import jax.numpy as jnp
from jax import lax
from jax.experimental import pallas as pl
from jax.experimental.pallas import tpu as pltpu

LANE = 128


def conv_bn_prelu_kernel(x_ref, w_ref, p_ref, o_ref, im2col_ref, *,
                         kh, kw, c_in, toc, num_oc_tiles):
    # x_ref:      (1, Hp, Wp, C)    bf16 spatially padded NHWC input (one image)
    # w_ref:      (Kpad, OCpad)     bf16 weight slab, K packed as (kh, kw, C); resident
    # p_ref:      (3, OCpad)        f32 [bn scale; bn shift; prelu alpha]; resident
    # o_ref:      (1, Ho*Wo, TOC)   bf16 output tile (flattened pixels, lane-dense OC)
    # im2col_ref: (Ho*Wo, Kpad)     bf16 scratch, built once per image, reused per OC tile
    _, hp, wp, _ = x_ref.shape
    ho = hp - kh + 1          # stride == 1
    wo = wp - kw + 1
    m, kpad = im2col_ref.shape
    k_used = kh * kw * c_in

    # Build the im2col slab once per image.  This carry is only valid because the
    # OC-tile axis is the innermost grid axis and marked "arbitrary" (sequential);
    # do NOT reorder the grid or mark that axis "parallel".
    @pl.when(pl.program_id(1) == 0)
    def _build_im2col():
        if k_used < kpad:
            # Zero the K-padding columns (scratch is uninitialized; NaN * 0 = NaN).
            im2col_ref[...] = jnp.zeros_like(im2col_ref)
        # Static unroll: kh*kw tap copies, packed contiguously along K.
        for i in range(kh):
            for j in range(kw):
                t = i * kw + j
                patch = x_ref[0, i:i + ho, j:j + wo, :]            # (Ho, Wo, C)
                im2col_ref[:, t * c_in:(t + 1) * c_in] = patch.reshape(m, c_in)

    # Slice this step's OC tile out of the resident weight/param slabs.
    if num_oc_tiles == 1:
        w_tile = w_ref[...]
        p_tile = p_ref[...]
    else:
        oc0 = pl.multiple_of(pl.program_id(1) * toc, toc)
        w_tile = w_ref[:, pl.ds(oc0, toc)]
        p_tile = p_ref[:, pl.ds(oc0, toc)]

    # One fat MXU matmul with f32 accumulation.
    acc = jnp.dot(im2col_ref[...], w_tile, preferred_element_type=jnp.float32)

    scale = p_tile[0:1, :]
    shift = p_tile[1:2, :]
    alpha = p_tile[2:3, :]
    y = acc * scale + shift                      # eval-mode BatchNorm, f32 epilogue
    y = jnp.where(y >= 0.0, y, alpha * y)        # PReLU
    o_ref[0] = y.astype(o_ref.dtype)


def _round_up(v, m):
    return ((v + m - 1) // m) * m


def _chip_defaults(ocpad):
    """Per-generation OC tile width + VMEM limit (best effort, safe fallbacks)."""
    kind = ""
    try:
        kind = jax.devices()[0].device_kind.lower()
    except Exception:
        pass
    wide_mxu = ("v6" in kind) or ("v7" in kind)          # 2x256x256 MXU
    toc = 256 if (wide_mxu and ocpad % 256 == 0) else min(ocpad, LANE)
    # v5e/v6e have 128 MiB physical VMEM; v7x only 64 MiB.
    vmem_limit = (48 if "v7" in kind else 96) * 1024 * 1024
    return toc, vmem_limit


def conv_bn_prelu(x_nchw, weight_oihw, gamma, beta, running_mean, running_var,
                  alpha, *, stride=1, padding=1, eps=1e-5):
    assert stride == 1, "this kernel implements stride=1 only"
    n, c, h, w = x_nchw.shape
    oc, ic, kh, kw = weight_oihw.shape
    assert ic == c, "groups=1 only"

    hp, wp = h + 2 * padding, w + 2 * padding
    ho, wo = hp - kh + 1, wp - kw + 1
    m = ho * wo

    k_used = kh * kw * c
    kpad = _round_up(k_used, LANE)       # contraction dim packed, padded ONCE to 128
    ocpad = _round_up(oc, LANE)
    toc, vmem_limit = _chip_defaults(ocpad)
    num_oc_tiles = ocpad // toc

    # NCHW -> NHWC, spatial zero-pad, bf16 -- one chained expression (pad + cast
    # fuse); channels are NOT padded (K is packed inside the kernel instead).
    x = jnp.pad(jnp.transpose(x_nchw, (0, 2, 3, 1)),
                ((0, 0), (padding, padding), (padding, padding), (0, 0))
                ).astype(jnp.bfloat16)

    # Weight slab: (kh, kw, C, OC) -> (K, OC), zero-padded to (Kpad, OCpad), bf16.
    # K ordering (i, j, c) matches the im2col column layout in the kernel.
    w_slab = jnp.transpose(weight_oihw, (2, 3, 1, 0)).reshape(k_used, oc)
    w_slab = jnp.pad(w_slab, ((0, kpad - k_used), (0, ocpad - oc))).astype(jnp.bfloat16)

    # Eval-mode BatchNorm folded to per-channel scale/shift, applied in the f32
    # epilogue (kept out of the bf16 weights to avoid rounding amplification).
    scale = gamma / jnp.sqrt(running_var + eps)
    shift = beta - running_mean * scale
    params = jnp.pad(jnp.stack([scale, shift, alpha]).astype(jnp.float32),
                     ((0, 0), (0, ocpad - oc)))

    kernel = functools.partial(conv_bn_prelu_kernel, kh=kh, kw=kw, c_in=c,
                               toc=toc, num_oc_tiles=num_oc_tiles)

    out = pl.pallas_call(
        kernel,
        out_shape=jax.ShapeDtypeStruct((n, m, ocpad), jnp.bfloat16),
        grid_spec=pltpu.PrefetchScalarGridSpec(
            num_scalar_prefetch=0,
            grid=(n, num_oc_tiles),
            in_specs=[
                # One padded image per step; block index depends only on b, so the
                # image block is not re-DMA'd across OC tiles.
                pl.BlockSpec((1, hp, wp, c), lambda b, t: (b, 0, 0, 0)),
                # Full-extent blocks with constant index_map -> resident across
                # the whole grid (no per-step weight/param re-DMA).
                pl.BlockSpec((kpad, ocpad), lambda b, t: (0, 0)),
                pl.BlockSpec((3, ocpad), lambda b, t: (0, 0)),
            ],
            out_specs=pl.BlockSpec((1, m, toc), lambda b, t: (b, 0, t)),
            scratch_shapes=[pltpu.VMEM((m, kpad), jnp.bfloat16)],
        ),
        compiler_params=pltpu.CompilerParams(
            # Batch axis parallel (megacore); OC-tile axis MUST stay innermost and
            # "arbitrary" -- the cached im2col scratch is only rebuilt at t == 0.
            dimension_semantics=("parallel", "arbitrary"),
            vmem_limit_bytes=vmem_limit,
        ),
    )(x, w_slab, params)

    # Single fused post-pass back to the module's f32 NCHW output.  A consumer
    # that accepts bf16 NHWC (lane-dense OCpad) could skip this entirely.
    return jnp.transpose(out.reshape(n, ho, wo, ocpad)[..., :oc],
                         (0, 3, 1, 2)).astype(jnp.float32)


def reference(x_nchw, weight_oihw, gamma, beta, running_mean, running_var,
              alpha, *, stride=1, padding=1, eps=1e-5, match_kernel_dtypes=False):
    """ConvBnPrelu forward in plain XLA (eval-mode BatchNorm).  If
    match_kernel_dtypes, applies the same bf16 rounding (activations, weights,
    output) that the Pallas kernel uses."""
    scale = gamma / jnp.sqrt(running_var + eps)
    shift = beta - running_mean * scale
    x = x_nchw.astype(jnp.float32)
    wgt = weight_oihw.astype(jnp.float32)
    if match_kernel_dtypes:
        x = x.astype(jnp.bfloat16).astype(jnp.float32)
        wgt = wgt.astype(jnp.bfloat16).astype(jnp.float32)
    y = lax.conv_general_dilated(
        x, wgt,
        window_strides=(stride, stride),
        padding=[(padding, padding), (padding, padding)],
        dimension_numbers=("NCHW", "OIHW", "NCHW"),
        precision=lax.Precision.HIGHEST)
    y = y * scale[None, :, None, None] + shift[None, :, None, None]
    y = jnp.where(y >= 0.0, y, alpha[None, :, None, None] * y)
    if match_kernel_dtypes:
        y = y.astype(jnp.bfloat16).astype(jnp.float32)
    return y


if __name__ == "__main__":
    key = jax.random.PRNGKey(0)
    k_x, k_w3, k_w1, k_g, k_b, k_m, k_v, k_a = jax.random.split(key, 8)

    N, IN_C, OUT_C, H, W = 2, 4, 8, 16, 16

    x = jax.random.normal(k_x, (N, IN_C, H, W), jnp.float32)
    gamma = 1.0 + 0.1 * jax.random.normal(k_g, (OUT_C,), jnp.float32)
    beta = 0.1 * jax.random.normal(k_b, (OUT_C,), jnp.float32)
    running_mean = 0.1 * jax.random.normal(k_m, (OUT_C,), jnp.float32)
    running_var = 1.0 + 0.1 * jax.random.uniform(k_v, (OUT_C,), jnp.float32)
    alpha = 0.25 + 0.01 * jax.random.normal(k_a, (OUT_C,), jnp.float32)  # PReLU ~0.25

    # Config A: 3x3 conv, stride 1, padding 1.
    w3 = jax.random.normal(k_w3, (OUT_C, IN_C, 3, 3), jnp.float32) * 0.1
    out3 = conv_bn_prelu(x, w3, gamma, beta, running_mean, running_var, alpha,
                         stride=1, padding=1)
    out3 = jax.block_until_ready(out3)
    assert out3.shape == (N, OUT_C, H, W)
    ref3_q = reference(x, w3, gamma, beta, running_mean, running_var, alpha,
                       stride=1, padding=1, match_kernel_dtypes=True)
    assert jnp.allclose(out3, ref3_q, atol=2e-2, rtol=2e-2), \
        "3x3: mismatch vs dtype-matched reference"
    ref3_f = reference(x, w3, gamma, beta, running_mean, running_var, alpha,
                       stride=1, padding=1, match_kernel_dtypes=False)
    assert jnp.allclose(out3, ref3_f, atol=6e-2, rtol=6e-2), \
        "3x3: mismatch vs f32 reference"

    # Config B: 1x1 conv, stride 1, padding 0 (the module's default kernel size).
    w1 = jax.random.normal(k_w1, (OUT_C, IN_C, 1, 1), jnp.float32) * 0.3
    out1 = conv_bn_prelu(x, w1, gamma, beta, running_mean, running_var, alpha,
                         stride=1, padding=0)
    out1 = jax.block_until_ready(out1)
    assert out1.shape == (N, OUT_C, H, W)
    ref1_q = reference(x, w1, gamma, beta, running_mean, running_var, alpha,
                       stride=1, padding=0, match_kernel_dtypes=True)
    assert jnp.allclose(out1, ref1_q, atol=2e-2, rtol=2e-2), \
        "1x1: mismatch vs dtype-matched reference"

    print("KERNEL_OK")
</pallas_src>

<mosaic_0001>
module attributes {stable_mosaic.version = 11 : i64} {
  func.func @conv_bn_prelu_kernel(%arg0: i32, %arg1: i32, %arg2: memref<1x18x18x4xbf16, #tpu.memory_space<vmem>>, %arg3: memref<128x128xbf16, #tpu.memory_space<vmem>>, %arg4: memref<3x128xf32, #tpu.memory_space<vmem>>, %arg5: memref<1x256x128xbf16, #tpu.memory_space<vmem>>, %arg6: memref<256x128xbf16, #tpu.memory_space<vmem>>) attributes {dimension_semantics = [#tpu.dimension_semantics<parallel>, #tpu.dimension_semantics<arbitrary>], iteration_bounds = array<i64: 2, 1>, scalar_prefetch = 0 : i64, scratch_operands = 1 : i64, tpu.core_type = #tpu.core_type<tc>, window_params = [{transform_indices = @transform_0, window_bounds = array<i64: 1, 18, 18, 4>}, {pipeline_mode = #tpu.pipeline_mode<synchronous>, transform_indices = @transform_1, window_bounds = array<i64: 128, 128>}, {pipeline_mode = #tpu.pipeline_mode<synchronous>, transform_indices = @transform_2, window_bounds = array<i64: 3, 128>}, {transform_indices = @transform_3, window_bounds = array<i64: 1, 256, 128>}]} {
    %c0_i32 = arith.constant 0 : i32
    %0 = arith.cmpi eq, %arg1, %c0_i32 : i32
    %1 = arith.extui %0 : i1 to i32
    %c0_i32_0 = arith.constant 0 : i32
    %2 = arith.cmpi ne, %1, %c0_i32_0 : i32
    scf.if %2 {
      %cst_10 = arith.constant 0.000000e+00 : bf16
      %23 = vector.broadcast %cst_10 : bf16 to vector<256x128xbf16>
      %c0_11 = arith.constant 0 : index
      %c0_12 = arith.constant 0 : index
      %24 = vector.load %arg6[%c0_11, %c0_12] : memref<256x128xbf16, #tpu.memory_space<vmem>>, vector<256x128xbf16>
      tpu.vector_store %arg6[%c0_11, %c0_12], %23 {strides = array<i32>} : memref<256x128xbf16, #tpu.memory_space<vmem>>, vector<256x128xbf16>,
      %c0_13 = arith.constant 0 : index
      %c0_14 = arith.constant 0 : index
      %c0_15 = arith.constant 0 : index
      %c0_16 = arith.constant 0 : index
      %25 = vector.load %arg2[%c0_13, %c0_14, %c0_15, %c0_16] : memref<1x18x18x4xbf16, #tpu.memory_space<vmem>>, vector<1x16x16x4xbf16>
      %26 = vector.shape_cast %25 : vector<1x16x16x4xbf16> to vector<16x16x4xbf16>
      %27 = vector.shape_cast %26 : vector<16x16x4xbf16> to vector<256x4xbf16>
      %c0_17 = arith.constant 0 : index
      %c0_18 = arith.constant 0 : index
      %28 = vector.load %arg6[%c0_17, %c0_18] : memref<256x128xbf16, #tpu.memory_space<vmem>>, vector<256x4xbf16>
      tpu.vector_store %arg6[%c0_17, %c0_18], %27 {strides = array<i32>} : memref<256x128xbf16, #tpu.memory_space<vmem>>, vector<256x4xbf16>,
      %c0_19 = arith.constant 0 : index
      %c0_20 = arith.constant 0 : index
      %c1 = arith.constant 1 : index
      %c0_21 = arith.constant 0 : index
      %29 = vector.load %arg2[%c0_19, %c0_20, %c1, %c0_21] : memref<1x18x18x4xbf16, #tpu.memory_space<vmem>>, vector<1x16x16x4xbf16>
      %30 = vector.shape_cast %29 : vector<1x16x16x4xbf16> to vector<16x16x4xbf16>
      %31 = vector.shape_cast %30 : vector<16x16x4xbf16> to vector<256x4xbf16>
      %c0_22 = arith.constant 0 : index
      %c4 = arith.constant 4 : index
      %32 = vector.load %arg6[%c0_22, %c4] : memref<256x128xbf16, #tpu.memory_space<vmem>>, vector<256x4xbf16>
      tpu.vector_store %arg6[%c0_22, %c4], %31 {strides = array<i32>} : memref<256x128xbf16, #tpu.memory_space<vmem>>, vector<256x4xbf16>,
      %c0_23 = arith.constant 0 : index
      %c0_24 = arith.constant 0 : index
      %c2 = arith.constant 2 : index
      %c0_25 = arith.constant 0 : index
      %33 = vector.load %arg2[%c0_23, %c0_24, %c2, %c0_25] : memref<1x18x18x4xbf16, #tpu.memory_space<vmem>>, vector<1x16x16x4xbf16>
      %34 = vector.shape_cast %33 : vector<1x16x16x4xbf16> to vector<16x16x4xbf16>
      %35 = vector.shape_cast %34 : vector<16x16x4xbf16> to vector<256x4xbf16>
      %c0_26 = arith.constant 0 : index
      %c8 = arith.constant 8 : index
      %36 = vector.load %arg6[%c0_26, %c8] : memref<256x128xbf16, #tpu.memory_space<vmem>>, vector<256x4xbf16>
      tpu.vector_store %arg6[%c0_26, %c8], %35 {strides = array<i32>} : memref<256x128xbf16, #tpu.memory_space<vmem>>, vector<256x4xbf16>,
      %c0_27 = arith.constant 0 : index
      %c1_28 = arith.constant 1 : index
      %c0_29 = arith.constant 0 : index
      %c0_30 = arith.constant 0 : index
      %37 = vector.load %arg2[%c0_27, %c1_28, %c0_29, %c0_30] : memref<1x18x18x4xbf16, #tpu.memory_space<vmem>>, vector<1x16x16x4xbf16>
      %38 = vector.shape_cast %37 : vector<1x16x16x4xbf16> to vector<16x16x4xbf16>
      %39 = vector.shape_cast %38 : vector<16x16x4xbf16> to vector<256x4xbf16>
      %c0_31 = arith.constant 0 : index
      %c12 = arith.constant 12 : index
      %40 = vector.load %arg6[%c0_31, %c12] : memref<256x128xbf16, #tpu.memory_space<vmem>>, vector<256x4xbf16>
      tpu.vector_store %arg6[%c0_31, %c12], %39 {strides = array<i32>} : memref<256x128xbf16, #tpu.memory_space<vmem>>, vector<256x4xbf16>,
      %c0_32 = arith.constant 0 : index
      %c1_33 = arith.constant 1 : index
      %c1_34 = arith.constant 1 : index
      %c0_35 = arith.constant 0 : index
      %41 = vector.load %arg2[%c0_32, %c1_33, %c1_34, %c0_35] : memref<1x18x18x4xbf16, #tpu.memory_space<vmem>>, vector<1x16x16x4xbf16>
      %42 = vector.shape_cast %41 : vector<1x16x16x4xbf16> to vector<16x16x4xbf16>
      %43 = vector.shape_cast %42 : vector<16x16x4xbf16> to vector<256x4xbf16>
      %c0_36 = arith.constant 0 : index
      %c16 = arith.constant 16 : index
      %44 = vector.load %arg6[%c0_36, %c16] : memref<256x128xbf16, #tpu.memory_space<vmem>>, vector<256x4xbf16>
      tpu.vector_store %arg6[%c0_36, %c16], %43 {strides = array<i32>} : memref<256x128xbf16, #tpu.memory_space<vmem>>, vector<256x4xbf16>,
      %c0_37 = arith.constant 0 : index
      %c1_38 = arith.constant 1 : index
      %c2_39 = arith.constant 2 : index
      %c0_40 = arith.constant 0 : index
      %45 = vector.load %arg2[%c0_37, %c1_38, %c2_39, %c0_40] : memref<1x18x18x4xbf16, #tpu.memory_space<vmem>>, vector<1x16x16x4xbf16>
      %46 = vector.shape_cast %45 : vector<1x16x16x4xbf16> to vector<16x16x4xbf16>
      %47 = vector.shape_cast %46 : vector<16x16x4xbf16> to vector<256x4xbf16>
      %c0_41 = arith.constant 0 : index
      %c20 = arith.constant 20 : index
      %48 = vector.load %arg6[%c0_41, %c20] : memref<256x128xbf16, #tpu.memory_space<vmem>>, vector<256x4xbf16>
      tpu.vector_store %arg6[%c0_41, %c20], %47 {strides = array<i32>} : memref<256x128xbf16, #tpu.memory_space<vmem>>, vector<256x4xbf16>,
      %c0_42 = arith.constant 0 : index
      %c2_43 = arith.constant 2 : index
      %c0_44 = arith.constant 0 : index
      %c0_45 = arith.constant 0 : index
      %49 = vector.load %arg2[%c0_42, %c2_43, %c0_44, %c0_45] : memref<1x18x18x4xbf16, #tpu.memory_space<vmem>>, vector<1x16x16x4xbf16>
      %50 = vector.shape_cast %49 : vector<1x16x16x4xbf16> to vector<16x16x4xbf16>
      %51 = vector.shape_cast %50 : vector<16x16x4xbf16> to vector<256x4xbf16>
      %c0_46 = arith.constant 0 : index
      %c24 = arith.constant 24 : index
      %52 = vector.load %arg6[%c0_46, %c24] : memref<256x128xbf16, #tpu.memory_space<vmem>>, vector<256x4xbf16>
      tpu.vector_store %arg6[%c0_46, %c24], %51 {strides = array<i32>} : memref<256x128xbf16, #tpu.memory_space<vmem>>, vector<256x4xbf16>,
      %c0_47 = arith.constant 0 : index
      %c2_48 = arith.constant 2 : index
      %c1_49 = arith.constant 1 : index
      %c0_50 = arith.constant 0 : index
      %53 = vector.load %arg2[%c0_47, %c2_48, %c1_49, %c0_50] : memref<1x18x18x4xbf16, #tpu.memory_space<vmem>>, vector<1x16x16x4xbf16>
      %54 = vector.shape_cast %53 : vector<1x16x16x4xbf16> to vector<16x16x4xbf16>
      %55 = vector.shape_cast %54 : vector<16x16x4xbf16> to vector<256x4xbf16>
      %c0_51 = arith.constant 0 : index
      %c28 = arith.constant 28 : index
      %56 = vector.load %arg6[%c0_51, %c28] : memref<256x128xbf16, #tpu.memory_space<vmem>>, vector<256x4xbf16>
      tpu.vector_store %arg6[%c0_51, %c28], %55 {strides = array<i32>} : memref<256x128xbf16, #tpu.memory_space<vmem>>, vector<256x4xbf16>,
      %c0_52 = arith.constant 0 : index
      %c2_53 = arith.constant 2 : index
      %c2_54 = arith.constant 2 : index
      %c0_55 = arith.constant 0 : index
      %57 = vector.load %arg2[%c0_52, %c2_53, %c2_54, %c0_55] : memref<1x18x18x4xbf16, #tpu.memory_space<vmem>>, vector<1x16x16x4xbf16>
      %58 = vector.shape_cast %57 : vector<1x16x16x4xbf16> to vector<16x16x4xbf16>
      %59 = vector.shape_cast %58 : vector<16x16x4xbf16> to vector<256x4xbf16>
      %c0_56 = arith.constant 0 : index
      %c32 = arith.constant 32 : index
      %60 = vector.load %arg6[%c0_56, %c32] : memref<256x128xbf16, #tpu.memory_space<vmem>>, vector<256x4xbf16>
      tpu.vector_store %arg6[%c0_56, %c32], %59 {strides = array<i32>} : memref<256x128xbf16, #tpu.memory_space<vmem>>, vector<256x4xbf16>,
    } else {
    }
    %c0 = arith.constant 0 : index
    %c0_1 = arith.constant 0 : index
    %3 = vector.load %arg3[%c0, %c0_1] : memref<128x128xbf16, #tpu.memory_space<vmem>>, vector<128x128xbf16>
    %c0_2 = arith.constant 0 : index
    %c0_3 = arith.constant 0 : index
    %4 = vector.load %arg4[%c0_2, %c0_3] : memref<3x128xf32, #tpu.memory_space<vmem>>, vector<3x128xf32>
    %c0_4 = arith.constant 0 : index
    %c0_5 = arith.constant 0 : index
    %5 = vector.load %arg6[%c0_4, %c0_5] : memref<256x128xbf16, #tpu.memory_space<vmem>>, vector<256x128xbf16>
    %cst = arith.constant dense<0.000000e+00> : vector<256x128xf32>
    %6 = tpu.matmul %5, %3, %cst {dimension_numbers = #tpu.dot_dimension_numbers<[1], [0], [0], [1], [0, 0, 1, 1], [], []>} : vector<256x128xbf16>, vector<128x128xbf16>, vector<256x128xf32> -> vector<256x128xf32>
    %7 = vector.extract_strided_slice %4 {offsets = [0, 0], sizes = [1, 128], strides = [1, 1]} : vector<3x128xf32> to vector<1x128xf32>
    %8 = vector.extract_strided_slice %4 {offsets = [1, 0], sizes = [1, 128], strides = [1, 1]} : vector<3x128xf32> to vector<1x128xf32>
    %9 = vector.extract_strided_slice %4 {offsets = [2, 0], sizes = [1, 128], strides = [1, 1]} : vector<3x128xf32> to vector<1x128xf32>
    %10 = vector.broadcast %7 : vector<1x128xf32> to vector<256x128xf32>
    %11 = arith.mulf %6, %10 : vector<256x128xf32>
    %12 = vector.broadcast %8 : vector<1x128xf32> to vector<256x128xf32>
    %13 = arith.addf %11, %12 : vector<256x128xf32>
    %cst_6 = arith.constant 0.000000e+00 : f32
    %14 = vector.broadcast %cst_6 : f32 to vector<256x128xf32>
    %15 = arith.cmpf oge, %13, %14 : vector<256x128xf32>
    %16 = vector.broadcast %9 : vector<1x128xf32> to vector<256x128xf32>
    %17 = arith.mulf %16, %13 : vector<256x128xf32>
    %18 = arith.select %15, %13, %17 : vector<256x128xi1>, vector<256x128xf32>
    %19 = arith.truncf %18 : vector<256x128xf32> to vector<256x128xbf16>
    %c0_7 = arith.constant 0 : index
    %c0_8 = arith.constant 0 : index
    %c0_9 = arith.constant 0 : index
    %20 = vector.load %arg5[%c0_7, %c0_8, %c0_9] : memref<1x256x128xbf16, #tpu.memory_space<vmem>>, vector<1x256x128xbf16>
    %21 = vector.shape_cast %20 : vector<1x256x128xbf16> to vector<256x128xbf16>
    %22 = vector.shape_cast %19 : vector<256x128xbf16> to vector<1x256x128xbf16>
    tpu.vector_store %arg5[%c0_7, %c0_8, %c0_9], %22 {strides = array<i32>} : memref<1x256x128xbf16, #tpu.memory_space<vmem>>, vector<1x256x128xbf16>,
    return
  }
  func.func @transform_0(%arg0: i32, %arg1: i32) -> (i32, i32, i32, i32) {
    %c0_i32 = arith.constant 0 : i32
    %c0_i32_0 = arith.constant 0 : i32
    %c0_i32_1 = arith.constant 0 : i32
    %c0_i32_2 = arith.constant 0 : i32
    return %arg0, %c0_i32, %c0_i32_0, %c0_i32_1 : i32, i32, i32, i32
  }
  func.func @transform_1(%arg0: i32, %arg1: i32) -> (i32, i32) {
    %c0_i32 = arith.constant 0 : i32
    %c0_i32_0 = arith.constant 0 : i32
    %c0_i32_1 = arith.constant 0 : i32
    return %c0_i32, %c0_i32_0 : i32, i32
  }
  func.func @transform_2(%arg0: i32, %arg1: i32) -> (i32, i32) {
    %c0_i32 = arith.constant 0 : i32
    %c0_i32_0 = arith.constant 0 : i32
    %c0_i32_1 = arith.constant 0 : i32
    return %c0_i32, %c0_i32_0 : i32, i32
  }
  func.func @transform_3(%arg0: i32, %arg1: i32) -> (i32, i32, i32) {
    %c0_i32 = arith.constant 0 : i32
    %c0_i32_0 = arith.constant 0 : i32
    return %arg0, %c0_i32, %arg1 : i32, i32, i32
  }
}

</mosaic_0001>

<bundles_post_ra>
// kernel: tpu_custom_call.1
= control target key start
LH: loop header
LB: loop body
LE: loop exit
PB: predicated region body
PF: predicated region fallthrough
CT: control target
= control target key end

     0   :  { %8 = vsyncpa [#allocation4], 0  ;;  %s6608_s0 = inlined_call_operand.hbm [shape: bf16[2,18,18,4], index: 0, kind: input, shape index: {}]   ;;  %s6609_s1 = inlined_call_operand.hbm [shape: bf16[128,128], index: 1, kind: input, shape index: {}]   ;;  %s6610_s2 = inlined_call_operand.hbm [shape: f32[3,128], index: 2, kind: input, shape index: {}]   ;;  %s6611_s3 = inlined_call_operand.hbm [shape: bf16[2,256,128], index: 3, kind: output, shape index: {}]  }
   0x1   :  { %10 = vsyncpa [#allocation4 + $0x1], 0 }
   0x2   :  { %11 = vsyncpa [#allocation7], 0 }
   0x3   :  { %12 = vsyncpa [#allocation5], 0 }
   0x4   :  { %14 = vsyncpa [#allocation5 + $0x1], 0  ;;  %s5131_s12 = smov 0   ;;  %s5133_s13 = smov 0  }
   0x5   :  { %s5135_s14 = smov 0   ;;  %s5137_s15 = smov 0  }
   0x6   :  { %s5139_s16 = smov 0   ;;  %s5141_s17 = smov 0  }
   0x7 LB: > { %s4047_s18 = sadd.s32 4294967295, %s5093_s17   ;;  %s4048_s19 = sadd.s32 4294967294, %s5093_s17   ;;  %s5093_s17 = sphi %s5141_s17, %s20_s17   ;;  %s5089_s16 = sphi %s5139_s16, %s6637_s16   ;;  %s5085_s15 = sphi %s5137_s15, %s6636_s15   ;;  %s5081_s14 = sphi %s5135_s14, %s6635_s14   ;;  %s5077_s13 = sphi %s5133_s13, %s6634_s13   ;;  %s5073_s12 = sphi %s5131_s12, %s6633_s12  }
   0x8   : > { %p52_p0 = scmp.ne.s32.totalorder %s5077_s13, %s5073_s12  ;;  %p5165_p1 = scmp.eq.s32.totalorder %s4047_s18, 0 }
   0x9   : > { %p5169_p2 = scmp.eq.s32.totalorder %s4047_s18, 1  ;;  %p126_p3 = scmp.eq.s32.totalorder %s4048_s19, 1 }
   0xa   : > { %s6616_s20 = scalar_select %p5165_p1, 1, 0 }
   0xb   : > { %p5175_p4 = por %p5165_p1, %p52_p0  ;;  %p4049_p5 = scmp.ge.s32.totalorder %s5093_s17, 1 }
   0xc   : > { %p5180_p6 = por %p126_p3, %p52_p0  ;;  %p133_p7 = scmp.lt.s32.totalorder %s5093_s17, 3 }
   0xd   : > { %s6618_s22 = scalar_select %p5175_p4, 1, 0 }
   0xe   : > { %s6619_s23 = scalar_select %p5180_p6, 1, 0 }
   0xf   : > { %p5185_p8 = pnand %p4049_p5, %p133_p7  ;;  %s5095_s25 = smov [#allocation6]  }
  0x10   : > { %s145_s26 = sshll.u32 %s5095_s25, 4  ;;  %s5096_s28 = smov [#allocation8]   ;;  %s5189_s26 = int_to_ptr.vmem [resolvable:$true] %s145_s26 }
  0x11   : > { %p4782_p9 = pneg %p5185_p8  ;;  %s159_s29 = sshll.u32 %s5096_s28, 4  ;;  %s5200_s29 = int_to_ptr.vmem [resolvable:$true] %s159_s29 }
  0x12   : > { %s4921_s5 = scalar_lea.hbm %s6609_s1, 1024 }
  0x13   : > { %p5196_p11 = pnand %p4782_p9, %p5165_p1  ;;  %p4922_p12 = scmp.ne.s32.totalorder %s6609_s1, %s4921_s5 }
  0x14   : > { %p4928_p5 = scmp.lt.u32.totalorder %s4921_s5, %s6609_s1 }
  0x15   : > { %p4923_p13 = pneg %p5196_p11 }
  0x17   : > { %p4924_p0 = pnand %p4923_p13, %p4922_p12 }
  0x19   : > { %p4925_p3 = pneg %p4924_p0 }
  0x1b   : > { %p4930_p7 = pnand %p4928_p5, %p4925_p3 }
  0x1d   : > { %4933 = shalt.err (!%p4930_p7)
}
  0x1e   : > { %s4934_s10 = scalar_lea.vmem %s5189_s26, 1024  ;;  %p4942_p1 = scmp.lt.s32.totalorder %s5189_s26, %s5189_s26 }
  0x1f   : > { %p4935_p9 = scmp.ne.s32.totalorder %s5189_s26, %s4934_s10  ;;  %p4943_p12 = scmp.lt.s32.totalorder %s4934_s10, %s4934_s10 }
  0x21   : > { %p4937_p10 = pnand %p4935_p9, %p4923_p13  ;;  %p4944_p0 = por %p4943_p12, %p4942_p1 }
  0x23   : > { %p4938_p6 = pneg %p4937_p10 }
  0x25   : > { %p4945_p4 = pnand %p4944_p0, %p4938_p6 }
  0x27   : > { %4948 = shalt.err (!%p4945_p4)
}
  0x28   : > { %s5097_s11 = smov 64   ;;  %s5098_s18 = smov 4  }
  0x29   : > { %4785 = dma.hbm_to_vmem [thread:$0]  (!%p5196_p11), %s6609_s1, 1024, %s5189_s26, [#allocation7], %s5097_s11, %s5097_s11, %s5098_s18  }
  0x2a   : > { %s4949_s4 = scalar_lea.hbm %s6610_s2, 64 }
  0x2b   : > { %p4950_p1 = scmp.ne.s32.totalorder %s6610_s2, %s4949_s4  ;;  %p4956_p10 = scmp.lt.u32.totalorder %s4949_s4, %s6610_s2 }
  0x2d   : > { %p4952_p4 = pnand %p4950_p1, %p4923_p13 }
  0x2f   : > { %p4953_p6 = pneg %p4952_p4 }
  0x31   : > { %p4958_p3 = pnand %p4956_p10, %p4953_p6 }
  0x33   : > { %4961 = shalt.err (!%p4958_p3)
}
  0x34   : > { %s4962_s26 = scalar_lea.vmem %s5200_s29, 64  ;;  %p4970_p12 = scmp.lt.s32.totalorder %s5200_s29, %s5200_s29 }
  0x35   : > { %p4963_p5 = scmp.ne.s32.totalorder %s5200_s29, %s4962_s26  ;;  %p4971_p0 = scmp.lt.s32.totalorder %s4962_s26, %s4962_s26 }
  0x37   : > { %p4965_p7 = pnand %p4963_p5, %p4923_p13  ;;  %p4972_p1 = por %p4971_p0, %p4970_p12 }
  0x39   : > { %p4966_p9 = pneg %p4965_p7 }
  0x3b   : > { %p4973_p4 = pnand %p4972_p1, %p4966_p9 }
  0x3d   : > { %4976 = shalt.err (!%p4973_p4)
}
  0x3e   : > { %4788 = dma.hbm_to_vmem [thread:$0]  (!%p5196_p11), %s6610_s2, 64, %s5200_s29, [#allocation7]  }
  0x3f   : > { %s32_s19 = sadd.s32 1, %s5089_s16  ;;  %s39_s25 = sadd.s32 1, %s5081_s14 }
  0x40   : > { %p34_p13 = scmp.ge.s32.totalorder %s32_s19, 2  ;;  %p46_p6 = scmp.ne.s32.totalorder %s5081_s14, %s5077_s13 }
  0x41   : > { %p47_p10 = scmp.eq.s32.totalorder %s5093_s17, 0  ;;  %p4799_p3 = scmp.lt.s32.totalorder %s5093_s17, 2 }
  0x42   : > { %s6639_s19 = smov (%p34_p13, %s32_s19), 0  ;;  %p5267_p7 = por %p5169_p2, %p46_p6 }
  0x43   : > { %p48_p5 = por %p47_p10, %p46_p6  ;;  %s36_s28 = ssub.s32 %s5089_s16, %s6639_s19 }
  0x44   : > { %s6622_s27 = scalar_select %p5267_p7, 1, 0 }
  0x45   : > { %s170_s30 = sand.u32 1, %s5081_s14   ;;  %p37_p9 = scmp.eq.s32.totalorder %s36_s28, 0 }
  0x46   : > { %s4767_s29 = smul.u32 216, %s170_s30  ;;  %p5274_p11 = pnand %p4799_p3, %p48_p5 }
  0x47   : > { %s5279_s5 = scalar_select %p37_p9, %s5081_s14, %s39_s25  }
  0x48   : > { %s4768_s6 = smul.u32 3456, %s5089_s16  ;;  %s174_s7 = scalar_lea.vmem [#allocation3], %s4767_s29 }
  0x49   : > { %s181_s8 = sshll.u32 %s174_s7, 4  ;;  %s5289_s10 = scalar_lea.sflag [#allocation4], %s170_s30  ;;  %s5287_s8 = int_to_ptr.vmem [resolvable:$true] %s181_s8 }
  0x4a   : > { %s5285_s9 = scalar_lea.hbm %s6608_s0, %s4768_s6  ;;  %p4979_p12 = pneg %p5274_p11 }
  0x4b   : > { %s4977_s28 = scalar_lea.hbm %s5285_s9, 3456  ;;  %s4982_s6 = scalar_lea.hbm %s6608_s0, 6912 }
  0x4c   : > { %p4978_p2 = scmp.ne.s32.totalorder %s5285_s9, %s4977_s28  ;;  %p4983_p4 = scmp.lt.u32.totalorder %s5285_s9, %s6608_s0 }
  0x4d   : > { %p4984_p13 = scmp.lt.u32.totalorder %s4982_s6, %s4977_s28  ;;  %p4986_p10 = scmp.lt.u32.totalorder %s4977_s28, %s5285_s9 }
  0x4e   : > { %p4980_p0 = pnand %p4979_p12, %p4978_p2 }
  0x4f   : > { %p4985_p6 = por %p4984_p13, %p4983_p4 }
  0x50   : > { %p4981_p1 = pneg %p4980_p0 }
  0x51   : > { %p4987_p3 = por %p4986_p10, %p4985_p6 }
  0x53   : > { %p4988_p5 = pnand %p4987_p3, %p4981_p1 }
  0x55   : > { %4991 = shalt.err (!%p4988_p5)
}
  0x56   : > { %s4992_s30 = scalar_lea.vmem %s5287_s8, 3456  ;;  %s5099_s26 = smov [#allocation3]  }
  0x57   : > { %p4993_p9 = scmp.ne.s32.totalorder %s5287_s8, %s4992_s30  ;;  %s4997_s25 = sshll.u32 %s5099_s26, 4  ;;  %s4998_s25 = int_to_ptr.vmem [resolvable:$false] %s4997_s25 }
  0x58   : > { %s4999_s29 = scalar_lea.vmem %s4998_s25, 6912  ;;  %p5000_p7 = scmp.lt.s32.totalorder %s5287_s8, %s4998_s25 }
  0x59   : > { %p4995_p2 = pnand %p4993_p9, %p4979_p12  ;;  %p5001_p4 = scmp.lt.s32.totalorder %s4999_s29, %s4992_s30 }
  0x5b   : > { %p4996_p0 = pneg %p4995_p2  ;;  %p5002_p13 = por %p5001_p4, %p5000_p7 }
  0x5d   : > { %p5003_p6 = pnand %p5002_p13, %p4996_p0 }
  0x5f   : > { %5006 = shalt.err (!%p5003_p6)
}
  0x60   : > { %4792 = dma.hbm_to_vmem [thread:$0]  (!%p5274_p11), %s5285_s9, 3456, %s5287_s8, %s5289_s10, %s5097_s11, %s5097_s11, %s5098_s18  }
  0x61   : > { %193 = sbr.rel (%p5185_p8) target bundleno = 776 (0x308), region = 32  ;;  %s5323_s28 = sand.u32 (!%p5185_p8), 1, %s5077_s13  }
  0x62   : > { %s4769_s6 = smul.u32 (!%p5185_p8), 216, %s5323_s28  ;;  %s196_s7 = scalar_lea.sflag (!%p5185_p8), [#allocation4], %s5323_s28 }
  0x63   : > { %p6624_p7 = scmp.ne.s32.totalorder (!%p5185_p8), %s6618_s22, 0 }
  0x64   : > { %s5327_s21 = scalar_lea.vmem (!%p5185_p8), [#allocation3], %s4769_s6 }
  0x68   : > { %5060 = dma.done.wait (%p6624_p7), %s196_s7, 3456  }
  0x69   : > { %5062 = vsyncadd (%p6624_p7), %s196_s7, 4294963840  ;;  %p6625_p11 = scmp.ne.s32.totalorder %s6616_s20, 0 }
  0x6b   : > { %5064 = dma.done.wait (%p6625_p11), [#allocation7], 1088  }
  0x6c   : > { %5066 = vsyncadd (%p6625_p11), [#allocation7], 4294966208  ;;  %vm1040_vm0 = vcmask 1042432   ;;  %vm1041_vm1 = vcmask 1046532   ;;  %v4865_v1 = vld [vmem:[%s5327_s21 + $0x6c] sm:$0xff]   ;;  %s5100_s22 = smov 12  }
  0x6d   : > { %vm5337_vm2 = vmor %vm1040_vm0, %vm1041_vm1  ;;  %v4866_v2 = vld [vmem:[%s5327_s21 + $0xc] sm:$0xff]   ;;  %1397 = vrot.lane.b32.xlu1 %v4865_v1, %s5100_s22  ;;  %v968_v3 = vld [vmem:[%s5327_s21 + $0x60] sm:$0xe]  ;;  %vm444_vm3 = vsmask.f32 3328  ;;  %s5101_s20 = smov 8  }
  0x6e   : > { %v969_v4 = vld [vmem:[%s5327_s21 + $0x64] sm:$0xf]  ;;  %v970_v5 = vld [vmem:[%s5327_s21 + $0x68] sm:$0x1]  ;;  %1381 = vrot.lane.b32.xlu0 %v4866_v2, %s5100_s22  ;;  %v4098_v6 = vrot.slane %v968_v3, 9  ;;  %s5102_s24 = smov 4  }
  0x6f   : > { %v1101_v7 = vrot.slane %v969_v4, 5  ;;  %v1104_v8 = vrot.slane %v970_v5, 5  ;;  %v944_v9 = vld [vmem:[%s5327_s21] sm:$0xe]  ;;  %v945_v10 = vld [vmem:[%s5327_s21 + $0x4] sm:$0xf] }
  0x70   : > { %v946_v11 = vld [vmem:[%s5327_s21 + $0x8] sm:$0x1]  ;;  %v4090_v12 = vrot.slane %v944_v9, 9  ;;  %v1045_v15 = vrot.slane %v945_v10, 5  ;;  %v971_v17 = vld [vmem:[%s5327_s21 + $0x6c] sm:$0xe] }
  0x71   : > { %v1102_v13 = vsel %vm5337_vm2, %v4098_v6, %v1101_v7  ;;  %v1103_v14 = vrot.slane %v1101_v7, 4  ;;  %v1048_v16 = vrot.slane %v946_v11, 5  ;;  %vm445_vm4 = vsmask.f32 7440  ;;  %v972_v18 = vld [vmem:[%s5327_s21 + $0x70] sm:$0xf] }
  0x72   : > { %v973_v19 = vld [vmem:[%s5327_s21 + $0x74] sm:$0x1]  ;;  %v4099_v20 = vrot.slane %v971_v17, 9  ;;  %v1046_v22 = vsel %vm5337_vm2, %v4090_v12, %v1045_v15  ;;  %v1047_v23 = vrot.slane %v1045_v15, 4  ;;  %v1108_v24 = vrot.slane %v972_v18, 5  ;;  %vm5387_vm5 = vmor %vm444_vm3, %vm445_vm4  ;;  %s5103_s11 = smov 16  }
  0x73   : > { %v1105_v21 = vsel %vm5337_vm2, %v1103_v14, %v1104_v8  ;;  %v947_v25 = vld [vmem:[%s5327_s21 + $0xc] sm:$0xe]  ;;  %v948_v26 = vld [vmem:[%s5327_s21 + $0x10] sm:$0xf]  ;;  %v1111_v28 = vrot.slane %v973_v19, 5  ;;  %s5104_s18 = smov 20  }
  0x74   : > { %v4114_v27 = vcombine.low %v1102_v13, %v1105_v21  ;;  %v949_v29 = vld [vmem:[%s5327_s21 + $0x14] sm:$0x1]  ;;  %v4091_v30 = vrot.slane %v947_v25, 9  ;;  %v1052_v31 = vrot.slane %v948_v26, 5  ;;  %v1049_v32 = vsel %vm5337_vm2, %v1047_v23, %v1048_v16  ;;  %v399_v36 = vld [vmem:[%s5327_s21 + $0xc] sm:$0xf] }
  0x75   : > { %v1109_v33 = vsel %vm5337_vm2, %v4099_v20, %v1108_v24  ;;  %v1110_v34 = vrot.slane %v1108_v24, 4  ;;  %v1055_v35 = vrot.slane %v949_v29, 5  ;;  %v400_v37 = vld [vmem:[%s5327_s21 + $0x10] sm:$0xf]  ;;  %v4106_v38 = vcombine.low %v1046_v22, %v1049_v32  ;;  %v401_v41 = vld [vmem:[%s5327_s21 + $0x14] sm:$0x1] }
  0x76   : > { %1219 = vrot.lane.b32.xlu1 %v4114_v27, %s5101_s20  ;;  %v1053_v39 = vsel %vm5337_vm2, %v4091_v30, %v1052_v31  ;;  %v1054_v40 = vrot.slane %v1052_v31, 4  ;;  %v472_v42 = vshrl.u32 %v399_v36, 16  ;;  %v396_v43 = vld [vmem:[%s5327_s21] sm:$0xf]  ;;  %v475_v45 = vshll.u32 %v399_v36, 16  ;;  %s5105_s4 = smov 24  }
  0x77   : > { %v1112_v44 = vsel %vm5337_vm2, %v1110_v34, %v1111_v28  ;;  %v481_v46 = vshll.u32 %v400_v37, 16  ;;  %v485_v47 = vshrl.u32 %v400_v37, 16  ;;  %v397_v48 = vld [vmem:[%s5327_s21 + $0x4] sm:$0xf]  ;;  %1203 = vrot.lane.b32.xlu0 %v4106_v38, %s5101_s20  ;;  %v491_v52 = vshll.u32 %v401_v41, 16  ;;  %s5106_s8 = smov 28  }
  0x78   : > { %v4115_v49 = vcombine.low %v1109_v33, %v1112_v44  ;;  %v1056_v50 = vsel %vm5337_vm2, %v1054_v40, %v1055_v35  ;;  %v474_v51 = vrot.slane %v472_v42, 4  ;;  %v398_v53 = vld [vmem:[%s5327_s21 + $0x8] sm:$0x1]  ;;  %v477_v55 = vrot.slane %v475_v45, 5  ;;  %v423_v58 = vld [vmem:[%s5327_s21 + $0x6c] sm:$0xf] }
  0x79   : > { %v4107_v54 = vcombine.low %v1053_v39, %v1056_v50  ;;  %v483_v56 = vrot.slane %v481_v46, 5  ;;  %v487_v57 = vrot.slane %v485_v47, 4  ;;  %v493_v59 = vrot.slane %v491_v52, 5  ;;  %v424_v4 = vld [vmem:[%s5327_s21 + $0x70] sm:$0xf]  ;;  %s5107_s9 = smov 32  }
  0x7a   : > { %1221 = vrot.lane.b32.xlu1 %v4115_v49, %s5101_s20  ;;  %v448_v60 = vshrl.u32 %v396_v43, 16  ;;  %v451_v61 = vshll.u32 %v396_v43, 16  ;;  %v457_v62 = vshll.u32 %v397_v48, 16  ;;  %v478_v63 = vor.u32 %v477_v55, %v474_v51  ;;  %v425_v9 = vld [vmem:[%s5327_s21 + $0x74] sm:$0x1]  ;;  %s4057_s10 = sshll.u32 %s5323_s28, 7 }
  0x7b   : > { %v488_v1 = vor.u32 %v487_v57, %v483_v56  ;;  %v461_v2 = vshrl.u32 %v397_v48, 16  ;;  %v467_v3 = vshll.u32 %v398_v53, 16  ;;  %1205 = vrot.lane.b32.xlu0 %v4107_v54, %s5101_s20  ;;  %v664_v10 = vshrl.u32 %v423_v58, 16  ;;  %v420_v11 = vld [vmem:[%s5327_s21 + $0x60] sm:$0xf]  ;;  %s6453_s30 = scalar_lea.vmem [#allocation9], %s4057_s10 }
  0x7c   : > { %v450_v6 = vrot.slane %v448_v60, 4  ;;  %v453_v7 = vrot.slane %v451_v61, 5  ;;  %v459_v8 = vrot.slane %v457_v62, 5  ;;  %v479_v12 = vrot.slane %v478_v63, 4  ;;  %v421_v16 = vld [vmem:[%s5327_s21 + $0x64] sm:$0xf] }
  0x7d   : > { %v489_v13 = vrot.slane %v488_v1, 4  ;;  %v463_v14 = vrot.slane %v461_v2, 4  ;;  %v469_v15 = vrot.slane %v467_v3, 5  ;;  %v666_v18 = vrot.slane %v664_v10, 4  ;;  %v422_v35 = vld [vmem:[%s5327_s21 + $0x68] sm:$0x1] }
  0x7e   : > { %v454_v17 = vor.u32 %v453_v7, %v450_v6  ;;  %v667_v19 = vshll.u32 %v423_v58, 16  ;;  %v673_v20 = vshll.u32 %v424_v4, 16  ;;  %v484_v21 = vsel %vm5387_vm5, %v479_v12, %v483_v56  ;;  %v4194_v38 = vld [vmem:[%s5327_s21 + $0x6c] sm:$0xf]  ;;  %v4195_v43 = vld [vmem:[%s5327_s21 + $0x70] sm:$0xf] }
  0x7f   : > { %v494_v22 = vsel %vm5387_vm5, %v489_v13, %v493_v59  ;;  %v464_v23 = vor.u32 %v463_v14, %v459_v8  ;;  %v677_v24 = vshrl.u32 %v424_v4, 16  ;;  %v683_v31 = vshll.u32 %v425_v9, 16  ;;  %v4196_v54 = vld [vmem:[%s5327_s21 + $0x74] sm:$0x1]  ;;  %v4170_v57 = vld [vmem:[%s5327_s21 + $0xc] sm:$0xf] }
  0x80   : > { %v4075_v25 = vcombine.low %v484_v21, %v494_v22  ;;  %v455_v26 = vrot.slane %v454_v17, 4  ;;  %v669_v27 = vrot.slane %v667_v19, 5  ;;  %v675_v28 = vrot.slane %v673_v20, 5  ;;  %v4171_v62 = vld [vmem:[%s5327_s21 + $0x10] sm:$0xf]  ;;  %v4867_v6 = vld [vmem:[%s5327_s21 + $0x78] sm:$0xff]  }
  0x81   : > { %v465_v29 = vrot.slane %v464_v23, 4  ;;  %v679_v30 = vrot.slane %v677_v24, 4  ;;  %v640_v32 = vshrl.u32 %v420_v11, 16  ;;  %v643_v36 = vshll.u32 %v420_v11, 16  ;;  %v4172_v12 = vld [vmem:[%s5327_s21 + $0x14] sm:$0x1] }
  0x82   : > { %881 = vrot.lane.b32.xlu1 %v4075_v25, %s5102_s24  ;;  %v460_v33 = vsel %vm5387_vm5, %v455_v26, %v459_v8  ;;  %v670_v34 = vor.u32 %v669_v27, %v666_v18  ;;  %v649_v37 = vshll.u32 %v421_v16, 16  ;;  %v685_v41 = vrot.slane %v683_v31, 5  ;;  %v4198_v27 = vld [vmem:[%s5327_s21 + $0x7c] sm:$0xf]  ;;  %s4583_s26 = sshll.u32 %s5085_s15, 11  ;;  %s3945_s25 = sshll.u32 %s6453_s30, 4  ;;  %s6555_s25 = int_to_ptr.vmem [resolvable:$true] %s3945_s25 }
  0x83   : > { %v470_v39 = vsel %vm5387_vm5, %v465_v29, %v469_v15  ;;  %v680_v40 = vor.u32 %v679_v30, %v675_v28  ;;  %v642_v42 = vrot.slane %v640_v32, 4  ;;  %v645_v46 = vrot.slane %v643_v36, 5  ;;  %v4197_v15 = vld [vmem:[%s5327_s21 + $0x78] sm:$0xf]  ;;  %s6553_s6 = scalar_lea.hbm %s6611_s3, %s4583_s26  ;;  %s3931_s7 = scalar_lea.sflag [#allocation5], %s5323_s28 }
  0x84   : > { %v4074_v44 = vcombine.low %v460_v33, %v470_v39  ;;  %v671_v45 = vrot.slane %v670_v34, 4  ;;  %v651_v47 = vrot.slane %v649_v37, 5  ;;  %v653_v49 = vshrl.u32 %v421_v16, 16  ;;  %v4199_v33 = vld [vmem:[%s5327_s21 + $0x80] sm:$0x1]  ;;  %p6630_p12 = scmp.ne.s32.totalorder %s6622_s27, 0 }
  0x85   : > { %v681_v48 = vrot.slane %v680_v40, 4  ;;  %v659_v50 = vshll.u32 %v422_v35, 16  ;;  %v1687_v51 = vshrl.u32 %v4194_v38, 16  ;;  %v646_v53 = vor.u32 %v645_v46, %v642_v42  ;;  %v4173_v34 = vld [vmem:[%s5327_s21 + $0x18] sm:$0xf] }
  0x86   : > { %879 = vrot.lane.b32.xlu0 %v4074_v44, %s5102_s24  ;;  %v676_v52 = vsel %vm5387_vm5, %v671_v45, %v675_v28  ;;  %v1690_v55 = vshll.u32 %v4194_v38, 16  ;;  %v1696_v56 = vshll.u32 %v4195_v43, 16  ;;  %v655_v59 = vrot.slane %v653_v49, 4  ;;  %v4174_v39 = vld [vmem:[%s5327_s21 + $0x1c] sm:$0xf] }
  0x87   : > { %v686_v58 = vsel %vm5387_vm5, %v681_v48, %v685_v41  ;;  %v661_v60 = vrot.slane %v659_v50, 5  ;;  %v1689_v61 = vrot.slane %v1687_v51, 4  ;;  %v647_v1 = vrot.slane %v646_v53, 4  ;;  %v4868_v40 = vld [vmem:[%s5327_s21 + $0x18] sm:$0xff]   ;;  %v4175_v45 = vld [vmem:[%s5327_s21 + $0x20] sm:$0x1] }
  0x88   : > { %v4083_v63 = vcombine.low %v676_v52, %v686_v58  ;;  %v1692_v2 = vrot.slane %v1690_v55, 5  ;;  %v1698_v3 = vrot.slane %v1696_v56, 5  ;;  %v656_v4 = vor.u32 %v655_v59, %v651_v47  ;;  %v4258_v50 = vld [vmem:[%s5327_s21 + $0x6c] sm:$0xe]  ;;  %v4259_v55 = vld [vmem:[%s5327_s21 + $0x70] sm:$0xf] }
  0x89   : > { %v1700_v7 = vshrl.u32 %v4195_v43, 16  ;;  %v1706_v8 = vshll.u32 %v4196_v54, 16  ;;  %v1495_v9 = vshrl.u32 %v4170_v57, 16  ;;  %v652_v10 = vsel %vm5387_vm5, %v647_v1, %v651_v47 }
  0x8a   : > { %897 = vrot.lane.b32.xlu1 %v4083_v63, %s5102_s24  ;;  %v1693_v11 = vor.u32 %v1692_v2, %v1689_v61  ;;  %v1498_v13 = vshll.u32 %v4170_v57, 16  ;;  %v1504_v14 = vshll.u32 %v4171_v62, 16  ;;  %v657_v16 = vrot.slane %v656_v4, 4  ;;  %v4234_v61 = vld [vmem:[%s5327_s21 + $0xc] sm:$0xe] }
  0x8b   : > { %v1702_v17 = vrot.slane %v1700_v7, 4  ;;  %v1708_v18 = vrot.slane %v1706_v8, 5  ;;  %v1497_v19 = vrot.slane %v1495_v9, 4  ;;  %v1508_v23 = vshrl.u32 %v4171_v62, 16  ;;  %v4236_v9 = vld [vmem:[%s5327_s21 + $0x14] sm:$0x1] }
  0x8c   : > { %v1694_v20 = vrot.slane %v1693_v11, 4  ;;  %v1500_v21 = vrot.slane %v1498_v13, 5  ;;  %v1506_v22 = vrot.slane %v1504_v14, 5  ;;  %v662_v24 = vsel %vm5387_vm5, %v657_v16, %v661_v60  ;;  %v4260_v60 = vld [vmem:[%s5327_s21 + $0x74] sm:$0x1] }
  0x8d   : > { %v1703_v25 = vor.u32 %v1702_v17, %v1698_v3  ;;  %v1514_v26 = vshll.u32 %v4172_v12, 16  ;;  %v1711_v28 = vshrl.u32 %v4197_v15, 16  ;;  %v4082_v29 = vcombine.low %v652_v10, %v662_v24 }
  0x8e   : > { %1399 = vrot.lane.b32.xlu1 %v4867_v6, %s5100_s22  ;;  %v1699_v30 = vsel %vm5387_vm5, %v1694_v20, %v1698_v3  ;;  %v1501_v31 = vor.u32 %v1500_v21, %v1497_v19  ;;  %v1510_v32 = vrot.slane %v1508_v23, 4  ;;  %v1714_v38 = vshll.u32 %v4197_v15, 16  ;;  %v4235_v3 = vld [vmem:[%s5327_s21 + $0x10] sm:$0xf] }
  0x8f   : > { %v1704_v35 = vrot.slane %v1703_v25, 4  ;;  %v1516_v36 = vrot.slane %v1514_v26, 5  ;;  %v1713_v37 = vrot.slane %v1711_v28, 4  ;;  %895 = vrot.lane.b32.xlu0 %v4082_v29, %s5102_s24  ;;  %v1720_v43 = vshll.u32 %v4198_v27, 16  ;;  %v4263_v28 = vld [vmem:[%s5327_s21 + $0x80] sm:$0x1] }
  0x90   : > { %v1502_v41 = vrot.slane %v1501_v31, 4  ;;  %v1511_v42 = vor.u32 %v1510_v32, %v1506_v22  ;;  %v1724_v44 = vshrl.u32 %v4198_v27, 16  ;;  %v1716_v47 = vrot.slane %v1714_v38, 5  ;;  %v4262_v27 = vld [vmem:[%s5327_s21 + $0x7c] sm:$0xf] }
  0x91   : > { %v1709_v46 = vsel %vm5387_vm5, %v1704_v35, %v1708_v18  ;;  %v1730_v48 = vshll.u32 %v4199_v33, 16  ;;  %v1519_v49 = vshrl.u32 %v4173_v34, 16  ;;  %v1722_v54 = vrot.slane %v1720_v43, 5  ;;  %v4237_v33 = vld [vmem:[%s5327_s21 + $0x18] sm:$0xe] }
  0x92   : > { %v4226_v51 = vcombine.low %v1699_v30, %v1709_v46  ;;  %v1507_v52 = vsel %vm5387_vm5, %v1502_v41, %v1506_v22  ;;  %v1512_v53 = vrot.slane %v1511_v42, 4  ;;  %v1717_v56 = vor.u32 %v1716_v47, %v1713_v37  ;;  %v4261_v22 = vld [vmem:[%s5327_s21 + $0x78] sm:$0xe]  ;;  %v4238_v38 = vld [vmem:[%s5327_s21 + $0x1c] sm:$0xf] }
  0x93   : > { %v1726_v57 = vrot.slane %v1724_v44, 4  ;;  %v1732_v58 = vrot.slane %v1730_v48, 5  ;;  %v1521_v59 = vrot.slane %v1519_v49, 4  ;;  %1383 = vrot.lane.b32.xlu0 %v4868_v40, %s5100_s22  ;;  %v1522_v63 = vshll.u32 %v4173_v34, 16  ;;  %v4386_v44 = vld [vmem:[%s5327_s21 + $0x78] sm:$0xf] }
  0x94   : > { %1942 = vrot.lane.b32.xlu1 %v4226_v51, %s5103_s11  ;;  %v1517_v62 = vsel %vm5387_vm5, %v1512_v53, %v1516_v36  ;;  %v1528_v1 = vshll.u32 %v4174_v39, 16  ;;  %v1532_v2 = vshrl.u32 %v4174_v39, 16  ;;  %v1718_v6 = vrot.slane %v1717_v56, 4  ;;  %v4239_v39 = vld [vmem:[%s5327_s21 + $0x20] sm:$0x1] }
  0x95   : > { %v4218_v4 = vcombine.low %v1507_v52, %v1517_v62  ;;  %v1727_v7 = vor.u32 %v1726_v57, %v1722_v54  ;;  %v1538_v8 = vshll.u32 %v4175_v45, 16  ;;  %v1524_v10 = vrot.slane %v1522_v63, 5  ;;  %v4387_v45 = vld [vmem:[%s5327_s21 + $0x7c] sm:$0xf] }
  0x96   : > { %v1530_v11 = vrot.slane %v1528_v1, 5  ;;  %v1534_v12 = vrot.slane %v1532_v2, 4  ;;  %v4290_v13 = vrot.slane %v4258_v50, 9  ;;  %v1723_v14 = vsel %vm5387_vm5, %v1718_v6, %v1722_v54  ;;  %v4388_v54 = vld [vmem:[%s5327_s21 + $0x80] sm:$0x1] }
  0x97   : > { %v1728_v15 = vrot.slane %v1727_v7, 4  ;;  %v1540_v16 = vrot.slane %v1538_v8, 5  ;;  %v2145_v17 = vrot.slane %v4259_v55, 5  ;;  %1926 = vrot.lane.b32.xlu0 %v4218_v4, %s5103_s11  ;;  %v1525_v18 = vor.u32 %v1524_v10, %v1521_v59  ;;  %v4362_v59 = vld [vmem:[%s5327_s21 + $0x18] sm:$0xf] }
  0x98   : > { %v1535_v19 = vor.u32 %v1534_v12, %v1530_v11  ;;  %v2148_v20 = vrot.slane %v4260_v60, 5  ;;  %v4282_v21 = vrot.slane %v4234_v61, 9  ;;  %v2089_v26 = vrot.slane %v4235_v3, 5  ;;  %v4363_v1 = vld [vmem:[%s5327_s21 + $0x1c] sm:$0xf] }
  0x99   : > { %v1733_v23 = vsel %vm5387_vm5, %v1728_v15, %v1732_v58  ;;  %v2146_v24 = vsel %vm5337_vm2, %v4290_v13, %v2145_v17  ;;  %v2147_v25 = vrot.slane %v2145_v17, 4  ;;  %v1526_v30 = vrot.slane %v1525_v18, 4  ;;  %v4364_v10 = vld [vmem:[%s5327_s21 + $0x20] sm:$0x1]  ;;  %v4869_v17 = vld [vmem:[%s5327_s21 + $0x78] sm:$0xff]  }
  0x9a   : > { %v4227_v29 = vcombine.low %v1723_v14, %v1733_v23  ;;  %v1536_v31 = vrot.slane %v1535_v19, 4  ;;  %v2092_v32 = vrot.slane %v4236_v9, 5  ;;  %v2090_v35 = vsel %vm5337_vm2, %v4282_v21, %v2089_v26 }
  0x9b   : > { %v2149_v34 = vsel %vm5337_vm2, %v2147_v25, %v2148_v20  ;;  %v2091_v36 = vrot.slane %v2089_v26, 4  ;;  %v4291_v37 = vrot.slane %v4261_v22, 9  ;;  %v1531_v40 = vsel %vm5387_vm5, %v1526_v30, %v1530_v11  ;;  %v4390_v22 = vld [vmem:[%s5327_s21 + $0x88] sm:$0xf] }
  0x9c   : > { %1944 = vrot.lane.b32.xlu1 %v4227_v29, %s5103_s11  ;;  %v1541_v41 = vsel %vm5387_vm5, %v1536_v31, %v1540_v16  ;;  %v4306_v42 = vcombine.low %v2146_v24, %v2149_v34  ;;  %v2152_v43 = vrot.slane %v4262_v27, 5  ;;  %v2155_v48 = vrot.slane %v4263_v28, 5  ;;  %v4389_v16 = vld [vmem:[%s5327_s21 + $0x84] sm:$0xf]  ;;  %v4870_v27 = vld [vmem:[%s5327_s21 + $0x18] sm:$0xff]  }
  0x9d   : > { %v4219_v46 = vcombine.low %v1531_v40, %v1541_v41  ;;  %v2093_v47 = vsel %vm5337_vm2, %v2091_v36, %v2092_v32  ;;  %v4283_v49 = vrot.slane %v4237_v33, 9  ;;  %v2096_v53 = vrot.slane %v4238_v38, 5  ;;  %v4871_v38 = vld [vmem:[%s5327_s21 + $0x84] sm:$0xff]  }
  0x9e   : > { %v4298_v50 = vcombine.low %v2090_v35, %v2093_v47  ;;  %v2153_v51 = vsel %vm5337_vm2, %v4291_v37, %v2152_v43  ;;  %v2154_v52 = vrot.slane %v2152_v43, 4  ;;  %v2099_v55 = vrot.slane %v4239_v39, 5  ;;  %v4391_v35 = vld [vmem:[%s5327_s21 + $0x8c] sm:$0x1]  ;;  %v4365_v37 = vld [vmem:[%s5327_s21 + $0x24] sm:$0xf] }
  0x9f   : > { %1928 = vrot.lane.b32.xlu0 %v4219_v46, %s5103_s11  ;;  %v2731_v56 = vshrl.u32 %v4386_v44, 16  ;;  %v2734_v57 = vshll.u32 %v4386_v44, 16  ;;  %v2740_v58 = vshll.u32 %v4387_v45, 16  ;;  %v2097_v61 = vsel %vm5337_vm2, %v4283_v49, %v2096_v53  ;;  %v4366_v43 = vld [vmem:[%s5327_s21 + $0x28] sm:$0xf] }
  0xa0   : > { %2263 = vrot.lane.b32.xlu1 %v4306_v42, %s5104_s18  ;;  %v2156_v60 = vsel %vm5337_vm2, %v2154_v52, %v2155_v48  ;;  %v2098_v62 = vrot.slane %v2096_v53, 4  ;;  %v2744_v63 = vshrl.u32 %v4387_v45, 16  ;;  %v2750_v9 = vshll.u32 %v4388_v54, 16  ;;  %v4367_v48 = vld [vmem:[%s5327_s21 + $0x2c] sm:$0x1]  ;;  %v4872_v54 = vld [vmem:[%s5327_s21 + $0x24] sm:$0xff]  }
  0xa1   : > { %v4307_v2 = vcombine.low %v2153_v51, %v2156_v60  ;;  %v2733_v3 = vrot.slane %v2731_v56, 4  ;;  %v2736_v4 = vrot.slane %v2734_v57, 5  ;;  %v2742_v6 = vrot.slane %v2740_v58, 5  ;;  %v4450_v53 = vld [vmem:[%s5327_s21 + $0x78] sm:$0xe] }
  0xa2   : > { %v2100_v7 = vsel %vm5337_vm2, %v2098_v62, %v2099_v55  ;;  %v2746_v8 = vrot.slane %v2744_v63, 4  ;;  %v2539_v11 = vshrl.u32 %v4362_v59, 16  ;;  %v2542_v14 = vshll.u32 %v4362_v59, 16  ;;  %v4451_v59 = vld [vmem:[%s5327_s21 + $0x7c] sm:$0xf] }
  0xa3   : > { %2247 = vrot.lane.b32.xlu0 %v4298_v50, %s5104_s18  ;;  %v4299_v12 = vcombine.low %v2097_v61, %v2100_v7  ;;  %v2737_v13 = vor.u32 %v2736_v4, %v2733_v3  ;;  %v2548_v15 = vshll.u32 %v4363_v1, 16  ;;  %v2752_v19 = vrot.slane %v2750_v9, 5  ;;  %v4427_v9 = vld [vmem:[%s5327_s21 + $0x1c] sm:$0xf] }
  0xa4   : > { %2265 = vrot.lane.b32.xlu1 %v4307_v2, %s5104_s18  ;;  %v2747_v18 = vor.u32 %v2746_v8, %v2742_v6  ;;  %v2541_v20 = vrot.slane %v2539_v11, 4  ;;  %v2552_v21 = vshrl.u32 %v4363_v1, 16  ;;  %v2544_v24 = vrot.slane %v2542_v14, 5  ;;  %v4452_v1 = vld [vmem:[%s5327_s21 + $0x80] sm:$0x1]  ;;  %v4889_v2 = vld [vmem:[#allocation6] sm:$0xff]  }
  0xa5   : > { %v2738_v23 = vrot.slane %v2737_v13, 4  ;;  %v2550_v25 = vrot.slane %v2548_v15, 5  ;;  %v2558_v26 = vshll.u32 %v4364_v10, 16  ;;  %v2755_v30 = vshrl.u32 %v4389_v16, 16  ;;  %v4426_v8 = vld [vmem:[%s5327_s21 + $0x18] sm:$0xe]  ;;  %4703 = vmatprep.subr.bf16.mxu0 %v4889_v2  ;;  %4751 = vmatprep.subr.bf16.mxu1 %v4889_v2 }
  0xa6   : > { %v2748_v28 = vrot.slane %v2747_v18, 4  ;;  %v2554_v29 = vrot.slane %v2552_v21, 4  ;;  %v2758_v31 = vshll.u32 %v4389_v16, 16  ;;  %v2545_v33 = vor.u32 %v2544_v24, %v2541_v20  ;;  %v4428_v18 = vld [vmem:[%s5327_s21 + $0x20] sm:$0x1]  ;;  %4704 = vmatpush3.bf16.msra.mxu0 %v4889_v2  ;;  %4759 = vmatpush3.bf16.msra.mxu1 %v4889_v2 }
  0xa7   : > { %2249 = vrot.lane.b32.xlu0 %v4299_v12, %s5104_s18  ;;  %v2743_v32 = vsel %vm5387_vm5, %v2738_v23, %v2742_v6  ;;  %v2560_v34 = vrot.slane %v2558_v26, 5  ;;  %v2764_v36 = vshll.u32 %v4390_v22, 16  ;;  %v2757_v41 = vrot.slane %v2755_v30, 4  ;;  %v426_v23 = vld [vmem:[%s5327_s21 + $0x78] sm:$0xf] }
  0xa8   : > { %2441 = vrot.lane.b32.xlu1 %v4869_v17, %s5105_s4  ;;  %v2753_v39 = vsel %vm5387_vm5, %v2748_v28, %v2752_v19  ;;  %v2555_v40 = vor.u32 %v2554_v29, %v2550_v25  ;;  %v2760_v42 = vrot.slane %v2758_v31, 5  ;;  %v2546_v45 = vrot.slane %v2545_v33, 4  ;;  %v427_v28 = vld [vmem:[%s5327_s21 + $0x7c] sm:$0xf]  ;;  %v428_v33 = vld [vmem:[%s5327_s21 + $0x80] sm:$0x1] }
  0xa9   : > { %v4418_v44 = vcombine.low %v2743_v32, %v2753_v39  ;;  %v2766_v46 = vrot.slane %v2764_v36, 5  ;;  %v2768_v47 = vshrl.u32 %v4390_v22, 16  ;;  %v2774_v51 = vshll.u32 %v4391_v35, 16  ;;  %v403_v39 = vld [vmem:[%s5327_s21 + $0x1c] sm:$0xf] }
  0xaa   : > { %v2556_v49 = vrot.slane %v2555_v40, 4  ;;  %v2761_v50 = vor.u32 %v2760_v42, %v2757_v41  ;;  %v2563_v52 = vshrl.u32 %v4365_v37, 16  ;;  %v2551_v55 = vsel %vm5387_vm5, %v2546_v45, %v2550_v25  ;;  %v4890_v45 = vld [vmem:[#allocation6 + $0x8] sm:$0xff]  }
  0xab   : > { %2425 = vrot.lane.b32.xlu0 %v4870_v27, %s5105_s4  ;;  %v2770_v56 = vrot.slane %v2768_v47, 4  ;;  %v2566_v57 = vshll.u32 %v4365_v37, 16  ;;  %v2572_v58 = vshll.u32 %v4366_v43, 16  ;;  %v2776_v62 = vrot.slane %v2774_v51, 5  ;;  %4705 = vmatprep.subr.bf16.mxu0 %v4890_v45 }
  0xac   : > { %2443 = vrot.lane.b32.xlu1 %v4871_v38, %s5105_s4  ;;  %v2561_v60 = vsel %vm5387_vm5, %v2556_v49, %v2560_v34  ;;  %v2762_v61 = vrot.slane %v2761_v50, 4  ;;  %v2565_v63 = vrot.slane %v2563_v52, 4  ;;  %v2576_v11 = vshrl.u32 %v4366_v43, 16  ;;  %v402_v38 = vld [vmem:[%s5327_s21 + $0x18] sm:$0xf]  ;;  %4752 = vmatprep.subr.bf16.mxu1 %v4890_v45 }
  0xad   : > { %v4410_v3 = vcombine.low %v2551_v55, %v2561_v60  ;;  %v2771_v4 = vor.u32 %v2770_v56, %v2766_v46  ;;  %v2568_v6 = vrot.slane %v2566_v57, 5  ;;  %v2574_v7 = vrot.slane %v2572_v58, 5  ;;  %v4453_v50 = vld [vmem:[%s5327_s21 + $0x84] sm:$0xe]  ;;  %v4454_v55 = vld [vmem:[%s5327_s21 + $0x88] sm:$0xf]  ;;  %4706 = vmatpush3.bf16.msra.mxu0 %v4890_v45  ;;  %4760 = vmatpush3.bf16.msra.mxu1 %v4890_v45 }
  0xae   : > { %v2767_v10 = vsel %vm5387_vm5, %v2762_v61, %v2766_v46  ;;  %v2582_v12 = vshll.u32 %v4367_v48, 16  ;;  %v4482_v13 = vrot.slane %v4450_v53, 9  ;;  %v3189_v16 = vrot.slane %v4451_v59, 5  ;;  %v4455_v56 = vld [vmem:[%s5327_s21 + $0x8c] sm:$0x1] }
  0xaf   : > { %2427 = vrot.lane.b32.xlu0 %v4872_v54, %s5105_s4  ;;  %v2772_v14 = vrot.slane %v2771_v4, 4  ;;  %v2569_v15 = vor.u32 %v2568_v6, %v2565_v63  ;;  %v3192_v17 = vrot.slane %v4452_v1, 5  ;;  %v2578_v19 = vrot.slane %v2576_v11, 4  ;;  %v4429_v61 = vld [vmem:[%s5327_s21 + $0x24] sm:$0xe] }
  0xb0   : > { %2986 = vrot.lane.b32.xlu1 %v4418_v44, %s5106_s8  ;;  %v2584_v20 = vrot.slane %v2582_v12, 5  ;;  %v4474_v21 = vrot.slane %v4426_v8, 9  ;;  %v3133_v22 = vrot.slane %v4427_v9, 5  ;;  %v3190_v26 = vsel %vm5337_vm2, %v4482_v13, %v3189_v16  ;;  %v404_v44 = vld [vmem:[%s5327_s21 + $0x20] sm:$0x1] }
  0xb1   : > { %v2777_v24 = vsel %vm5387_vm5, %v2772_v14, %v2776_v62  ;;  %v2570_v25 = vrot.slane %v2569_v15, 4  ;;  %v3191_v27 = vrot.slane %v3189_v16, 4  ;;  %v2579_v30 = vor.u32 %v2578_v19, %v2574_v7  ;;  %v4891_v62 = vld [vmem:[#allocation6 + $0x10] sm:$0xff]  }
  0xb2   : > { %v4419_v29 = vcombine.low %v2767_v10, %v2777_v24  ;;  %v5528_v31 = vsel %vm5337_vm2, %v4474_v21, %v3133_v22  ;;  %v3135_v32 = vrot.slane %v3133_v22, 4  ;;  %v3136_v36 = vrot.slane %v4428_v18, 5  ;;  %v4430_v4 = vld [vmem:[%s5327_s21 + $0x28] sm:$0xf]  ;;  %v4431_v10 = vld [vmem:[%s5327_s21 + $0x2c] sm:$0x1]  ;;  %4707 = vmatprep.subr.bf16.mxu0 %v4891_v62  ;;  %4753 = vmatprep.subr.bf16.mxu1 %v4891_v62 }
  0xb3   : > { %2970 = vrot.lane.b32.xlu0 %v4410_v3, %s5106_s8  ;;  %v2575_v34 = vsel %vm5387_vm5, %v2570_v25, %v2574_v7  ;;  %v3193_v35 = vsel %vm5337_vm2, %v3191_v27, %v3192_v17  ;;  %v688_v37 = vshrl.u32 %v426_v23, 16  ;;  %v2580_v40 = vrot.slane %v2579_v30, 4  ;;  %v429_v15 = vld [vmem:[%s5327_s21 + $0x84] sm:$0xf]  ;;  %4708 = vmatpush3.bf16.msra.mxu0 %v4891_v62  ;;  %v430_v24 = vld [vmem:[%s5327_s21 + $0x88] sm:$0xf] }
  0xb4   : > { %2988 = vrot.lane.b32.xlu1 %v4419_v29, %s5106_s8  ;;  %v4498_v41 = vcombine.low %v3190_v26, %v3193_v35  ;;  %v691_v42 = vshll.u32 %v426_v23, 16  ;;  %v697_v43 = vshll.u32 %v427_v28, 16  ;;  %v3137_v46 = vsel %vm5337_vm2, %v3135_v32, %v3136_v36  ;;  %4761 = vmatpush3.bf16.msra.mxu1 %v4891_v62  ;;  %v4892_v25 = vld [vmem:[#allocation6 + $0x18] sm:$0xff]  }
  0xb5   : > { %v690_v47 = vrot.slane %v688_v37, 4  ;;  %v701_v48 = vshrl.u32 %v427_v28, 16  ;;  %v707_v49 = vshll.u32 %v428_v33, 16  ;;  %v2585_v51 = vsel %vm5387_vm5, %v2580_v40, %v2584_v20  ;;  %4709 = vmatprep.subr.bf16.mxu0 %v4892_v25  ;;  %4754 = vmatprep.subr.bf16.mxu1 %v4892_v25  ;;  %v431_v37 = vld [vmem:[%s5327_s21 + $0x8c] sm:$0x1] }
  0xb6   : > { %v4490_v52 = vcombine.low %v5528_v31, %v3137_v46  ;;  %v693_v53 = vrot.slane %v691_v42, 5  ;;  %v699_v54 = vrot.slane %v697_v43, 5  ;;  %v4411_v57 = vcombine.low %v2575_v34, %v2585_v51  ;;  %v405_v43 = vld [vmem:[%s5327_s21 + $0x24] sm:$0xf] }
  0xb7   : > { %v703_v58 = vrot.slane %v701_v48, 4  ;;  %v709_v59 = vrot.slane %v707_v49, 5  ;;  %v496_v60 = vshrl.u32 %v402_v38, 16  ;;  %v499_v1 = vshll.u32 %v402_v38, 16  ;;  %4710 = vmatpush3.bf16.msra.mxu0 %v4892_v25  ;;  %v407_v49 = vld [vmem:[%s5327_s21 + $0x2c] sm:$0x1] }
  0xb8   : > { %3307 = vrot.lane.b32.xlu1 %v4498_v41, %s5107_s9  ;;  %v694_v63 = vor.u32 %v693_v53, %v690_v47  ;;  %v505_v2 = vshll.u32 %v403_v39, 16  ;;  %v509_v3 = vshrl.u32 %v403_v39, 16  ;;  %2972 = vrot.lane.b32.xlu0 %v4411_v57, %s5106_s8  ;;  %v515_v8 = vshll.u32 %v404_v44, 16  ;;  %v406_v44 = vld [vmem:[%s5327_s21 + $0x28] sm:$0xf] }
  0xb9   : > { %v704_v6 = vor.u32 %v703_v58, %v699_v54  ;;  %v498_v7 = vrot.slane %v496_v60, 4  ;;  %v4483_v9 = vrot.slane %v4453_v50, 9  ;;  %v501_v12 = vrot.slane %v499_v1, 5  ;;  %4762 = vmatpush3.bf16.msra.mxu1 %v4892_v25  ;;  %v974_v50 = vld [vmem:[%s5327_s21 + $0x78] sm:$0xe] }
  0xba   : > { %v695_v11 = vrot.slane %v694_v63, 4  ;;  %v507_v13 = vrot.slane %v505_v2, 5  ;;  %v511_v14 = vrot.slane %v509_v3, 4  ;;  %v517_v17 = vrot.slane %v515_v8, 5  ;;  %v950_v3 = vld [vmem:[%s5327_s21 + $0x18] sm:$0xe] }
  0xbb   : > { %v705_v16 = vrot.slane %v704_v6, 4  ;;  %v3196_v18 = vrot.slane %v4454_v55, 5  ;;  %v3199_v19 = vrot.slane %v4455_v56, 5  ;;  %v502_v21 = vor.u32 %v501_v12, %v498_v7  ;;  %v975_v55 = vld [vmem:[%s5327_s21 + $0x7c] sm:$0xf] }
  0xbc   : > { %v700_v20 = vsel %vm5387_vm5, %v695_v11, %v699_v54  ;;  %v512_v22 = vor.u32 %v511_v14, %v507_v13  ;;  %v4475_v23 = vrot.slane %v4429_v61, 9  ;;  %3291 = vrot.lane.b32.xlu0 %v4490_v52, %s5107_s9  ;;  %v3140_v29 = vrot.slane %v4430_v4, 5  ;;  %v4895_v56 = vld [vmem:[#allocation6 + $0x20] sm:$0xff]   ;;  %v976_v61 = vld [vmem:[%s5327_s21 + $0x80] sm:$0x1] }
  0xbd   : > { %v710_v26 = vsel %vm5387_vm5, %v705_v16, %v709_v59  ;;  %v3197_v27 = vsel %vm5337_vm2, %v4483_v9, %v3196_v18  ;;  %v3198_v28 = vrot.slane %v3196_v18, 4  ;;  %v503_v31 = vrot.slane %v502_v21, 4  ;;  %4711 = vmatprep.subr.bf16.mxu0 %v4895_v56  ;;  %v951_v9 = vld [vmem:[%s5327_s21 + $0x1c] sm:$0xf]  ;;  %4755 = vmatprep.subr.bf16.mxu1 %v4895_v56  ;;  %v952_v14 = vld [vmem:[%s5327_s21 + $0x20] sm:$0x1] }
  0xbe   : > { %v4084_v30 = vcombine.low %v700_v20, %v710_v26  ;;  %v513_v32 = vrot.slane %v512_v22, 4  ;;  %v3143_v33 = vrot.slane %v4431_v10, 5  ;;  %v3141_v35 = vsel %vm5337_vm2, %v4475_v23, %v3140_v29  ;;  %4712 = vmatpush3.bf16.msra.mxu0 %v4895_v56  ;;  %4763 = vmatpush3.bf16.msra.mxu1 %v4895_v56  ;;  %v979_v25 = vld [vmem:[%s5327_s21 + $0x8c] sm:$0x1] }
  0xbf   : > { %v3200_v34 = vsel %vm5337_vm2, %v3198_v28, %v3199_v19  ;;  %v3142_v36 = vrot.slane %v3140_v29, 4  ;;  %v712_v38 = vshrl.u32 %v429_v15, 16  ;;  %v508_v39 = vsel %vm5387_vm5, %v503_v31, %v507_v13  ;;  %v977_v19 = vld [vmem:[%s5327_s21 + $0x84] sm:$0xe] }
  0xc0   : > { %899 = vrot.lane.b32.xlu1 %v4084_v30, %s5102_s24  ;;  %v518_v40 = vsel %vm5387_vm5, %v513_v32, %v517_v17  ;;  %v4499_v41 = vcombine.low %v3197_v27, %v3200_v34  ;;  %v715_v42 = vshll.u32 %v429_v15, 16  ;;  %v721_v48 = vshll.u32 %v430_v24, 16  ;;  %v953_v30 = vld [vmem:[%s5327_s21 + $0x24] sm:$0xe] }
  0xc1   : > { %v4076_v45 = vcombine.low %v508_v39, %v518_v40  ;;  %v3144_v46 = vsel %vm5337_vm2, %v3142_v36, %v3143_v33  ;;  %v714_v47 = vrot.slane %v712_v38, 4  ;;  %v725_v53 = vshrl.u32 %v430_v24, 16  ;;  %v978_v24 = vld [vmem:[%s5327_s21 + $0x88] sm:$0xf]  ;;  %v4900_v36 = vld [vmem:[#allocation6 + $0x28] sm:$0xff]  }
  0xc2   : > { %v4491_v51 = vcombine.low %v3141_v35, %v3144_v46  ;;  %v717_v52 = vrot.slane %v715_v42, 5  ;;  %v731_v54 = vshll.u32 %v431_v37, 16  ;;  %v723_v57 = vrot.slane %v721_v48, 5  ;;  %v954_v35 = vld [vmem:[%s5327_s21 + $0x28] sm:$0xf]  ;;  %4713 = vmatprep.subr.bf16.mxu0 %v4900_v36  ;;  %4756 = vmatprep.subr.bf16.mxu1 %v4900_v36 }
  0xc3   : > { %883 = vrot.lane.b32.xlu0 %v4076_v45, %s5102_s24  ;;  %v520_v58 = vshrl.u32 %v405_v43, 16  ;;  %v523_v59 = vshll.u32 %v405_v43, 16  ;;  %v529_v60 = vshll.u32 %v406_v44, 16  ;;  %v727_v63 = vrot.slane %v725_v53, 4  ;;  %v4200_v46 = vld [vmem:[%s5327_s21 + $0x84] sm:$0xf]  ;;  %4714 = vmatpush3.bf16.msra.mxu0 %v4900_v36 }
  0xc4   : > { %3309 = vrot.lane.b32.xlu1 %v4499_v41, %s5107_s9  ;;  %v718_v62 = vor.u32 %v717_v52, %v714_v47  ;;  %v733_v1 = vrot.slane %v731_v54, 5  ;;  %v533_v2 = vshrl.u32 %v406_v44, 16  ;;  %v539_v8 = vshll.u32 %v407_v49, 16  ;;  %v955_v41 = vld [vmem:[%s5327_s21 + $0x2c] sm:$0x1]  ;;  %4764 = vmatpush3.bf16.msra.mxu1 %v4900_v36 }
  0xc5   : > { %v522_v4 = vrot.slane %v520_v58, 4  ;;  %v525_v6 = vrot.slane %v523_v59, 5  ;;  %v531_v7 = vrot.slane %v529_v60, 5  ;;  %v728_v11 = vor.u32 %v727_v63, %v723_v57  ;;  %v4201_v47 = vld [vmem:[%s5327_s21 + $0x88] sm:$0xf] }
  0xc6   : > { %v719_v10 = vrot.slane %v718_v62, 4  ;;  %v535_v12 = vrot.slane %v533_v2, 4  ;;  %v4100_v13 = vrot.slane %v974_v50, 9  ;;  %v541_v16 = vrot.slane %v539_v8, 5  ;;  %v4202_v52 = vld [vmem:[%s5327_s21 + $0x8c] sm:$0x1] }
  0xc7   : > { %3293 = vrot.lane.b32.xlu0 %v4491_v51, %s5107_s9  ;;  %v526_v15 = vor.u32 %v525_v6, %v522_v4  ;;  %v1115_v17 = vrot.slane %v975_v55, 5  ;;  %v1118_v18 = vrot.slane %v976_v61, 5  ;;  %v729_v21 = vrot.slane %v728_v11, 4  ;;  %v4901_v53 = vld [vmem:[#allocation6 + $0x30] sm:$0xff]  }
  0xc8   : > { %v724_v20 = vsel %vm5387_vm5, %v719_v10, %v723_v57  ;;  %v536_v22 = vor.u32 %v535_v12, %v531_v7  ;;  %v4092_v23 = vrot.slane %v950_v3, 9  ;;  %v1059_v29 = vrot.slane %v951_v9, 5  ;;  %v4176_v58 = vld [vmem:[%s5327_s21 + $0x24] sm:$0xf]  ;;  %v4177_v59 = vld [vmem:[%s5327_s21 + $0x28] sm:$0xf]  ;;  %4715 = vmatprep.subr.bf16.mxu0 %v4901_v53  ;;  %4757 = vmatprep.subr.bf16.mxu1 %v4901_v53 }
  0xc9   : > { %v527_v26 = vrot.slane %v526_v15, 4  ;;  %v1116_v27 = vsel %vm5337_vm2, %v4100_v13, %v1115_v17  ;;  %v1117_v28 = vrot.slane %v1115_v17, 4  ;;  %v734_v31 = vsel %vm5387_vm5, %v729_v21, %v733_v1  ;;  %v4178_v1 = vld [vmem:[%s5327_s21 + $0x2c] sm:$0x1]  ;;  %4716 = vmatpush3.bf16.msra.mxu0 %v4901_v53  ;;  %4765 = vmatpush3.bf16.msra.mxu1 %v4901_v53 }
  0xca   : > { %v537_v32 = vrot.slane %v536_v22, 4  ;;  %v1062_v33 = vrot.slane %v952_v14, 5  ;;  %v4101_v34 = vrot.slane %v977_v19, 9  ;;  %v4085_v37 = vcombine.low %v724_v20, %v734_v31 }
  0xcb   : > { %v532_v38 = vsel %vm5387_vm5, %v527_v26, %v531_v7  ;;  %v1119_v39 = vsel %vm5337_vm2, %v1117_v28, %v1118_v18  ;;  %v1060_v40 = vsel %vm5337_vm2, %v4092_v23, %v1059_v29  ;;  %v1061_v44 = vrot.slane %v1059_v29, 4  ;;  %v4203_v7 = vld [vmem:[%s5327_s21 + $0x90] sm:$0xf]  ;;  %v4874_v26 = vld [vmem:[%s5327_s21 + $0x24] sm:$0xff]  }
  0xcc   : > { %v542_v42 = vsel %vm5387_vm5, %v537_v32, %v541_v16  ;;  %v4116_v43 = vcombine.low %v1116_v27, %v1119_v39  ;;  %v1122_v45 = vrot.slane %v978_v24, 5  ;;  %901 = vrot.lane.b32.xlu1 %v4085_v37, %s5102_s24  ;;  %v1125_v49 = vrot.slane %v979_v25, 5  ;;  %v4204_v24 = vld [vmem:[%s5327_s21 + $0x94] sm:$0xf]  ;;  %v4873_v25 = vld [vmem:[%s5327_s21 + $0x84] sm:$0xff]  }
  0xcd   : > { %v4077_v48 = vcombine.low %v532_v38, %v542_v42  ;;  %v4093_v50 = vrot.slane %v953_v30, 9  ;;  %v1066_v51 = vrot.slane %v954_v35, 5  ;;  %v1063_v54 = vsel %vm5337_vm2, %v1061_v44, %v1062_v33  ;;  %v4205_v35 = vld [vmem:[%s5327_s21 + $0x98] sm:$0x1] }
  0xce   : > { %v1123_v55 = vsel %vm5337_vm2, %v4101_v34, %v1122_v45  ;;  %v1124_v56 = vrot.slane %v1122_v45, 4  ;;  %v1069_v57 = vrot.slane %v955_v41, 5  ;;  %v4108_v60 = vcombine.low %v1060_v40, %v1063_v54  ;;  %v4179_v40 = vld [vmem:[%s5327_s21 + $0x30] sm:$0xf] }
  0xcf   : > { %885 = vrot.lane.b32.xlu0 %v4077_v48, %s5102_s24  ;;  %v1067_v61 = vsel %vm5337_vm2, %v4093_v50, %v1066_v51  ;;  %v1068_v62 = vrot.slane %v1066_v51, 4  ;;  %v1735_v63 = vshrl.u32 %v4200_v46, 16  ;;  %v1738_v3 = vshll.u32 %v4200_v46, 16  ;;  %v4904_v41 = vld [vmem:[#allocation6 + $0x38] sm:$0xff]  }
  0xd0   : > { %v1126_v2 = vsel %vm5337_vm2, %v1124_v56, %v1125_v49  ;;  %v1744_v4 = vshll.u32 %v4201_v47, 16  ;;  %v1748_v6 = vshrl.u32 %v4201_v47, 16  ;;  %1223 = vrot.lane.b32.xlu1 %v4116_v43, %s5101_s20  ;;  %v1754_v11 = vshll.u32 %v4202_v52, 16  ;;  %v4180_v46 = vld [vmem:[%s5327_s21 + $0x34] sm:$0xf]  ;;  %4717 = vmatprep.subr.bf16.mxu0 %v4904_v41 }
  0xd1   : > { %v4117_v8 = vcombine.low %v1123_v55, %v1126_v2  ;;  %v1070_v9 = vsel %vm5337_vm2, %v1068_v62, %v1069_v57  ;;  %v1737_v10 = vrot.slane %v1735_v63, 4  ;;  %v1740_v13 = vrot.slane %v1738_v3, 5  ;;  %v4875_v47 = vld [vmem:[%s5327_s21 + $0x90] sm:$0xff]   ;;  %v4181_v56 = vld [vmem:[%s5327_s21 + $0x38] sm:$0x1]  ;;  %4758 = vmatprep.subr.bf16.mxu1 %v4904_v41  ;;  %4718 = vmatpush3.bf16.msra.mxu0 %v4904_v41 }
  0xd2   : > { %v4109_v12 = vcombine.low %v1067_v61, %v1070_v9  ;;  %v1746_v14 = vrot.slane %v1744_v4, 5  ;;  %v1750_v15 = vrot.slane %v1748_v6, 4  ;;  %v1756_v16 = vrot.slane %v1754_v11, 5  ;;  %v4876_v48 = vld [vmem:[%s5327_s21 + $0x30] sm:$0xff]   ;;  %v4264_v62 = vld [vmem:[%s5327_s21 + $0x84] sm:$0xe]  ;;  %4766 = vmatpush3.bf16.msra.mxu1 %v4904_v41 }
  0xd3   : > { %1207 = vrot.lane.b32.xlu0 %v4108_v60, %s5101_s20  ;;  %v1543_v17 = vshrl.u32 %v4176_v58, 16  ;;  %v1546_v18 = vshll.u32 %v4176_v58, 16  ;;  %v1552_v19 = vshll.u32 %v4177_v59, 16  ;;  %v1741_v20 = vor.u32 %v1740_v13, %v1737_v10  ;;  %v4265_v63 = vld [vmem:[%s5327_s21 + $0x88] sm:$0xf] }
  0xd4   : > { %v1751_v21 = vor.u32 %v1750_v15, %v1746_v14  ;;  %v1556_v22 = vshrl.u32 %v4177_v59, 16  ;;  %v1562_v23 = vshll.u32 %v4178_v1, 16  ;;  %1225 = vrot.lane.b32.xlu1 %v4117_v8, %s5101_s20  ;;  %v1759_v30 = vshrl.u32 %v4203_v7, 16  ;;  %v4266_v6 = vld [vmem:[%s5327_s21 + $0x8c] sm:$0x1] }
  0xd5   : > { %v1545_v27 = vrot.slane %v1543_v17, 4  ;;  %v1548_v28 = vrot.slane %v1546_v18, 5  ;;  %v1554_v29 = vrot.slane %v1552_v19, 5  ;;  %v1742_v31 = vrot.slane %v1741_v20, 4  ;;  %v4242_v17 = vld [vmem:[%s5327_s21 + $0x2c] sm:$0x1] }
  0xd6   : > { %v1752_v32 = vrot.slane %v1751_v21, 4  ;;  %v1558_v33 = vrot.slane %v1556_v22, 4  ;;  %v1564_v34 = vrot.slane %v1562_v23, 5  ;;  %v1761_v37 = vrot.slane %v1759_v30, 4  ;;  %v4267_v22 = vld [vmem:[%s5327_s21 + $0x90] sm:$0xe] }
  0xd7   : > { %1209 = vrot.lane.b32.xlu0 %v4109_v12, %s5101_s20  ;;  %v1549_v36 = vor.u32 %v1548_v28, %v1545_v27  ;;  %v1762_v38 = vshll.u32 %v4203_v7, 16  ;;  %v1768_v39 = vshll.u32 %v4204_v24, 16  ;;  %v1747_v42 = vsel %vm5387_vm5, %v1742_v31, %v1746_v14  ;;  %v4240_v7 = vld [vmem:[%s5327_s21 + $0x24] sm:$0xe]  ;;  %v4241_v12 = vld [vmem:[%s5327_s21 + $0x28] sm:$0xf] }
  0xd8   : > { %v1757_v43 = vsel %vm5387_vm5, %v1752_v32, %v1756_v16  ;;  %v1559_v44 = vor.u32 %v1558_v33, %v1554_v29  ;;  %v1772_v45 = vshrl.u32 %v4204_v24, 16  ;;  %1401 = vrot.lane.b32.xlu1 %v4873_v25, %s5100_s22  ;;  %v1778_v55 = vshll.u32 %v4205_v35, 16  ;;  %v4268_v23 = vld [vmem:[%s5327_s21 + $0x94] sm:$0xf]  ;;  %v4269_v28 = vld [vmem:[%s5327_s21 + $0x98] sm:$0x1] }
  0xd9   : > { %v4228_v49 = vcombine.low %v1747_v42, %v1757_v43  ;;  %v1550_v50 = vrot.slane %v1549_v36, 4  ;;  %v1764_v51 = vrot.slane %v1762_v38, 5  ;;  %v1770_v52 = vrot.slane %v1768_v39, 5  ;;  %v4243_v33 = vld [vmem:[%s5327_s21 + $0x30] sm:$0xe] }
  0xda   : > { %v1560_v53 = vrot.slane %v1559_v44, 4  ;;  %v1774_v54 = vrot.slane %v1772_v45, 4  ;;  %v1567_v57 = vshrl.u32 %v4179_v40, 16  ;;  %v1570_v60 = vshll.u32 %v4179_v40, 16  ;;  %v4244_v38 = vld [vmem:[%s5327_s21 + $0x34] sm:$0xf] }
  0xdb   : > { %1385 = vrot.lane.b32.xlu0 %v4874_v26, %s5100_s22  ;;  %v1555_v58 = vsel %vm5387_vm5, %v1550_v50, %v1554_v29  ;;  %v1765_v59 = vor.u32 %v1764_v51, %v1761_v37  ;;  %v1576_v61 = vshll.u32 %v4180_v46, 16  ;;  %v1780_v3 = vrot.slane %v1778_v55, 5  ;;  %v4245_v43 = vld [vmem:[%s5327_s21 + $0x38] sm:$0x1]  ;;  %v4392_v44 = vld [vmem:[%s5327_s21 + $0x90] sm:$0xf] }
  0xdc   : > { %v1565_v1 = vsel %vm5387_vm5, %v1560_v53, %v1564_v34  ;;  %v1775_v2 = vor.u32 %v1774_v54, %v1770_v52  ;;  %v1569_v4 = vrot.slane %v1567_v57, 4  ;;  %1403 = vrot.lane.b32.xlu1 %v4875_v47, %s5100_s22  ;;  %v1572_v10 = vrot.slane %v1570_v60, 5  ;;  %v4394_v50 = vld [vmem:[%s5327_s21 + $0x98] sm:$0x1]  ;;  %v4368_v51 = vld [vmem:[%s5327_s21 + $0x30] sm:$0xf] }
  0xdd   : > { %v4220_v8 = vcombine.low %v1555_v58, %v1565_v1  ;;  %v1766_v9 = vrot.slane %v1765_v59, 4  ;;  %v1578_v11 = vrot.slane %v1576_v61, 5  ;;  %v1580_v14 = vshrl.u32 %v4180_v46, 16 }
  0xde   : > { %v1776_v13 = vrot.slane %v1775_v2, 4  ;;  %v1586_v15 = vshll.u32 %v4181_v56, 16  ;;  %v4292_v16 = vrot.slane %v4264_v62, 9  ;;  %v1573_v19 = vor.u32 %v1572_v10, %v1569_v4  ;;  %v4369_v2 = vld [vmem:[%s5327_s21 + $0x34] sm:$0xf] }
  0xdf   : > { %1387 = vrot.lane.b32.xlu0 %v4876_v48, %s5100_s22  ;;  %v1771_v18 = vsel %vm5387_vm5, %v1766_v9, %v1770_v52  ;;  %v2159_v20 = vrot.slane %v4265_v63, 5  ;;  %v2162_v21 = vrot.slane %v4266_v6, 5  ;;  %v1582_v25 = vrot.slane %v1580_v14, 4  ;;  %v5680_v52 = vpop.permute.xlu1 %1397 }
  0xe0   : > { %v1781_v24 = vsel %vm5387_vm5, %v1776_v13, %v1780_v3  ;;  %v1588_v26 = vrot.slane %v1586_v15, 5  ;;  %v4284_v27 = vrot.slane %v4240_v7, 9  ;;  %1946 = vrot.lane.b32.xlu1 %v4228_v49, %s5103_s11  ;;  %v1574_v30 = vrot.slane %v1573_v19, 4  ;;  %v4393_v49 = vld [vmem:[%s5327_s21 + $0x94] sm:$0xf] }
  0xe1   : > { %v4229_v29 = vcombine.low %v1771_v18, %v1781_v24  ;;  %v2160_v31 = vsel %vm5337_vm2, %v4292_v16, %v2159_v20  ;;  %v2161_v32 = vrot.slane %v2159_v20, 4  ;;  %v1583_v34 = vor.u32 %v1582_v25, %v1578_v11  ;;  %v4395_v18 = vld [vmem:[%s5327_s21 + $0x9c] sm:$0xf]  ;;  %v4396_v24 = vld [vmem:[%s5327_s21 + $0xa0] sm:$0xf] }
  0xe2   : > { %v2103_v35 = vrot.slane %v4241_v12, 5  ;;  %v2106_v36 = vrot.slane %v4242_v17, 5  ;;  %v4293_v37 = vrot.slane %v4267_v22, 9  ;;  %v1579_v39 = vsel %vm5387_vm5, %v1574_v30, %v1578_v11  ;;  %v4370_v11 = vld [vmem:[%s5327_s21 + $0x38] sm:$0x1]  ;;  %v5699_v17 = vpop.permute.xlu0 %1381  ;;  %v4877_v30 = vld [vmem:[%s5327_s21 + $0x90] sm:$0xff]  }
  0xe3   : > { %1930 = vrot.lane.b32.xlu0 %v4220_v8, %s5103_s11  ;;  %v2163_v40 = vsel %vm5337_vm2, %v2161_v32, %v2162_v21  ;;  %v2166_v41 = vrot.slane %v4268_v23, 5  ;;  %v2169_v42 = vrot.slane %v4269_v28, 5  ;;  %v1584_v45 = vrot.slane %v1583_v34, 4 }
  0xe4   : > { %v4308_v46 = vcombine.low %v2160_v31, %v2163_v40  ;;  %v2104_v47 = vsel %vm5337_vm2, %v4284_v27, %v2103_v35  ;;  %v2105_v48 = vrot.slane %v2103_v35, 4  ;;  %1948 = vrot.lane.b32.xlu1 %v4229_v29, %s5103_s11  ;;  %v4285_v55 = vrot.slane %v4243_v33, 9  ;;  %v4397_v29 = vld [vmem:[%s5327_s21 + $0xa4] sm:$0x1]  ;;  %v4371_v35 = vld [vmem:[%s5327_s21 + $0x3c] sm:$0xf] }
  0xe5   : > { %v2167_v53 = vsel %vm5337_vm2, %v4293_v37, %v2166_v41  ;;  %v2168_v54 = vrot.slane %v2166_v41, 4  ;;  %v2110_v56 = vrot.slane %v4244_v38, 5  ;;  %v1589_v57 = vsel %vm5387_vm5, %v1584_v45, %v1588_v26 }
  0xe6   : > { %v2107_v58 = vsel %vm5337_vm2, %v2105_v48, %v2106_v36  ;;  %v2113_v59 = vrot.slane %v4245_v43, 5  ;;  %v2779_v60 = vshrl.u32 %v4392_v44, 16  ;;  %v4221_v61 = vcombine.low %v1579_v39, %v1589_v57  ;;  %v4372_v57 = vld [vmem:[%s5327_s21 + $0x40] sm:$0xf] }
  0xe7   : > { %v4300_v62 = vcombine.low %v2104_v47, %v2107_v58  ;;  %v2170_v63 = vsel %vm5337_vm2, %v2168_v54, %v2169_v42  ;;  %v2111_v1 = vsel %vm5337_vm2, %v4285_v55, %v2110_v56  ;;  %v2112_v4 = vrot.slane %v2110_v56, 4 }
  0xe8   : > { %v4309_v3 = vcombine.low %v2167_v53, %v2170_v63  ;;  %v2781_v6 = vrot.slane %v2779_v60, 4  ;;  %v2782_v7 = vshll.u32 %v4392_v44, 16  ;;  %1932 = vrot.lane.b32.xlu0 %v4221_v61, %s5103_s11  ;;  %2267 = vrot.lane.b32.xlu1 %v4308_v46, %s5104_s18  ;;  %v2788_v8 = vshll.u32 %v4393_v49, 16  ;;  %v5702_v19 = vpop.permute.xlu1 %1219  ;;  %v4878_v44 = vld [vmem:[%s5327_s21 + $0x30] sm:$0xff]   ;;  %v4373_v61 = vld [vmem:[%s5327_s21 + $0x44] sm:$0x1] }
  0xe9   : > { %v2792_v9 = vshrl.u32 %v4393_v49, 16  ;;  %v2798_v10 = vshll.u32 %v4394_v50, 16  ;;  %v2587_v12 = vshrl.u32 %v4368_v51, 16  ;;  %v2114_v13 = vsel %vm5337_vm2, %v2112_v4, %v2113_v59  ;;  %v5713_v49 = vpop.permute.xlu0 %1203  ;;  %v4880_v63 = vld [vmem:[%s5327_s21 + $0x3c] sm:$0xff]  }
  0xea   : > { %v2784_v14 = vrot.slane %v2782_v7, 5  ;;  %v2590_v15 = vshll.u32 %v4368_v51, 16  ;;  %v2596_v16 = vshll.u32 %v4369_v2, 16  ;;  %v4301_v20 = vcombine.low %v2111_v1, %v2114_v13  ;;  %v4879_v51 = vld [vmem:[%s5327_s21 + $0x9c] sm:$0xff]  }
  0xeb   : > { %v2790_v21 = vrot.slane %v2788_v8, 5  ;;  %v2794_v22 = vrot.slane %v2792_v9, 4  ;;  %v2800_v23 = vrot.slane %v2798_v10, 5  ;;  %v2589_v26 = vrot.slane %v2587_v12, 4 }
  0xec   : > { %v2785_v25 = vor.u32 %v2784_v14, %v2781_v6  ;;  %v2592_v27 = vrot.slane %v2590_v15, 5  ;;  %v2598_v28 = vrot.slane %v2596_v16, 5  ;;  %2251 = vrot.lane.b32.xlu0 %v4300_v62, %s5104_s18  ;;  %2269 = vrot.lane.b32.xlu1 %v4309_v3, %s5104_s18  ;;  %v2600_v32 = vshrl.u32 %v4369_v2, 16  ;;  %v5715_v50 = vpop.permute.xlu1 %1221  ;;  %v4456_v6 = vld [vmem:[%s5327_s21 + $0x90] sm:$0xe] }
  0xed   : > { %v2795_v31 = vor.u32 %v2794_v22, %v2790_v21  ;;  %v2606_v33 = vshll.u32 %v4370_v11, 16  ;;  %v2803_v34 = vshrl.u32 %v4395_v18, 16  ;;  %v2806_v38 = vshll.u32 %v4395_v18, 16  ;;  %v4457_v11 = vld [vmem:[%s5327_s21 + $0x94] sm:$0xf] }
  0xee   : > { %v2786_v36 = vrot.slane %v2785_v25, 4  ;;  %v2593_v37 = vor.u32 %v2592_v27, %v2589_v26  ;;  %v2812_v39 = vshll.u32 %v4396_v24, 16  ;;  %v2602_v41 = vrot.slane %v2600_v32, 4  ;;  %v4458_v16 = vld [vmem:[%s5327_s21 + $0x98] sm:$0x1]  ;;  %v5739_v26 = vpop.permute.xlu0 %1205 }
  0xef   : > { %v2796_v40 = vrot.slane %v2795_v31, 4  ;;  %v2608_v42 = vrot.slane %v2606_v33, 5  ;;  %v2805_v43 = vrot.slane %v2803_v34, 4  ;;  %v2808_v47 = vrot.slane %v2806_v38, 5  ;;  %v4432_v18 = vld [vmem:[%s5327_s21 + $0x30] sm:$0xe] }
  0xf0   : > { %v2791_v45 = vsel %vm5387_vm5, %v2786_v36, %v2790_v21  ;;  %v2594_v46 = vrot.slane %v2593_v37, 4  ;;  %v2814_v48 = vrot.slane %v2812_v39, 5  ;;  %2253 = vrot.lane.b32.xlu0 %v4301_v20, %s5104_s18  ;;  %2445 = vrot.lane.b32.xlu1 %v4877_v30, %s5105_s4  ;;  %v2603_v54 = vor.u32 %v2602_v41, %v2598_v28  ;;  %v4434_v25 = vld [vmem:[%s5327_s21 + $0x38] sm:$0x1]  ;;  %v432_v36 = vld [vmem:[%s5327_s21 + $0x90] sm:$0xf] }
  0xf1   : > { %v2801_v53 = vsel %vm5387_vm5, %v2796_v40, %v2800_v23  ;;  %v2816_v55 = vshrl.u32 %v4396_v24, 16  ;;  %v2822_v56 = vshll.u32 %v4397_v29, 16  ;;  %v2809_v60 = vor.u32 %v2808_v47, %v2805_v43  ;;  %v4433_v24 = vld [vmem:[%s5327_s21 + $0x34] sm:$0xf]  ;;  %v408_v47 = vld [vmem:[%s5327_s21 + $0x30] sm:$0xf] }
  0xf2   : > { %v4420_v58 = vcombine.low %v2791_v45, %v2801_v53  ;;  %v2599_v59 = vsel %vm5387_vm5, %v2594_v46, %v2598_v28  ;;  %v2611_v62 = vshrl.u32 %v4371_v35, 16  ;;  %v2604_v1 = vrot.slane %v2603_v54, 4  ;;  %v433_v41 = vld [vmem:[%s5327_s21 + $0x94] sm:$0xf]  ;;  %v434_v46 = vld [vmem:[%s5327_s21 + $0x98] sm:$0x1] }
  0xf3   : > { %v2818_v2 = vrot.slane %v2816_v55, 4  ;;  %v2824_v3 = vrot.slane %v2822_v56, 5  ;;  %v2614_v4 = vshll.u32 %v4371_v35, 16  ;;  %v2810_v7 = vrot.slane %v2809_v60, 4  ;;  %v409_v55 = vld [vmem:[%s5327_s21 + $0x34] sm:$0xf] }
  0xf4   : > { %v2613_v8 = vrot.slane %v2611_v62, 4  ;;  %v2620_v9 = vshll.u32 %v4372_v57, 16  ;;  %v2624_v10 = vshrl.u32 %v4372_v57, 16  ;;  %2429 = vrot.lane.b32.xlu0 %v4878_v44, %s5105_s4  ;;  %2447 = vrot.lane.b32.xlu1 %v4879_v51, %s5105_s4  ;;  %v2609_v12 = vsel %vm5387_vm5, %v2604_v1, %v2608_v42  ;;  %v5741_v27 = vpop.permute.xlu1 %881  ;;  %v410_v56 = vld [vmem:[%s5327_s21 + $0x38] sm:$0x1] }
  0xf5   : > { %v2819_v13 = vor.u32 %v2818_v2, %v2814_v48  ;;  %v2616_v14 = vrot.slane %v2614_v4, 5  ;;  %v2630_v15 = vshll.u32 %v4373_v61, 16  ;;  %v4412_v20 = vcombine.low %v2599_v59, %v2609_v12 }
  0xf6   : > { %v2815_v21 = vsel %vm5387_vm5, %v2810_v7, %v2814_v48  ;;  %v2622_v22 = vrot.slane %v2620_v9, 5  ;;  %v2626_v23 = vrot.slane %v2624_v10, 4  ;;  %v4484_v31 = vrot.slane %v4456_v6, 9 }
  0xf7   : > { %v2820_v28 = vrot.slane %v2819_v13, 4  ;;  %v2617_v29 = vor.u32 %v2616_v14, %v2613_v8  ;;  %v2632_v30 = vrot.slane %v2630_v15, 5  ;;  %v3203_v33 = vrot.slane %v4457_v11, 5  ;;  %v4881_v13 = vld [vmem:[%s5327_s21 + $0xc] sm:$0xff]   ;;  %v4882_v14 = vld [vmem:[%s5327_s21] sm:$0xff]  }
  0xf8   : > { %v2627_v32 = vor.u32 %v2626_v23, %v2622_v22  ;;  %v3206_v34 = vrot.slane %v4458_v16, 5  ;;  %v4476_v35 = vrot.slane %v4432_v18, 9  ;;  %2431 = vrot.lane.b32.xlu0 %v4880_v63, %s5105_s4  ;;  %2990 = vrot.lane.b32.xlu1 %v4420_v58, %s5106_s8  ;;  %v3147_v39 = vrot.slane %v4433_v24, 5  ;;  %v5765_v61 = vpop.permute.xlu0 %879  ;;  %v4883_v15 = vld [vmem:[%s5327_s21 + $0x6c] sm:$0xff]   ;;  %v4884_v16 = vld [vmem:[%s5327_s21 + $0x60] sm:$0xff]  }
  0xf9   : > { %v2825_v37 = vsel %vm5387_vm5, %v2820_v28, %v2824_v3  ;;  %v2618_v38 = vrot.slane %v2617_v29, 4  ;;  %v3150_v40 = vrot.slane %v4434_v25, 5  ;;  %v3204_v44 = vsel %vm5337_vm2, %v4484_v31, %v3203_v33  ;;  %v4898_v18 = vld [vmem:[%s5327_s21 + $0x78] sm:$0xff]   ;;  %v5790_v29 = vld [vmem:[%s5327_s21 + $0xa0] sm:$0xf]  ;;  %v4903_v31 = vld [vmem:[%s5327_s21 + $0x24] sm:$0xff]  }
  0xfa   : > { %v4421_v42 = vcombine.low %v2815_v21, %v2825_v37  ;;  %v2628_v43 = vrot.slane %v2627_v32, 4  ;;  %v3205_v45 = vrot.slane %v3203_v33, 4  ;;  %v5757_v51 = vsel %vm5337_vm2, %v4476_v35, %v3147_v39  ;;  %v4902_v21 = vld [vmem:[%s5327_s21 + $0x84] sm:$0xff]   ;;  %v5787_v28 = vld [vmem:[%s5327_s21 + $0x9c] sm:$0xe] }
  0xfb   : > { %v2623_v48 = vsel %vm5387_vm5, %v2618_v38, %v2622_v22  ;;  %v3149_v53 = vrot.slane %v3147_v39, 4  ;;  %v736_v54 = vshrl.u32 %v432_v36, 16  ;;  %v739_v59 = vshll.u32 %v432_v36, 16 }
  0xfc   : > { %v2633_v57 = vsel %vm5387_vm5, %v2628_v43, %v2632_v30  ;;  %v3207_v58 = vsel %vm5337_vm2, %v3205_v45, %v3206_v34  ;;  %v745_v60 = vshll.u32 %v433_v41, 16  ;;  %v5767_v62 = vpop.permute.xlu1 %897  ;;  %2974 = vrot.lane.b32.xlu0 %v4412_v20, %s5106_s8  ;;  %2992 = vrot.lane.b32.xlu1 %v4421_v42, %s5106_s8  ;;  %v749_v8 = vshrl.u32 %v433_v41, 16  ;;  %v4899_v20 = vld [vmem:[%s5327_s21 + $0x18] sm:$0xff]   ;;  %v5793_v30 = vld [vmem:[%s5327_s21 + $0xa4] sm:$0x1] }
  0xfd   : > { %v4413_v63 = vcombine.low %v2623_v48, %v2633_v57  ;;  %v4500_v1 = vcombine.low %v3204_v44, %v3207_v58  ;;  %v5773_v2 = vsel %vm5337_vm2, %v3149_v53, %v3150_v40  ;;  %v738_v3 = vrot.slane %v736_v54, 4  ;;  %v5804_v40 = vld [vmem:[%s5327_s21 + $0x3c] sm:$0xe]  ;;  %v4436_v44 = vld [vmem:[%s5327_s21 + $0x40] sm:$0xf] }
  0xfe   : > { %v4492_v4 = vcombine.low %v5757_v51, %v5773_v2  ;;  %v741_v6 = vrot.slane %v739_v59, 5  ;;  %v5777_v7 = vrot.slane %v745_v60, 5  ;;  %v755_v9 = vshll.u32 %v434_v46, 16  ;;  %v4437_v51 = vld [vmem:[%s5327_s21 + $0x44] sm:$0x1] }
  0xff   : > { %v544_v10 = vshrl.u32 %v408_v47, 16  ;;  %v547_v11 = vshll.u32 %v408_v47, 16  ;;  %v553_v12 = vshll.u32 %v409_v55, 16  ;;  %v751_v23 = vrot.slane %v749_v8, 4  ;;  %v435_v57 = vld [vmem:[%s5327_s21 + $0x9c] sm:$0xf] }
 0x100   : > { %v742_v22 = vor.u32 %v741_v6, %v738_v3  ;;  %v557_v24 = vshrl.u32 %v409_v55, 16  ;;  %v563_v25 = vshll.u32 %v410_v56, 16  ;;  %2976 = vrot.lane.b32.xlu0 %v4413_v63, %s5106_s8  ;;  %3311 = vrot.lane.b32.xlu1 %v4500_v1, %s5107_s9  ;;  %v757_v32 = vrot.slane %v755_v9, 5  ;;  %v5806_v42 = vpop.permute.xlu1 %1399  ;;  %v436_v1 = vld [vmem:[%s5327_s21 + $0xa0] sm:$0xf] }
 0x101   : > { %v546_v33 = vrot.slane %v544_v10, 4  ;;  %v549_v34 = vrot.slane %v547_v11, 5  ;;  %v5798_v35 = vrot.slane %v553_v12, 5  ;;  %v752_v37 = vor.u32 %v751_v23, %v5777_v7  ;;  %v896_v41 = vpop.permute.xlu0 %895  ;;  %v411_v11 = vld [vmem:[%s5327_s21 + $0x3c] sm:$0xf] }
 0x102   : > { %v743_v36 = vrot.slane %v742_v22, 4  ;;  %v559_v38 = vrot.slane %v557_v24, 4  ;;  %v5801_v39 = vrot.slane %v563_v25, 5  ;;  %vm379_vm6 = vcmask 31744   ;;  %v980_v24 = vld [vmem:[%s5327_s21 + $0x90] sm:$0xe] }
 0x103   : > { %v550_v43 = vor.u32 %v549_v34, %v546_v33  ;;  %vm927_vm7 = vcmask 64544   ;;  %v753_v46 = vrot.slane %v752_v37, 4  ;;  %v5108_v48 = vmov 0   ;;  %v982_v37 = vld [vmem:[%s5327_s21 + $0x98] sm:$0x1] }
 0x104   : > { %v748_v45 = vsel %vm5387_vm5, %v743_v36, %v5777_v7  ;;  %v560_v47 = vor.u32 %v559_v38, %v5798_v35  ;;  %236 = vst [vmem:[#allocation2 + $0x8] sm:$0xff] %v5108_v48  ;;  %235 = vst [vmem:[#allocation2] sm:$0xff] %v5108_v48  ;;  %vm1251_vm8 = vcmask 97344   ;;  %3295 = vrot.lane.b32.xlu0 %v4492_v4, %s5107_s9  ;;  %v4485_v54 = vrot.slane %v5787_v28, 9  ;;  %v437_v7 = vld [vmem:[%s5327_s21 + $0xa4] sm:$0x1] }
 0x105   : > { %237 = vst [vmem:[#allocation2 + $0x10] sm:$0xff] %v5108_v48  ;;  %238 = vst [vmem:[#allocation2 + $0x18] sm:$0xff] %v5108_v48  ;;  %v551_v53 = vrot.slane %v550_v43, 4  ;;  %v3210_v55 = vrot.slane %v5790_v29, 5  ;;  %v3213_v56 = vrot.slane %v5793_v30, 5  ;;  %v758_v58 = vsel %vm5387_vm5, %v753_v46, %v757_v32  ;;  %v5838_v2 = vpop.permute.xlu0 %1383  ;;  %v4913_v38 = vld [vmem:[%s5327_s21 + $0x90] sm:$0xff]  }
 0x106   : > { %239 = vst [vmem:[#allocation2 + $0x20] sm:$0xff] %v5108_v48  ;;  %240 = vst [vmem:[#allocation2 + $0x28] sm:$0xff] %v5108_v48  ;;  %v561_v59 = vrot.slane %v560_v47, 4  ;;  %v4477_v60 = vrot.slane %v5804_v40, 9  ;;  %v3154_v63 = vrot.slane %v4436_v44, 5  ;;  %v4086_v3 = vcombine.low %v748_v45, %v758_v58  ;;  %v5859_v8 = vpop.permute.xlu1 %1942  ;;  %v4914_v46 = vld [vmem:[%s5327_s21 + $0x30] sm:$0xff]  }
 0x107   : > { %241 = vst [vmem:[#allocation2 + $0x30] sm:$0xff] %v5108_v48  ;;  %242 = vst [vmem:[#allocation2 + $0x38] sm:$0xff] %v5108_v48  ;;  %v3157_v6 = vrot.slane %v4437_v51, 5  ;;  %v760_v9 = vshrl.u32 %v435_v57, 16  ;;  %v763_v10 = vshll.u32 %v435_v57, 16  ;;  %v779_v23 = vshll.u32 %v437_v7, 16 }
 0x108   : > { %243 = vst [vmem:[#allocation2 + $0x40] sm:$0xff] %v5108_v48  ;;  %244 = vst [vmem:[#allocation2 + $0x48] sm:$0xff] %v5108_v48  ;;  %v566_v4 = vsel %vm5387_vm5, %v561_v59, %v5801_v39  ;;  %903 = vrot.lane.b32.xlu1 %v4086_v3, %s5102_s24  ;;  %v568_v30 = vshrl.u32 %v411_v11, 16  ;;  %v981_v32 = vld [vmem:[%s5327_s21 + $0x94] sm:$0xf]  ;;  %vm1429_vm9 = vcmask 130144  }
 0x109   : > { %245 = vst [vmem:[#allocation2 + $0x50] sm:$0xff] %v5108_v48  ;;  %246 = vst [vmem:[#allocation2 + $0x58] sm:$0xff] %v5108_v48  ;;  %v765_v22 = vrot.slane %v763_v10, 5  ;;  %v5871_v25 = vpop.permute.xlu0 %1926  ;;  %v781_v34 = vrot.slane %v779_v23, 5  ;;  %v956_v44 = vld [vmem:[%s5327_s21 + $0x30] sm:$0xe] }
 0x10a   : > { %247 = vst [vmem:[#allocation2 + $0x60] sm:$0xff] %v5108_v48  ;;  %248 = vst [vmem:[#allocation2 + $0x68] sm:$0xff] %v5108_v48  ;;  %v570_v40 = vrot.slane %v568_v30, 4  ;;  %v4102_v57 = vrot.slane %v980_v24, 9  ;;  %v958_v58 = vld [vmem:[%s5327_s21 + $0x38] sm:$0x1] }
 0x10b   : > { %249 = vst [vmem:[#allocation2 + $0x70] sm:$0xff] %v5108_v48  ;;  %250 = vst [vmem:[#allocation2 + $0x78] sm:$0xff] %v5108_v48  ;;  %vm1974_vm10 = vcmask 162944   ;;  %v4208_v30 = vld [vmem:[%s5327_s21 + $0xa4] sm:$0x1]  ;;  %vm2295_vm11 = vcmask 195744  }
 0x10c   : > { %381 = vst.msk [vmem:[#allocation2 + $0x8] sm:$0xff] %vm379_vm6, %v4881_v13  ;;  %380 = vst.msk [vmem:[#allocation2] sm:$0xff] %vm379_vm6, %v4882_v14  ;;  %v769_v14 = vshll.u32 %v436_v1, 16  ;;  %vm2473_vm12 = vcmask 228544   ;;  %vm3018_vm13 = vcmask 261344   ;;  %vm3339_vm14 = vcmask 294144  }
 0x10d   : > { %389 = vst.msk [vmem:[#allocation2 + $0x48] sm:$0xff] %vm379_vm6, %v4883_v15  ;;  %388 = vst.msk [vmem:[#allocation2 + $0x40] sm:$0xff] %vm379_vm6, %v4884_v16  ;;  %v773_v15 = vshrl.u32 %v436_v1, 16  ;;  %v412_v16 = vld [vmem:[%s5327_s21 + $0x40] sm:$0xf] }
 0x10e   : > { %390 = vst.msk [vmem:[#allocation2 + $0x50] sm:$0xff] %vm379_vm6, %v4898_v18  ;;  %382 = vst.msk [vmem:[#allocation2 + $0x10] sm:$0xff] %vm379_vm6, %v4899_v20  ;;  %v413_v18 = vld [vmem:[%s5327_s21 + $0x44] sm:$0x1]  ;;  %v771_v28 = vrot.slane %v769_v14, 5  ;;  %v581_v36 = vshrl.u32 %v412_v16, 16  ;;  %v1945_v45 = vpop.permute.xlu1 %1944 }
 0x10f   : > { %391 = vst.msk [vmem:[#allocation2 + $0x58] sm:$0xff] %vm379_vm6, %v4902_v21  ;;  %383 = vst.msk [vmem:[#allocation2 + $0x18] sm:$0xff] %vm379_vm6, %v4903_v31  ;;  %v762_v21 = vrot.slane %v760_v9, 4  ;;  %v775_v29 = vrot.slane %v773_v15, 4  ;;  %v571_v31 = vshll.u32 %v411_v11, 16  ;;  %v587_v43 = vshll.u32 %v413_v18, 16 }
 0x110   : > { %929 = vst.msk [vmem:[#allocation2 + $0x8] sm:$0xff] %vm927_vm7, %v5741_v27  ;;  %928 = vst.msk [vmem:[#allocation2] sm:$0xff] %vm927_vm7, %v5765_v61  ;;  %v556_v27 = vsel %vm5387_vm5, %v551_v53, %v5798_v35  ;;  %v3211_v61 = vsel %vm5337_vm2, %v4485_v54, %v3210_v55  ;;  %v577_v35 = vshll.u32 %v412_v16, 16  ;;  %v583_v51 = vrot.slane %v581_v36, 4  ;;  %v957_v53 = vld [vmem:[%s5327_s21 + $0x34] sm:$0xf] }
 0x111   : > { %937 = vst.msk [vmem:[#allocation2 + $0x48] sm:$0xff] %vm927_vm7, %v5767_v62  ;;  %936 = vst.msk [vmem:[#allocation2 + $0x40] sm:$0xff] %vm927_vm7, %v896_v41  ;;  %v3212_v62 = vrot.slane %v3210_v55, 4  ;;  %v766_v33 = vor.u32 %v765_v22, %v762_v21  ;;  %v776_v39 = vor.u32 %v775_v29, %v771_v28  ;;  %v573_v41 = vrot.slane %v571_v31, 5  ;;  %v983_v1 = vld [vmem:[%s5327_s21 + $0x9c] sm:$0xe]  ;;  %v1929_v3 = vpop.permute.xlu0 %1928 }
 0x112   : > { %1252 = vst.msk [vmem:[#allocation2] sm:$0xff] %vm1251_vm8, %v5713_v49  ;;  %1253 = vst.msk [vmem:[#allocation2 + $0x8] sm:$0xff] %vm1251_vm8, %v5739_v26  ;;  %v3155_v49 = vsel %vm5337_vm2, %v4477_v60, %v3154_v63  ;;  %v3156_v26 = vrot.slane %v3154_v63, 4  ;;  %v579_v48 = vrot.slane %v577_v35, 5  ;;  %v1132_v63 = vrot.slane %v982_v37, 5  ;;  %v4915_v31 = vld [vmem:[%s5327_s21 + $0x9c] sm:$0xff]  }
 0x113   : > { %1261 = vst.msk [vmem:[#allocation2 + $0x48] sm:$0xff] %vm1251_vm8, %v5715_v50  ;;  %1260 = vst.msk [vmem:[#allocation2 + $0x40] sm:$0xff] %vm1251_vm8, %v5702_v19  ;;  %v4078_v50 = vcombine.low %v556_v27, %v566_v4  ;;  %v3214_v19 = vsel %vm5337_vm2, %v3212_v62, %v3213_v56  ;;  %v767_v47 = vrot.slane %v766_v33, 4  ;;  %v777_v54 = vrot.slane %v776_v39, 4  ;;  %v985_v62 = vld [vmem:[%s5327_s21 + $0xa4] sm:$0x1]  ;;  %v2264_v4 = vpop.permute.xlu1 %2263 }
 0x114   : > { %v4501_v12 = vcombine.low %v3211_v61, %v3214_v19  ;;  %v3158_v13 = vsel %vm5337_vm2, %v3156_v26, %v3157_v6  ;;  %392 = vst.msk [vmem:[#allocation2 + $0x60] sm:$0xff] %vm379_vm6, %v4913_v38  ;;  %v574_v55 = vor.u32 %v573_v41, %v570_v40  ;;  %v589_v56 = vrot.slane %v587_v43, 5  ;;  %384 = vst.msk [vmem:[#allocation2 + $0x20] sm:$0xff] %vm379_vm6, %v4914_v46  ;;  %v4207_v21 = vld [vmem:[%s5327_s21 + $0xa0] sm:$0xf] }
 0x115   : > { %887 = vrot.lane.b32.xlu0 %v4078_v50, %s5102_s24  ;;  %v4493_v20 = vcombine.low %v3155_v49, %v3158_v13  ;;  %1439 = vst.msk [vmem:[#allocation2 + $0x48] sm:$0xff] %vm1429_vm9, %v5806_v42  ;;  %1430 = vst.msk [vmem:[#allocation2] sm:$0xff] %vm1429_vm9, %v5699_v17  ;;  %v772_v59 = vsel %vm5387_vm5, %v767_v47, %v771_v28  ;;  %v584_v60 = vor.u32 %v583_v51, %v579_v48  ;;  %v984_v17 = vld [vmem:[%s5327_s21 + $0xa0] sm:$0xf]  ;;  %v959_v50 = vld [vmem:[%s5327_s21 + $0x3c] sm:$0xe]  ;;  %v2248_v18 = vpop.permute.xlu0 %2247 }
 0x116   : > { %3313 = vrot.lane.b32.xlu1 %v4501_v12, %s5107_s9  ;;  %1438 = vst.msk [vmem:[#allocation2 + $0x40] sm:$0xff] %vm1429_vm9, %v5680_v52  ;;  %1431 = vst.msk [vmem:[#allocation2 + $0x8] sm:$0xff] %vm1429_vm9, %v5838_v2  ;;  %v1129_v42 = vrot.slane %v981_v32, 5  ;;  %v782_v52 = vsel %vm5387_vm5, %v777_v54, %v781_v34  ;;  %v575_v2 = vrot.slane %v574_v55, 4  ;;  %v4094_v27 = vrot.slane %v956_v44, 9  ;;  %v4916_v36 = vld [vmem:[%s5327_s21 + $0x3c] sm:$0xff]  }
 0x117   : > { %v1073_v61 = vrot.slane %v957_v53, 5  ;;  %v4087_v49 = vcombine.low %v772_v59, %v782_v52  ;;  %v585_v26 = vrot.slane %v584_v60, 4  ;;  %v1076_v11 = vrot.slane %v958_v58, 5  ;;  %v960_v12 = vld [vmem:[%s5327_s21 + $0x40] sm:$0xf]  ;;  %1983 = vst.msk [vmem:[#allocation2 + $0x40] sm:$0xff] %vm1974_vm10, %v5859_v8  ;;  %v2266_v29 = vpop.permute.xlu1 %2265 }
 0x118   : > { %v1130_v6 = vsel %vm5337_vm2, %v4102_v57, %v1129_v42  ;;  %v1131_v7 = vrot.slane %v1129_v42, 4  ;;  %v580_v19 = vsel %vm5387_vm5, %v575_v2, %v579_v48  ;;  %v961_v13 = vld [vmem:[%s5327_s21 + $0x44] sm:$0x1]  ;;  %v4103_v16 = vrot.slane %v983_v1, 9  ;;  %1975 = vst.msk [vmem:[#allocation2] sm:$0xff] %vm1974_vm10, %v5871_v25  ;;  %1984 = vst.msk [vmem:[#allocation2 + $0x48] sm:$0xff] %vm1974_vm10, %v1945_v45 }
 0x119   : > { %3297 = vrot.lane.b32.xlu0 %v4493_v20, %s5107_s9  ;;  %v1074_v9 = vsel %vm5337_vm2, %v4094_v27, %v1073_v61  ;;  %v1075_v10 = vrot.slane %v1073_v61, 4  ;;  %v590_v14 = vsel %vm5387_vm5, %v585_v26, %v589_v56  ;;  %v4206_v20 = vld [vmem:[%s5327_s21 + $0x9c] sm:$0xf]  ;;  %v1136_v28 = vrot.slane %v984_v17, 5  ;;  %1976 = vst.msk [vmem:[#allocation2 + $0x8] sm:$0xff] %vm1974_vm10, %v1929_v3  ;;  %v2250_v43 = vpop.permute.xlu0 %2249 }
 0x11a   : > { %905 = vrot.lane.b32.xlu1 %v4087_v49, %s5102_s24  ;;  %v1133_v15 = vsel %vm5337_vm2, %v1131_v7, %v1132_v63  ;;  %v4079_v22 = vcombine.low %v580_v19, %v590_v14  ;;  %v1139_v33 = vrot.slane %v985_v62, 5  ;;  %v4095_v34 = vrot.slane %v959_v50, 9  ;;  %v4182_v38 = vld [vmem:[%s5327_s21 + $0x3c] sm:$0xf]  ;;  %v4183_v39 = vld [vmem:[%s5327_s21 + $0x40] sm:$0xf] }
 0x11b   : > { %v4118_v23 = vcombine.low %v1130_v6, %v1133_v15  ;;  %v1077_v24 = vsel %vm5337_vm2, %v1075_v10, %v1076_v11  ;;  %v1080_v35 = vrot.slane %v960_v12, 5  ;;  %v1137_v8 = vsel %vm5337_vm2, %v4103_v16, %v1136_v28  ;;  %393 = vst.msk [vmem:[#allocation2 + $0x68] sm:$0xff] %vm379_vm6, %v4915_v31  ;;  %v4184_v46 = vld [vmem:[%s5327_s21 + $0x44] sm:$0x1]  ;;  %385 = vst.msk [vmem:[#allocation2 + $0x28] sm:$0xff] %vm379_vm6, %v4916_v36  ;;  %v2442_v54 = vpop.permute.xlu1 %2441  ;;  %v4885_v3 = vld [vmem:[%s5327_s21 + $0x9c] sm:$0xff]  }
 0x11c   : > { %v4110_v32 = vcombine.low %v1074_v9, %v1077_v24  ;;  %v1138_v25 = vrot.slane %v1136_v28, 4  ;;  %v1083_v37 = vrot.slane %v961_v13, 5  ;;  %2304 = vst.msk [vmem:[#allocation2 + $0x40] sm:$0xff] %vm2295_vm11, %v2264_v4  ;;  %2296 = vst.msk [vmem:[#allocation2] sm:$0xff] %vm2295_vm11, %v2248_v18  ;;  %v1783_v44 = vshrl.u32 %v4206_v20, 16  ;;  %v4886_v4 = vld [vmem:[%s5327_s21 + $0x3c] sm:$0xff]  }
 0x11d   : > { %889 = vrot.lane.b32.xlu0 %v4079_v22, %s5102_s24  ;;  %v1081_v40 = vsel %vm5337_vm2, %v4095_v34, %v1080_v35  ;;  %v1082_v41 = vrot.slane %v1080_v35, 4  ;;  %2305 = vst.msk [vmem:[#allocation2 + $0x48] sm:$0xff] %vm2295_vm11, %v2266_v29  ;;  %v1786_v45 = vshll.u32 %v4206_v20, 16  ;;  %2297 = vst.msk [vmem:[#allocation2 + $0x8] sm:$0xff] %vm2295_vm11, %v2250_v43  ;;  %v1792_v48 = vshll.u32 %v4207_v21, 16  ;;  %v2426_v62 = vpop.permute.xlu0 %2425  ;;  %v4887_v50 = vld [vmem:[%s5327_s21 + $0xa8] sm:$0xff]  }
 0x11e   : > { %1227 = vrot.lane.b32.xlu1 %v4118_v23, %s5101_s20  ;;  %v1140_v47 = vsel %vm5337_vm2, %v1138_v25, %v1139_v33  ;;  %v1796_v51 = vshrl.u32 %v4207_v21, 16  ;;  %v1802_v53 = vshll.u32 %v4208_v30, 16  ;;  %v1785_v57 = vrot.slane %v1783_v44, 4  ;;  %v4209_v59 = vld [vmem:[%s5327_s21 + $0xa8] sm:$0xf]  ;;  %2482 = vst.msk [vmem:[#allocation2 + $0x40] sm:$0xff] %vm2473_vm12, %v2442_v54 }
 0x11f   : > { %v4119_v55 = vcombine.low %v1137_v8, %v1140_v47  ;;  %v1084_v56 = vsel %vm5337_vm2, %v1082_v41, %v1083_v37  ;;  %v1788_v58 = vrot.slane %v1786_v45, 5  ;;  %v1794_v42 = vrot.slane %v1792_v48, 5  ;;  %v4210_v17 = vld [vmem:[%s5327_s21 + $0xac] sm:$0xf]  ;;  %v2444_v7 = vpop.permute.xlu1 %2443  ;;  %2474 = vst.msk [vmem:[#allocation2] sm:$0xff] %vm2473_vm12, %v2426_v62 }
 0x120   : > { %v4111_v60 = vcombine.low %v1081_v40, %v1084_v56  ;;  %v1798_v63 = vrot.slane %v1796_v51, 4  ;;  %v1804_v1 = vrot.slane %v1802_v53, 5  ;;  %v1591_v2 = vshrl.u32 %v4182_v38, 16  ;;  %v4211_v12 = vld [vmem:[%s5327_s21 + $0xb0] sm:$0x1]  ;;  %2483 = vst.msk [vmem:[#allocation2 + $0x48] sm:$0xff] %vm2473_vm12, %v2444_v7 }
 0x121   : > { %1211 = vrot.lane.b32.xlu0 %v4110_v32, %s5101_s20  ;;  %v1789_v52 = vor.u32 %v1788_v58, %v1785_v57  ;;  %v1594_v27 = vshll.u32 %v4182_v38, 16  ;;  %v1600_v61 = vshll.u32 %v4183_v39, 16  ;;  %v1604_v26 = vshrl.u32 %v4183_v39, 16  ;;  %v4185_v13 = vld [vmem:[%s5327_s21 + $0x48] sm:$0xf]  ;;  %v2428_v28 = vpop.permute.xlu0 %2427 }
 0x122   : > { %1229 = vrot.lane.b32.xlu1 %v4119_v55, %s5101_s20  ;;  %v1799_v49 = vor.u32 %v1798_v63, %v1794_v42  ;;  %v1610_v6 = vshll.u32 %v4184_v46, 16  ;;  %v1593_v9 = vrot.slane %v1591_v2, 4  ;;  %v1807_v18 = vshrl.u32 %v4209_v59, 16  ;;  %v4186_v20 = vld [vmem:[%s5327_s21 + $0x4c] sm:$0xf]  ;;  %2475 = vst.msk [vmem:[#allocation2 + $0x8] sm:$0xff] %vm2473_vm12, %v2428_v28 }
 0x123   : > { %v1790_v19 = vrot.slane %v1789_v52, 4  ;;  %v1596_v10 = vrot.slane %v1594_v27, 5  ;;  %v1602_v11 = vrot.slane %v1600_v61, 5  ;;  %v1606_v15 = vrot.slane %v1604_v26, 4  ;;  %v5965_v33 = vpop.permute.xlu1 %2986  ;;  %v4888_v34 = vld [vmem:[%s5327_s21 + $0x48] sm:$0xff]  }
 0x124   : > { %v1800_v14 = vrot.slane %v1799_v49, 4  ;;  %v1612_v16 = vrot.slane %v1610_v6, 5  ;;  %v1810_v23 = vshll.u32 %v4209_v59, 16  ;;  %v1816_v24 = vshll.u32 %v4210_v17, 16  ;;  %v4187_v37 = vld [vmem:[%s5327_s21 + $0x50] sm:$0x1] }
 0x125   : > { %1213 = vrot.lane.b32.xlu0 %v4111_v60, %s5101_s20  ;;  %v1795_v21 = vsel %vm5387_vm5, %v1790_v19, %v1794_v42  ;;  %v1597_v22 = vor.u32 %v1596_v10, %v1593_v9  ;;  %v1607_v30 = vor.u32 %v1606_v15, %v1602_v11  ;;  %v1809_v31 = vrot.slane %v1807_v18, 4  ;;  %v4270_v47 = vld [vmem:[%s5327_s21 + $0x9c] sm:$0xe]  ;;  %v4271_v48 = vld [vmem:[%s5327_s21 + $0xa0] sm:$0xf]  ;;  %v2971_v51 = vpop.permute.xlu0 %2970  ;;  %3027 = vst.msk [vmem:[#allocation2 + $0x40] sm:$0xff] %vm3018_vm13, %v5965_v33 }
 0x126   : > { %1405 = vrot.lane.b32.xlu1 %v4885_v3, %s5100_s22  ;;  %v1805_v29 = vsel %vm5387_vm5, %v1800_v14, %v1804_v1  ;;  %v1820_v32 = vshrl.u32 %v4210_v17, 16  ;;  %v1812_v8 = vrot.slane %v1810_v23, 5  ;;  %v1818_v25 = vrot.slane %v1816_v24, 5  ;;  %v4272_v57 = vld [vmem:[%s5327_s21 + $0xa4] sm:$0x1]  ;;  %3019 = vst.msk [vmem:[#allocation2] sm:$0xff] %vm3018_vm13, %v2971_v51 }
 0x127   : > { %v4230_v35 = vcombine.low %v1795_v21, %v1805_v29  ;;  %v1598_v36 = vrot.slane %v1597_v22, 4  ;;  %v1608_v38 = vrot.slane %v1607_v30, 4  ;;  %v1826_v40 = vshll.u32 %v4211_v12, 16  ;;  %v4246_v58 = vld [vmem:[%s5327_s21 + $0x3c] sm:$0xe]  ;;  %v2989_v59 = vpop.permute.xlu1 %2988 }
 0x128   : > { %v1822_v39 = vrot.slane %v1820_v32, 4  ;;  %v1615_v41 = vshrl.u32 %v4185_v13, 16  ;;  %v1813_v44 = vor.u32 %v1812_v8, %v1809_v31  ;;  %v1618_v45 = vshll.u32 %v4185_v13, 16  ;;  %v4247_v17 = vld [vmem:[%s5327_s21 + $0x40] sm:$0xf]  ;;  %3028 = vst.msk [vmem:[#allocation2 + $0x48] sm:$0xff] %vm3018_vm13, %v2989_v59 }
 0x129   : > { %1389 = vrot.lane.b32.xlu0 %v4886_v4, %s5100_s22  ;;  %v1603_v43 = vsel %vm5387_vm5, %v1598_v36, %v1602_v11  ;;  %v1624_v46 = vshll.u32 %v4186_v20, 16  ;;  %v1613_v53 = vsel %vm5387_vm5, %v1608_v38, %v1612_v16  ;;  %v1828_v55 = vrot.slane %v1826_v40, 5  ;;  %v4248_v3 = vld [vmem:[%s5327_s21 + $0x44] sm:$0x1]  ;;  %v4273_v62 = vld [vmem:[%s5327_s21 + $0xa8] sm:$0xe] }
 0x12a   : > { %1407 = vrot.lane.b32.xlu1 %v4887_v50, %s5100_s22  ;;  %v1823_v54 = vor.u32 %v1822_v39, %v1818_v25  ;;  %v1617_v56 = vrot.slane %v1615_v41, 4  ;;  %v4222_v60 = vcombine.low %v1603_v43, %v1613_v53  ;;  %v1814_v42 = vrot.slane %v1813_v44, 4  ;;  %v4274_v10 = vld [vmem:[%s5327_s21 + $0xac] sm:$0xf]  ;;  %v4275_v15 = vld [vmem:[%s5327_s21 + $0xb0] sm:$0x1]  ;;  %v2973_v18 = vpop.permute.xlu0 %2972 }
 0x12b   : > { %v1620_v63 = vrot.slane %v1618_v45, 5  ;;  %v1626_v1 = vrot.slane %v1624_v46, 5  ;;  %v1628_v2 = vshrl.u32 %v4186_v20, 16  ;;  %v1634_v27 = vshll.u32 %v4187_v37, 16  ;;  %v4249_v16 = vld [vmem:[%s5327_s21 + $0x48] sm:$0xe]  ;;  %v3308_v24 = vpop.permute.xlu1 %3307 }
 0x12c   : > { %v1824_v52 = vrot.slane %v1823_v54, 4  ;;  %v4294_v61 = vrot.slane %v4270_v47, 9  ;;  %v1819_v4 = vsel %vm5387_vm5, %v1814_v42, %v1818_v25  ;;  %v2173_v26 = vrot.slane %v4271_v48, 5  ;;  %v4250_v23 = vld [vmem:[%s5327_s21 + $0x4c] sm:$0xf]  ;;  %3020 = vst.msk [vmem:[#allocation2 + $0x8] sm:$0xff] %vm3018_vm13, %v2973_v18 }
 0x12d   : > { %1391 = vrot.lane.b32.xlu0 %v4888_v34, %s5100_s22  ;;  %v1621_v49 = vor.u32 %v1620_v63, %v1617_v56  ;;  %v2176_v6 = vrot.slane %v4272_v57, 5  ;;  %v1630_v50 = vrot.slane %v1628_v2, 4  ;;  %v1636_v19 = vrot.slane %v1634_v27, 5  ;;  %v4251_v32 = vld [vmem:[%s5327_s21 + $0x50] sm:$0x1]  ;;  %3348 = vst.msk [vmem:[#allocation2 + $0x40] sm:$0xff] %vm3339_vm14, %v3308_v24 }
 0x12e   : > { %1950 = vrot.lane.b32.xlu1 %v4230_v35, %s5103_s11  ;;  %v1829_v7 = vsel %vm5387_vm5, %v1824_v52, %v1828_v55  ;;  %v4286_v9 = vrot.slane %v4246_v58, 9  ;;  %v2174_v13 = vsel %vm5337_vm2, %v4294_v61, %v2173_v26  ;;  %v2175_v14 = vrot.slane %v2173_v26, 4  ;;  %v4398_v34 = vld [vmem:[%s5327_s21 + $0xa8] sm:$0xf]  ;;  %v4399_v37 = vld [vmem:[%s5327_s21 + $0xac] sm:$0xf]  ;;  %v3292_v43 = vpop.permute.xlu0 %3291 }
 0x12f   : > { %v4231_v11 = vcombine.low %v1819_v4, %v1829_v7  ;;  %v1622_v12 = vrot.slane %v1621_v49, 4  ;;  %v1631_v20 = vor.u32 %v1630_v50, %v1626_v1  ;;  %v2117_v21 = vrot.slane %v4247_v17, 5  ;;  %v4400_v38 = vld [vmem:[%s5327_s21 + $0xb0] sm:$0x1]  ;;  %v4374_v54 = vld [vmem:[%s5327_s21 + $0x48] sm:$0xf] }
 0x130   : > { %v2120_v22 = vrot.slane %v4248_v3, 5  ;;  %v2177_v29 = vsel %vm5337_vm2, %v2175_v14, %v2176_v6  ;;  %v4295_v30 = vrot.slane %v4273_v62, 9  ;;  %v2180_v31 = vrot.slane %v4274_v10, 5  ;;  %3340 = vst.msk [vmem:[#allocation2] sm:$0xff] %vm3339_vm14, %v3292_v43  ;;  %v4375_v17 = vld [vmem:[%s5327_s21 + $0x4c] sm:$0xf] }
 0x131   : > { %1934 = vrot.lane.b32.xlu0 %v4222_v60, %s5103_s11  ;;  %v1627_v28 = vsel %vm5387_vm5, %v1622_v12, %v1626_v1  ;;  %v1632_v35 = vrot.slane %v1631_v20, 4  ;;  %v4310_v36 = vcombine.low %v2174_v13, %v2177_v29  ;;  %v2118_v8 = vsel %vm5337_vm2, %v4286_v9, %v2117_v21  ;;  %v4376_v2 = vld [vmem:[%s5327_s21 + $0x50] sm:$0x1]  ;;  %v4893_v4 = vld [vmem:[%s5327_s21 + $0xa8] sm:$0xff]   ;;  %v4401_v50 = vld [vmem:[%s5327_s21 + $0xb4] sm:$0xf] }
 0x132   : > { %1952 = vrot.lane.b32.xlu1 %v4231_v11, %s5103_s11  ;;  %v2119_v25 = vrot.slane %v2117_v21, 4  ;;  %v2181_v33 = vsel %vm5337_vm2, %v4295_v30, %v2180_v31  ;;  %v2182_v39 = vrot.slane %v2180_v31, 4  ;;  %v2183_v40 = vrot.slane %v4275_v15, 5  ;;  %v900_v58 = vpop.permute.xlu1 %899  ;;  %v4402_v18 = vld [vmem:[%s5327_s21 + $0xb8] sm:$0xf] }
 0x133   : > { %v4287_v41 = vrot.slane %v4249_v16, 9  ;;  %v1637_v44 = vsel %vm5387_vm5, %v1632_v35, %v1636_v19  ;;  %v2124_v46 = vrot.slane %v4250_v23, 5  ;;  %v2127_v47 = vrot.slane %v4251_v32, 5  ;;  %938 = vst.msk [vmem:[#allocation2 + $0x50] sm:$0xff] %vm927_vm7, %v900_v58  ;;  %v4896_v20 = vld [vmem:[%s5327_s21 + $0xb4] sm:$0xff]  }
 0x134   : > { %v2121_v45 = vsel %vm5337_vm2, %v2119_v25, %v2120_v22  ;;  %v4223_v48 = vcombine.low %v1627_v28, %v1637_v44  ;;  %v2184_v53 = vsel %vm5337_vm2, %v2182_v39, %v2183_v40  ;;  %v2827_v59 = vshrl.u32 %v4398_v34, 16  ;;  %v4403_v23 = vld [vmem:[%s5327_s21 + $0xbc] sm:$0x1]  ;;  %v4894_v39 = vld [vmem:[%s5327_s21 + $0x48] sm:$0xff]  }
 0x135   : > { %v4302_v51 = vcombine.low %v2118_v8, %v2121_v45  ;;  %v4311_v55 = vcombine.low %v2181_v33, %v2184_v53  ;;  %v2125_v56 = vsel %vm5337_vm2, %v4287_v41, %v2124_v46  ;;  %v2126_v57 = vrot.slane %v2124_v46, 4  ;;  %v884_v49 = vpop.permute.xlu0 %883  ;;  %v4377_v33 = vld [vmem:[%s5327_s21 + $0x54] sm:$0xf]  ;;  %v4378_v45 = vld [vmem:[%s5327_s21 + $0x58] sm:$0xf] }
 0x136   : > { %2271 = vrot.lane.b32.xlu1 %v4310_v36, %s5104_s18  ;;  %1936 = vrot.lane.b32.xlu0 %v4223_v48, %s5103_s11  ;;  %v2830_v60 = vshll.u32 %v4398_v34, 16  ;;  %v2836_v42 = vshll.u32 %v4399_v37, 16  ;;  %v2840_v63 = vshrl.u32 %v4399_v37, 16  ;;  %v2846_v1 = vshll.u32 %v4400_v38, 16  ;;  %930 = vst.msk [vmem:[#allocation2 + $0x10] sm:$0xff] %vm927_vm7, %v884_v49  ;;  %v3310_v12 = vpop.permute.xlu1 %3309  ;;  %v3381_v36 = vld [vmem:[#allocation2 + $0x40] sm:$0xff] }
 0x137   : > { %v2128_v3 = vsel %vm5337_vm2, %v2126_v57, %v2127_v47  ;;  %v2829_v52 = vrot.slane %v2827_v59, 4  ;;  %v2635_v27 = vshrl.u32 %v4374_v54, 16  ;;  %v2638_v61 = vshll.u32 %v4374_v54, 16  ;;  %3349 = vst.msk [vmem:[#allocation2 + $0x48] sm:$0xff] %vm3339_vm14, %v3310_v12  ;;  %v3373_v35 = vld [vmem:[#allocation2] sm:$0xff]  ;;  %4735 = vmatprep.mubr.bf16.mxu1 %v3381_v36 }
 0x138   : > { %v4303_v62 = vcombine.low %v2125_v56, %v2128_v3  ;;  %v2832_v26 = vrot.slane %v2830_v60, 5  ;;  %v2838_v6 = vrot.slane %v2836_v42, 5  ;;  %v2842_v7 = vrot.slane %v2840_v63, 4  ;;  %4719 = vmatprep.mubr.bf16.mxu0 %v3373_v35  ;;  %v4379_v53 = vld [vmem:[%s5327_s21 + $0x5c] sm:$0x1]  ;;  %v4897_v60 = vld [vmem:[%s5327_s21 + $0x54] sm:$0xff]  }
 0x139   : > { %v2848_v19 = vrot.slane %v2846_v1, 5  ;;  %v2637_v9 = vrot.slane %v2635_v27, 4  ;;  %v2640_v10 = vrot.slane %v2638_v61, 5  ;;  %v2644_v11 = vshll.u32 %v4375_v17, 16  ;;  %v3294_v34 = vpop.permute.xlu0 %3293  ;;  %v4462_v54 = vld [vmem:[%s5327_s21 + $0xa8] sm:$0xe] }
 0x13a   : > { %2273 = vrot.lane.b32.xlu1 %v4311_v55, %s5104_s18  ;;  %2255 = vrot.lane.b32.xlu0 %v4302_v51, %s5104_s18  ;;  %v2833_v13 = vor.u32 %v2832_v26, %v2829_v52  ;;  %v2843_v14 = vor.u32 %v2842_v7, %v2838_v6  ;;  %v2648_v15 = vshrl.u32 %v4375_v17, 16  ;;  %v2654_v16 = vshll.u32 %v4376_v2, 16  ;;  %3341 = vst.msk [vmem:[#allocation2 + $0x8] sm:$0xff] %vm3339_vm14, %v3294_v34  ;;  %v4463_v59 = vld [vmem:[%s5327_s21 + $0xac] sm:$0xf] }
 0x13b   : > { %v2641_v21 = vor.u32 %v2640_v10, %v2637_v9  ;;  %v2646_v22 = vrot.slane %v2644_v11, 5  ;;  %v2851_v24 = vshrl.u32 %v4401_v50, 16  ;;  %v2854_v28 = vshll.u32 %v4401_v50, 16  ;;  %v4438_v49 = vld [vmem:[%s5327_s21 + $0x48] sm:$0xe] }
 0x13c   : > { %v2834_v29 = vrot.slane %v2833_v13, 4  ;;  %v2844_v30 = vrot.slane %v2843_v14, 4  ;;  %v2650_v31 = vrot.slane %v2648_v15, 4  ;;  %v2656_v32 = vrot.slane %v2654_v16, 5  ;;  %v439_v36 = vld [vmem:[%s5327_s21 + $0xac] sm:$0xf] }
 0x13d   : > { %v2642_v8 = vrot.slane %v2641_v21, 4  ;;  %v2853_v25 = vrot.slane %v2851_v24, 4  ;;  %v2856_v37 = vrot.slane %v2854_v28, 5  ;;  %v2860_v38 = vshll.u32 %v4402_v18, 16 }
 0x13e   : > { %2449 = vrot.lane.b32.xlu1 %v4893_v4, %s5105_s4  ;;  %2257 = vrot.lane.b32.xlu0 %v4303_v62, %s5104_s18  ;;  %v2839_v40 = vsel %vm5387_vm5, %v2834_v29, %v2838_v6  ;;  %v2849_v41 = vsel %vm5387_vm5, %v2844_v30, %v2848_v19  ;;  %v2651_v43 = vor.u32 %v2650_v31, %v2646_v22  ;;  %v2864_v44 = vshrl.u32 %v4402_v18, 16  ;;  %v3382_v3 = vld [vmem:[#allocation2 + $0x48] sm:$0xff]  ;;  %v902_v62 = vpop.permute.xlu1 %901 }
 0x13f   : > { %v4422_v46 = vcombine.low %v2839_v40, %v2849_v41  ;;  %v2647_v47 = vsel %vm5387_vm5, %v2642_v8, %v2646_v22  ;;  %v2857_v48 = vor.u32 %v2856_v37, %v2853_v25  ;;  %v2862_v51 = vrot.slane %v2860_v38, 5  ;;  %v4464_v4 = vld [vmem:[%s5327_s21 + $0xb0] sm:$0x1]  ;;  %4736 = vmatmul.mubr.bf16.vlgmr.msra.gmra.mrb[0].mxu1 %v3382_v3  ;;  %939 = vst.msk [vmem:[#allocation2 + $0x58] sm:$0xff] %vm927_vm7, %v902_v62  ;;  %v4439_v19 = vld [vmem:[%s5327_s21 + $0x4c] sm:$0xf] }
 0x140   : > { %v2652_v55 = vrot.slane %v2651_v43, 4  ;;  %v2866_v56 = vrot.slane %v2864_v44, 4  ;;  %v2870_v57 = vshll.u32 %v4403_v23, 16  ;;  %v2659_v58 = vshrl.u32 %v4377_v33, 16  ;;  %v438_v30 = vld [vmem:[%s5327_s21 + $0xa8] sm:$0xf] }
 0x141   : > { %v2858_v42 = vrot.slane %v2857_v48, 4  ;;  %v2662_v63 = vshll.u32 %v4377_v33, 16  ;;  %v2668_v1 = vshll.u32 %v4378_v45, 16  ;;  %v2672_v17 = vshrl.u32 %v4378_v45, 16  ;;  %v886_v12 = vpop.permute.xlu0 %885  ;;  %v3374_v14 = vld [vmem:[#allocation2 + $0x8] sm:$0xff] }
 0x142   : > { %2451 = vrot.lane.b32.xlu1 %v4896_v20, %s5105_s4  ;;  %2433 = vrot.lane.b32.xlu0 %v4894_v39, %s5105_s4  ;;  %v2657_v52 = vsel %vm5387_vm5, %v2652_v55, %v2656_v32  ;;  %v2867_v2 = vor.u32 %v2866_v56, %v2862_v51  ;;  %v2872_v27 = vrot.slane %v2870_v57, 5  ;;  %v2661_v61 = vrot.slane %v2659_v58, 4  ;;  %931 = vst.msk [vmem:[#allocation2 + $0x18] sm:$0xff] %vm927_vm7, %v886_v12  ;;  %v4440_v20 = vld [vmem:[%s5327_s21 + $0x50] sm:$0x1]  ;;  %v1224_v29 = vpop.permute.xlu1 %1223  ;;  %v4917_v56 = vld [vmem:[%s5327_s21 + $0xa8] sm:$0xff]  }
 0x143   : > { %v4414_v26 = vcombine.low %v2647_v47, %v2657_v52  ;;  %v2863_v6 = vsel %vm5387_vm5, %v2858_v42, %v2862_v51  ;;  %v2664_v7 = vrot.slane %v2662_v63, 5  ;;  %v2670_v50 = vrot.slane %v2668_v1, 5  ;;  %4720 = vmatmul.mubr.bf16.vlgmr.msra.gmra.mrb[0].mxu0 %v3374_v14  ;;  %1262 = vst.msk [vmem:[#allocation2 + $0x50] sm:$0xff] %vm1251_vm8, %v1224_v29  ;;  %v440_v41 = vld [vmem:[%s5327_s21 + $0xb0] sm:$0x1] }
 0x144   : > { %v2868_v9 = vrot.slane %v2867_v2, 4  ;;  %v2674_v10 = vrot.slane %v2672_v17, 4  ;;  %v2678_v11 = vshll.u32 %v4379_v53, 16  ;;  %v4486_v13 = vrot.slane %v4462_v54, 9  ;;  %v414_v45 = vld [vmem:[%s5327_s21 + $0x48] sm:$0xf] }
 0x145   : > { %v2665_v15 = vor.u32 %v2664_v7, %v2661_v61  ;;  %v3217_v16 = vrot.slane %v4463_v59, 5  ;;  %v3220_v18 = vrot.slane %v4464_v4, 5  ;;  %v4478_v21 = vrot.slane %v4438_v49, 9  ;;  %v1208_v33 = vpop.permute.xlu0 %1207  ;;  %v415_v53 = vld [vmem:[%s5327_s21 + $0x4c] sm:$0xf]  ;;  %394 = vst.msk [vmem:[#allocation2 + $0x70] sm:$0xff] %vm379_vm6, %v4917_v56 }
 0x146   : > { %2994 = vrot.lane.b32.xlu1 %v4422_v46, %s5106_s8  ;;  %2435 = vrot.lane.b32.xlu0 %v4897_v60, %s5105_s4  ;;  %v2873_v22 = vsel %vm5387_vm5, %v2868_v9, %v2872_v27  ;;  %v2675_v23 = vor.u32 %v2674_v10, %v2670_v50  ;;  %v2680_v24 = vrot.slane %v2678_v11, 5  ;;  %v3161_v28 = vrot.slane %v4439_v19, 5  ;;  %1254 = vst.msk [vmem:[#allocation2 + $0x10] sm:$0xff] %vm1251_vm8, %v1208_v33  ;;  %v416_v54 = vld [vmem:[%s5327_s21 + $0x50] sm:$0x1]  ;;  %v1226_v55 = vpop.permute.xlu1 %1225 }
 0x147   : > { %v4423_v31 = vcombine.low %v2863_v6, %v2873_v22  ;;  %v2666_v32 = vrot.slane %v2665_v15, 4  ;;  %v3218_v34 = vsel %vm5337_vm2, %v4486_v13, %v3217_v16  ;;  %v3219_v35 = vrot.slane %v3217_v16, 4  ;;  %1263 = vst.msk [vmem:[#allocation2 + $0x58] sm:$0xff] %vm1251_vm8, %v1226_v55  ;;  %v4465_v42 = vld [vmem:[%s5327_s21 + $0xb4] sm:$0xe]  ;;  %v4918_v6 = vld [vmem:[%s5327_s21 + $0x48] sm:$0xff]  }
 0x148   : > { %v2676_v8 = vrot.slane %v2675_v23, 4  ;;  %v6079_v25 = vsel %vm5337_vm2, %v4478_v21, %v3161_v28  ;;  %v3163_v37 = vrot.slane %v3161_v28, 4  ;;  %v3164_v38 = vrot.slane %v4440_v20, 5  ;;  %v4466_v63 = vld [vmem:[%s5327_s21 + $0xb8] sm:$0xf]  ;;  %386 = vst.msk [vmem:[#allocation2 + $0x30] sm:$0xff] %vm379_vm6, %v4918_v6 }
 0x149   : > { %v2671_v39 = vsel %vm5387_vm5, %v2666_v32, %v2670_v50  ;;  %v3221_v40 = vsel %vm5337_vm2, %v3219_v35, %v3220_v18  ;;  %v784_v43 = vshrl.u32 %v438_v30, 16  ;;  %v787_v44 = vshll.u32 %v438_v30, 16  ;;  %v1210_v2 = vpop.permute.xlu0 %1209  ;;  %v4467_v27 = vld [vmem:[%s5327_s21 + $0xbc] sm:$0x1]  ;;  %v4442_v10 = vld [vmem:[%s5327_s21 + $0x58] sm:$0xf] }
 0x14a   : > { %2996 = vrot.lane.b32.xlu1 %v4423_v31, %s5106_s8  ;;  %2978 = vrot.lane.b32.xlu0 %v4414_v26, %s5106_s8  ;;  %v2681_v46 = vsel %vm5387_vm5, %v2676_v8, %v2680_v24  ;;  %v4502_v47 = vcombine.low %v3218_v34, %v3221_v40  ;;  %v3165_v48 = vsel %vm5337_vm2, %v3163_v37, %v3164_v38  ;;  %v793_v51 = vshll.u32 %v439_v36, 16  ;;  %v4441_v26 = vld [vmem:[%s5327_s21 + $0x54] sm:$0xe]  ;;  %v4443_v11 = vld [vmem:[%s5327_s21 + $0x5c] sm:$0x1]  ;;  %v1402_v12 = vpop.permute.xlu1 %1401 }
 0x14b   : > { %v4415_v57 = vcombine.low %v2671_v39, %v2681_v46  ;;  %v4494_v58 = vcombine.low %v6079_v25, %v3165_v48  ;;  %v786_v59 = vrot.slane %v784_v43, 4  ;;  %v789_v60 = vrot.slane %v787_v44, 5  ;;  %1255 = vst.msk [vmem:[#allocation2 + $0x18] sm:$0xff] %vm1251_vm8, %v1210_v2  ;;  %v441_v18 = vld [vmem:[%s5327_s21 + $0xb4] sm:$0xf] }
 0x14c   : > { %v795_v1 = vrot.slane %v793_v51, 5  ;;  %v797_v17 = vshrl.u32 %v439_v36, 16  ;;  %v803_v3 = vshll.u32 %v440_v41, 16  ;;  %v592_v52 = vshrl.u32 %v414_v45, 16  ;;  %1440 = vst.msk [vmem:[#allocation2 + $0x50] sm:$0xff] %vm1429_vm9, %v1402_v12 }
 0x14d   : > { %v790_v61 = vor.u32 %v789_v60, %v786_v59  ;;  %v595_v62 = vshll.u32 %v414_v45, 16  ;;  %v601_v4 = vshll.u32 %v415_v53, 16  ;;  %v605_v49 = vshrl.u32 %v415_v53, 16  ;;  %v1386_v24 = vpop.permute.xlu0 %1385  ;;  %v442_v8 = vld [vmem:[%s5327_s21 + $0xb8] sm:$0xf] }
 0x14e   : > { %3315 = vrot.lane.b32.xlu1 %v4502_v47, %s5107_s9  ;;  %2980 = vrot.lane.b32.xlu0 %v4415_v57, %s5106_s8  ;;  %v799_v7 = vrot.slane %v797_v17, 4  ;;  %v805_v50 = vrot.slane %v803_v3, 5  ;;  %v594_v19 = vrot.slane %v592_v52, 4  ;;  %v611_v9 = vshll.u32 %v416_v54, 16  ;;  %1432 = vst.msk [vmem:[#allocation2 + $0x10] sm:$0xff] %vm1429_vm9, %v1386_v24  ;;  %v1404_v37 = vpop.permute.xlu1 %1403  ;;  %v4920_v24 = vld [vmem:[%s5327_s21 + $0x54] sm:$0xff]  }
 0x14f   : > { %v791_v13 = vrot.slane %v790_v61, 4  ;;  %v597_v14 = vrot.slane %v595_v62, 5  ;;  %v603_v15 = vrot.slane %v601_v4, 5  ;;  %v607_v16 = vrot.slane %v605_v49, 4  ;;  %v443_v25 = vld [vmem:[%s5327_s21 + $0xbc] sm:$0x1] }
 0x150   : > { %v800_v20 = vor.u32 %v799_v7, %v795_v1  ;;  %v613_v21 = vrot.slane %v611_v9, 5  ;;  %v4487_v22 = vrot.slane %v4465_v42, 9  ;;  %v3224_v23 = vrot.slane %v4466_v63, 5  ;;  %1441 = vst.msk [vmem:[#allocation2 + $0x58] sm:$0xff] %vm1429_vm9, %v1404_v37  ;;  %v417_v54 = vld [vmem:[%s5327_s21 + $0x54] sm:$0xf] }
 0x151   : > { %v796_v28 = vsel %vm5387_vm5, %v791_v13, %v795_v1  ;;  %v598_v29 = vor.u32 %v597_v14, %v594_v19  ;;  %v608_v30 = vor.u32 %v607_v16, %v603_v15  ;;  %v3227_v31 = vrot.slane %v4467_v27, 5  ;;  %v1388_v46 = vpop.permute.xlu0 %1387  ;;  %v418_v55 = vld [vmem:[%s5327_s21 + $0x58] sm:$0xf]  ;;  %v419_v60 = vld [vmem:[%s5327_s21 + $0x5c] sm:$0x1]  ;;  %387 = vst.msk [vmem:[#allocation2 + $0x38] sm:$0xff] %vm379_vm6, %v4920_v24 }
 0x152   : > { %3299 = vrot.lane.b32.xlu0 %v4494_v58, %s5107_s9  ;;  %v801_v32 = vrot.slane %v800_v20, 4  ;;  %v3225_v34 = vsel %vm5337_vm2, %v4487_v22, %v3224_v23  ;;  %v3226_v35 = vrot.slane %v3224_v23, 4  ;;  %v4479_v36 = vrot.slane %v4441_v26, 9  ;;  %1433 = vst.msk [vmem:[#allocation2 + $0x18] sm:$0xff] %vm1429_vm9, %v1388_v46  ;;  %v1947_v42 = vpop.permute.xlu1 %1946  ;;  %v986_v52 = vld [vmem:[%s5327_s21 + $0xa8] sm:$0xe] }
 0x153   : > { %v599_v38 = vrot.slane %v598_v29, 4  ;;  %v609_v33 = vrot.slane %v608_v30, 4  ;;  %v3168_v39 = vrot.slane %v4442_v10, 5  ;;  %v3171_v40 = vrot.slane %v4443_v11, 5  ;;  %1985 = vst.msk [vmem:[#allocation2 + $0x50] sm:$0xff] %vm1974_vm10, %v1947_v42  ;;  %v4919_v26 = vld [vmem:[%s5327_s21 + $0xb4] sm:$0xff]  }
 0x154   : > { %v806_v41 = vsel %vm5387_vm5, %v801_v32, %v805_v50  ;;  %v3228_v43 = vsel %vm5337_vm2, %v3226_v35, %v3227_v31  ;;  %v808_v44 = vshrl.u32 %v441_v18, 16  ;;  %v811_v45 = vshll.u32 %v441_v18, 16  ;;  %v987_v4 = vld [vmem:[%s5327_s21 + $0xac] sm:$0xf]  ;;  %v988_v9 = vld [vmem:[%s5327_s21 + $0xb0] sm:$0x1] }
 0x155   : > { %v4088_v47 = vcombine.low %v796_v28, %v806_v41  ;;  %v604_v48 = vsel %vm5387_vm5, %v599_v38, %v603_v15  ;;  %v614_v51 = vsel %vm5387_vm5, %v609_v33, %v613_v21  ;;  %v4503_v53 = vcombine.low %v3225_v34, %v3228_v43  ;;  %v1931_v49 = vpop.permute.xlu0 %1930  ;;  %v962_v10 = vld [vmem:[%s5327_s21 + $0x48] sm:$0xe]  ;;  %v963_v15 = vld [vmem:[%s5327_s21 + $0x4c] sm:$0xf]  ;;  %395 = vst.msk [vmem:[#allocation2 + $0x78] sm:$0xff] %vm379_vm6, %v4919_v26 }
 0x156   : > { %v4080_v56 = vcombine.low %v604_v48, %v614_v51  ;;  %v3169_v57 = vsel %vm5337_vm2, %v4479_v36, %v3168_v39  ;;  %v3170_v58 = vrot.slane %v3168_v39, 4  ;;  %v810_v59 = vrot.slane %v808_v44, 4  ;;  %1977 = vst.msk [vmem:[#allocation2 + $0x10] sm:$0xff] %vm1974_vm10, %v1931_v49  ;;  %v1949_v16 = vpop.permute.xlu1 %1948  ;;  %v964_v23 = vld [vmem:[%s5327_s21 + $0x50] sm:$0x1] }
 0x157   : > { %907 = vrot.lane.b32.xlu1 %v4088_v47, %s5102_s24  ;;  %v813_v63 = vrot.slane %v811_v45, 5  ;;  %v817_v1 = vshll.u32 %v442_v8, 16  ;;  %v821_v17 = vshrl.u32 %v442_v8, 16  ;;  %v827_v3 = vshll.u32 %v443_v25, 16  ;;  %1986 = vst.msk [vmem:[#allocation2 + $0x58] sm:$0xff] %vm1974_vm10, %v1949_v16 }
 0x158   : > { %891 = vrot.lane.b32.xlu0 %v4080_v56, %s5102_s24  ;;  %v3172_v2 = vsel %vm5337_vm2, %v3170_v58, %v3171_v40  ;;  %v616_v27 = vshrl.u32 %v417_v54, 16  ;;  %v619_v61 = vshll.u32 %v417_v54, 16  ;;  %v625_v62 = vshll.u32 %v418_v55, 16  ;;  %v989_v32 = vld [vmem:[%s5327_s21 + $0xb4] sm:$0xe] }
 0x159   : > { %v4495_v6 = vcombine.low %v3169_v57, %v3172_v2  ;;  %v814_v7 = vor.u32 %v813_v63, %v810_v59  ;;  %v819_v50 = vrot.slane %v817_v1, 5  ;;  %v823_v19 = vrot.slane %v821_v17, 4  ;;  %v990_v25 = vld [vmem:[%s5327_s21 + $0xb8] sm:$0xf]  ;;  %v991_v40 = vld [vmem:[%s5327_s21 + $0xbc] sm:$0x1] }
 0x15a   : > { %v829_v11 = vrot.slane %v827_v3, 5  ;;  %v618_v12 = vrot.slane %v616_v27, 4  ;;  %v621_v13 = vrot.slane %v619_v61, 5  ;;  %v6147_v14 = vrot.slane %v625_v62, 5  ;;  %v1933_v41 = vpop.permute.xlu0 %1932  ;;  %v2268_v43 = vpop.permute.xlu1 %2267  ;;  %v965_v48 = vld [vmem:[%s5327_s21 + $0x54] sm:$0xe] }
 0x15b   : > { %3317 = vrot.lane.b32.xlu1 %v4503_v53, %s5107_s9  ;;  %v815_v18 = vrot.slane %v814_v7, 4  ;;  %v824_v20 = vor.u32 %v823_v19, %v819_v50  ;;  %v629_v21 = vshrl.u32 %v418_v55, 16  ;;  %v635_v22 = vshll.u32 %v419_v60, 16  ;;  %v966_v51 = vld [vmem:[%s5327_s21 + $0x58] sm:$0xf]  ;;  %1978 = vst.msk [vmem:[#allocation2 + $0x18] sm:$0xff] %vm1974_vm10, %v1933_v41 }
 0x15c   : > { %3301 = vrot.lane.b32.xlu0 %v4495_v6, %s5107_s9  ;;  %v622_v28 = vor.u32 %v621_v13, %v618_v12  ;;  %v4104_v29 = vrot.slane %v986_v52, 9  ;;  %v1143_v30 = vrot.slane %v987_v4, 5  ;;  %v1146_v31 = vrot.slane %v988_v9, 5  ;;  %2306 = vst.msk [vmem:[#allocation2 + $0x50] sm:$0xff] %vm2295_vm11, %v2268_v43  ;;  %v967_v57 = vld [vmem:[%s5327_s21 + $0x5c] sm:$0x1] }
 0x15d   : > { %v820_v34 = vsel %vm5387_vm5, %v815_v18, %v819_v50  ;;  %v825_v35 = vrot.slane %v824_v20, 4  ;;  %v631_v36 = vrot.slane %v629_v21, 4  ;;  %v637_v8 = vrot.slane %v635_v22, 5  ;;  %v4212_v58 = vld [vmem:[%s5327_s21 + $0xb4] sm:$0xf] }
 0x15e   : > { %v623_v37 = vrot.slane %v622_v28, 4  ;;  %v1144_v38 = vsel %vm5337_vm2, %v4104_v29, %v1143_v30  ;;  %v1145_v33 = vrot.slane %v1143_v30, 4  ;;  %v4096_v39 = vrot.slane %v962_v10, 9  ;;  %v2252_v2 = vpop.permute.xlu0 %2251  ;;  %v2270_v27 = vpop.permute.xlu1 %2269  ;;  %v4213_v49 = vld [vmem:[%s5327_s21 + $0xb8] sm:$0xf] }
 0x15f   : > { %v830_v44 = vsel %vm5387_vm5, %v825_v35, %v829_v11  ;;  %v632_v45 = vor.u32 %v631_v36, %v6147_v14  ;;  %v1087_v46 = vrot.slane %v963_v15, 5  ;;  %v1090_v47 = vrot.slane %v964_v23, 5  ;;  %2298 = vst.msk [vmem:[#allocation2 + $0x10] sm:$0xff] %vm2295_vm11, %v2252_v2  ;;  %2307 = vst.msk [vmem:[#allocation2 + $0x58] sm:$0xff] %vm2295_vm11, %v2270_v27  ;;  %v4214_v26 = vld [vmem:[%s5327_s21 + $0xbc] sm:$0x1] }
 0x160   : > { %v4089_v53 = vcombine.low %v820_v34, %v830_v44  ;;  %v628_v54 = vsel %vm5387_vm5, %v623_v37, %v6147_v14  ;;  %v1147_v55 = vsel %vm5337_vm2, %v1145_v33, %v1146_v31  ;;  %v4105_v56 = vrot.slane %v989_v32, 9  ;;  %v4188_v10 = vld [vmem:[%s5327_s21 + $0x54] sm:$0xf]  ;;  %v4189_v11 = vld [vmem:[%s5327_s21 + $0x58] sm:$0xf] }
 0x161   : > { %v633_v59 = vrot.slane %v632_v45, 4  ;;  %v4120_v60 = vcombine.low %v1144_v38, %v1147_v55  ;;  %v1088_v42 = vsel %vm5337_vm2, %v4096_v39, %v1087_v46  ;;  %v1089_v63 = vrot.slane %v1087_v46, 4  ;;  %v4190_v16 = vld [vmem:[%s5327_s21 + $0x5c] sm:$0x1]  ;;  %v4215_v18 = vld [vmem:[%s5327_s21 + $0xc0] sm:$0xf] }
 0x162   : > { %909 = vrot.lane.b32.xlu1 %v4089_v53, %s5102_s24  ;;  %v1150_v1 = vrot.slane %v990_v25, 5  ;;  %v1153_v17 = vrot.slane %v991_v40, 5  ;;  %v4097_v3 = vrot.slane %v965_v48, 9  ;;  %v1094_v52 = vrot.slane %v966_v51, 5  ;;  %v2254_v21 = vpop.permute.xlu0 %2253  ;;  %v2446_v28 = vpop.permute.xlu1 %2445  ;;  %v4216_v25 = vld [vmem:[%s5327_s21 + $0xc4] sm:$0xf] }
 0x163   : > { %v638_v61 = vsel %vm5387_vm5, %v633_v59, %v637_v8  ;;  %v1091_v62 = vsel %vm5337_vm2, %v1089_v63, %v1090_v47  ;;  %v1097_v4 = vrot.slane %v967_v57, 5  ;;  %v1831_v6 = vshrl.u32 %v4212_v58, 16  ;;  %2299 = vst.msk [vmem:[#allocation2 + $0x18] sm:$0xff] %vm2295_vm11, %v2254_v21  ;;  %v4217_v40 = vld [vmem:[%s5327_s21 + $0xc8] sm:$0x1]  ;;  %v4905_v41 = vld [vmem:[%s5327_s21 + $0xb4] sm:$0xff]  }
 0x164   : > { %v4081_v7 = vcombine.low %v628_v54, %v638_v61  ;;  %v4112_v50 = vcombine.low %v1088_v42, %v1091_v62  ;;  %v1151_v19 = vsel %vm5337_vm2, %v4105_v56, %v1150_v1  ;;  %v1152_v9 = vrot.slane %v1150_v1, 4  ;;  %2484 = vst.msk [vmem:[#allocation2 + $0x50] sm:$0xff] %vm2473_vm12, %v2446_v28  ;;  %v4191_v56 = vld [vmem:[%s5327_s21 + $0x60] sm:$0xf]  ;;  %v4906_v57 = vld [vmem:[%s5327_s21 + $0x54] sm:$0xff]  }
 0x165   : > { %v1095_v12 = vsel %vm5337_vm2, %v4097_v3, %v1094_v52  ;;  %v1096_v13 = vrot.slane %v1094_v52, 4  ;;  %v1833_v14 = vrot.slane %v1831_v6, 4  ;;  %v1834_v15 = vshll.u32 %v4212_v58, 16  ;;  %v4907_v58 = vld [vmem:[%s5327_s21 + $0xc0] sm:$0xff]  }
 0x166   : > { %893 = vrot.lane.b32.xlu0 %v4081_v7, %s5102_s24  ;;  %1231 = vrot.lane.b32.xlu1 %v4120_v60, %s5101_s20  ;;  %v1154_v20 = vsel %vm5337_vm2, %v1152_v9, %v1153_v17  ;;  %v1840_v22 = vshll.u32 %v4213_v49, 16  ;;  %v1844_v23 = vshrl.u32 %v4213_v49, 16  ;;  %v1850_v24 = vshll.u32 %v4214_v26, 16  ;;  %v2430_v46 = vpop.permute.xlu0 %2429  ;;  %v2448_v48 = vpop.permute.xlu1 %2447  ;;  %v4193_v9 = vld [vmem:[%s5327_s21 + $0x68] sm:$0x1] }
 0x167   : > { %v4121_v29 = vcombine.low %v1151_v19, %v1154_v20  ;;  %v1098_v30 = vsel %vm5337_vm2, %v1096_v13, %v1097_v4  ;;  %v1836_v31 = vrot.slane %v1834_v15, 5  ;;  %v1639_v32 = vshrl.u32 %v4188_v10, 16  ;;  %2476 = vst.msk [vmem:[#allocation2 + $0x10] sm:$0xff] %vm2473_vm12, %v2430_v46  ;;  %2485 = vst.msk [vmem:[#allocation2 + $0x58] sm:$0xff] %vm2473_vm12, %v2448_v48  ;;  %v4192_v4 = vld [vmem:[%s5327_s21 + $0x64] sm:$0xf] }
 0x168   : > { %v4113_v34 = vcombine.low %v1095_v12, %v1098_v30  ;;  %v1842_v35 = vrot.slane %v1840_v22, 5  ;;  %v1846_v36 = vrot.slane %v1844_v23, 4  ;;  %v1852_v8 = vrot.slane %v1850_v24, 5  ;;  %v4908_v15 = vld [vmem:[%s5327_s21 + $0x60] sm:$0xff]   ;;  %v4277_v22 = vld [vmem:[%s5327_s21 + $0xb8] sm:$0xf] }
 0x169   : > { %v1837_v37 = vor.u32 %v1836_v31, %v1833_v14  ;;  %v1641_v38 = vrot.slane %v1639_v32, 4  ;;  %v1642_v33 = vshll.u32 %v4188_v10, 16  ;;  %v1648_v39 = vshll.u32 %v4189_v11, 16  ;;  %v4276_v14 = vld [vmem:[%s5327_s21 + $0xb4] sm:$0xe] }
 0x16a   : > { %1215 = vrot.lane.b32.xlu0 %v4112_v50, %s5101_s20  ;;  %1233 = vrot.lane.b32.xlu1 %v4121_v29, %s5101_s20  ;;  %v1847_v43 = vor.u32 %v1846_v36, %v1842_v35  ;;  %v1652_v44 = vshrl.u32 %v4189_v11, 16  ;;  %v1658_v45 = vshll.u32 %v4190_v16, 16  ;;  %v1855_v47 = vshrl.u32 %v4215_v18, 16  ;;  %v2432_v49 = vpop.permute.xlu0 %2431  ;;  %v2991_v26 = vpop.permute.xlu1 %2990  ;;  %v4278_v30 = vld [vmem:[%s5327_s21 + $0xbc] sm:$0x1] }
 0x16b   : > { %v1838_v51 = vrot.slane %v1837_v37, 4  ;;  %v1644_v53 = vrot.slane %v1642_v33, 5  ;;  %v1650_v54 = vrot.slane %v1648_v39, 5  ;;  %v1858_v55 = vshll.u32 %v4215_v18, 16  ;;  %2477 = vst.msk [vmem:[#allocation2 + $0x18] sm:$0xff] %vm2473_vm12, %v2432_v49 }
 0x16c   : > { %v1848_v59 = vrot.slane %v1847_v43, 4  ;;  %v1654_v60 = vrot.slane %v1652_v44, 4  ;;  %v1660_v42 = vrot.slane %v1658_v45, 5  ;;  %v1857_v63 = vrot.slane %v1855_v47, 4  ;;  %3029 = vst.msk [vmem:[#allocation2 + $0x50] sm:$0xff] %vm3018_vm13, %v2991_v26 }
 0x16d   : > { %v1843_v1 = vsel %vm5387_vm5, %v1838_v51, %v1842_v35  ;;  %v1645_v17 = vor.u32 %v1644_v53, %v1641_v38  ;;  %v1860_v3 = vrot.slane %v1858_v55, 5  ;;  %v1864_v52 = vshll.u32 %v4216_v25, 16  ;;  %v4252_v31 = vld [vmem:[%s5327_s21 + $0x54] sm:$0xe]  ;;  %v4253_v37 = vld [vmem:[%s5327_s21 + $0x58] sm:$0xf] }
 0x16e   : > { %1217 = vrot.lane.b32.xlu0 %v4113_v34, %s5101_s20  ;;  %1409 = vrot.lane.b32.xlu1 %v4905_v41, %s5100_s22  ;;  %v1853_v2 = vsel %vm5387_vm5, %v1848_v59, %v1852_v8  ;;  %v1655_v27 = vor.u32 %v1654_v60, %v1650_v54  ;;  %v1868_v61 = vshrl.u32 %v4216_v25, 16  ;;  %v1874_v62 = vshll.u32 %v4217_v40, 16  ;;  %v2975_v32 = vpop.permute.xlu0 %2974  ;;  %v2993_v34 = vpop.permute.xlu1 %2992  ;;  %v4254_v38 = vld [vmem:[%s5327_s21 + $0x5c] sm:$0x1]  ;;  %v4279_v43 = vld [vmem:[%s5327_s21 + $0xc0] sm:$0xe] }
 0x16f   : > { %v4232_v6 = vcombine.low %v1843_v1, %v1853_v2  ;;  %v1646_v7 = vrot.slane %v1645_v17, 4  ;;  %v1861_v50 = vor.u32 %v1860_v3, %v1857_v63  ;;  %v1866_v19 = vrot.slane %v1864_v52, 5  ;;  %3021 = vst.msk [vmem:[#allocation2 + $0x10] sm:$0xff] %vm3018_vm13, %v2975_v32  ;;  %3030 = vst.msk [vmem:[#allocation2 + $0x58] sm:$0xff] %vm3018_vm13, %v2993_v34  ;;  %v4280_v48 = vld [vmem:[%s5327_s21 + $0xc4] sm:$0xf] }
 0x170   : > { %v1656_v10 = vrot.slane %v1655_v27, 4  ;;  %v1870_v11 = vrot.slane %v1868_v61, 4  ;;  %v1876_v12 = vrot.slane %v1874_v62, 5  ;;  %v1663_v13 = vshrl.u32 %v4191_v56, 16  ;;  %v4255_v1 = vld [vmem:[%s5327_s21 + $0x60] sm:$0xe] }
 0x171   : > { %v1651_v16 = vsel %vm5387_vm5, %v1646_v7, %v1650_v54  ;;  %v1862_v18 = vrot.slane %v1861_v50, 4  ;;  %v1666_v20 = vshll.u32 %v4191_v56, 16  ;;  %v1672_v21 = vshll.u32 %v4192_v4, 16  ;;  %v4281_v56 = vld [vmem:[%s5327_s21 + $0xc8] sm:$0x1] }
 0x172   : > { %1393 = vrot.lane.b32.xlu0 %v4906_v57, %s5100_s22  ;;  %1411 = vrot.lane.b32.xlu1 %v4907_v58, %s5100_s22  ;;  %v1661_v23 = vsel %vm5387_vm5, %v1656_v10, %v1660_v42  ;;  %v1871_v24 = vor.u32 %v1870_v11, %v1866_v19  ;;  %v1665_v28 = vrot.slane %v1663_v13, 4  ;;  %v1676_v29 = vshrl.u32 %v4192_v4, 16  ;;  %v2977_v57 = vpop.permute.xlu0 %2976  ;;  %v3312_v58 = vpop.permute.xlu1 %3311  ;;  %v4256_v17 = vld [vmem:[%s5327_s21 + $0x64] sm:$0xf]  ;;  %v4257_v26 = vld [vmem:[%s5327_s21 + $0x68] sm:$0x1] }
 0x173   : > { %v4224_v35 = vcombine.low %v1651_v16, %v1661_v23  ;;  %v1867_v36 = vsel %vm5387_vm5, %v1862_v18, %v1866_v19  ;;  %v1668_v8 = vrot.slane %v1666_v20, 5  ;;  %v1674_v25 = vrot.slane %v1672_v21, 5  ;;  %3022 = vst.msk [vmem:[#allocation2 + $0x18] sm:$0xff] %vm3018_vm13, %v2977_v57  ;;  %v4405_v11 = vld [vmem:[%s5327_s21 + $0xc4] sm:$0xf] }
 0x174   : > { %v1872_v33 = vrot.slane %v1871_v24, 4  ;;  %v1678_v39 = vrot.slane %v1676_v29, 4  ;;  %v1682_v40 = vshll.u32 %v4193_v9, 16  ;;  %v4296_v41 = vrot.slane %v4276_v14, 9  ;;  %3350 = vst.msk [vmem:[#allocation2 + $0x50] sm:$0xff] %vm3339_vm14, %v3312_v58 }
 0x175   : > { %v1669_v44 = vor.u32 %v1668_v8, %v1665_v28  ;;  %v2187_v45 = vrot.slane %v4277_v22, 5  ;;  %v2190_v46 = vrot.slane %v4278_v30, 5  ;;  %v4288_v47 = vrot.slane %v4252_v31, 9  ;;  %v4406_v16 = vld [vmem:[%s5327_s21 + $0xc8] sm:$0x1] }
 0x176   : > { %1395 = vrot.lane.b32.xlu0 %v4908_v15, %s5100_s22  ;;  %1954 = vrot.lane.b32.xlu1 %v4232_v6, %s5103_s11  ;;  %v1877_v51 = vsel %vm5387_vm5, %v1872_v33, %v1876_v12  ;;  %v1679_v53 = vor.u32 %v1678_v39, %v1674_v25  ;;  %v1684_v54 = vrot.slane %v1682_v40, 5  ;;  %v2131_v55 = vrot.slane %v4253_v37, 5  ;;  %v4404_v6 = vld [vmem:[%s5327_s21 + $0xc0] sm:$0xf]  ;;  %v3296_v10 = vpop.permute.xlu0 %3295  ;;  %v4381_v31 = vld [vmem:[%s5327_s21 + $0x64] sm:$0xf] }
 0x177   : > { %v4233_v59 = vcombine.low %v1867_v36, %v1877_v51  ;;  %v1670_v60 = vrot.slane %v1669_v44, 4  ;;  %v2188_v42 = vsel %vm5337_vm2, %v4296_v41, %v2187_v45  ;;  %v2189_v63 = vrot.slane %v2187_v45, 4  ;;  %3342 = vst.msk [vmem:[#allocation2 + $0x10] sm:$0xff] %vm3339_vm14, %v3296_v10  ;;  %v4380_v23 = vld [vmem:[%s5327_s21 + $0x60] sm:$0xf]  ;;  %s5109_s22 = smov [#allocation9]  }
 0x178   : > { %v1680_v3 = vrot.slane %v1679_v53, 4  ;;  %v2132_v52 = vsel %vm5337_vm2, %v4288_v47, %v2131_v55  ;;  %v2133_v2 = vrot.slane %v2131_v55, 4  ;;  %v2134_v27 = vrot.slane %v4254_v38, 5  ;;  %v4382_v40 = vld [vmem:[%s5327_s21 + $0x68] sm:$0x1]  ;;  %s5011_s20 = sshll.u32 %s5109_s22, 4  ;;  %s5012_s20 = int_to_ptr.vmem [resolvable:$false] %s5011_s20 }
 0x179   : > { %v1675_v61 = vsel %vm5387_vm5, %v1670_v60, %v1674_v25  ;;  %v2191_v62 = vsel %vm5337_vm2, %v2189_v63, %v2190_v46  ;;  %v4297_v4 = vrot.slane %v4279_v43, 9  ;;  %v2194_v49 = vrot.slane %v4280_v48, 5  ;;  %v4407_v47 = vld [vmem:[%s5327_s21 + $0xcc] sm:$0xf]  ;;  %v4408_v55 = vld [vmem:[%s5327_s21 + $0xd0] sm:$0xf]  ;;  %p5014_p3 = scmp.lt.s32.totalorder %s6555_s25, %s5012_s20 }
 0x17a   : > { %1938 = vrot.lane.b32.xlu0 %v4224_v35, %s5103_s11  ;;  %1956 = vrot.lane.b32.xlu1 %v4233_v59, %s5103_s11  ;;  %v1685_v7 = vsel %vm5387_vm5, %v1680_v3, %v1684_v54  ;;  %v4312_v50 = vcombine.low %v2188_v42, %v2191_v62  ;;  %v2135_v19 = vsel %vm5337_vm2, %v2133_v2, %v2134_v27  ;;  %v2197_v9 = vrot.slane %v4281_v56, 5  ;;  %v904_v36 = vpop.permute.xlu1 %903  ;;  %v4909_v56 = vld [vmem:[%s5327_s21 + $0xc0] sm:$0xff]   ;;  %v4911_v62 = vld [vmem:[%s5327_s21 + $0xcc] sm:$0xff]  }
 0x17b   : > { %v4225_v12 = vcombine.low %v1675_v61, %v1685_v7  ;;  %v4304_v13 = vcombine.low %v2132_v52, %v2135_v19  ;;  %v2195_v14 = vsel %vm5337_vm2, %v4297_v4, %v2194_v49  ;;  %v2196_v15 = vrot.slane %v2194_v49, 4  ;;  %v3383_v25 = vld [vmem:[#allocation2 + $0x50] sm:$0xff]  ;;  %940 = vst.msk [vmem:[#allocation2 + $0x60] sm:$0xff] %vm927_vm7, %v904_v36  ;;  %v4910_v61 = vld [vmem:[%s5327_s21 + $0x60] sm:$0xff]  }
 0x17c   : > { %v4289_v18 = vrot.slane %v4255_v1, 9  ;;  %v2138_v20 = vrot.slane %v4256_v17, 5  ;;  %v2141_v21 = vrot.slane %v4257_v26, 5  ;;  %v2875_v22 = vshrl.u32 %v4404_v6, 16  ;;  %4739 = vmatprep.mubr.bf16.mxu1 %v3383_v25  ;;  %v4409_v1 = vld [vmem:[%s5327_s21 + $0xd4] sm:$0x1] }
 0x17d   : > { %v2198_v24 = vsel %vm5337_vm2, %v2196_v15, %v2197_v9  ;;  %v2878_v28 = vshll.u32 %v4404_v6, 16  ;;  %v2884_v29 = vshll.u32 %v4405_v11, 16  ;;  %v2888_v30 = vshrl.u32 %v4405_v11, 16  ;;  %v4383_v17 = vld [vmem:[%s5327_s21 + $0x6c] sm:$0xf] }
 0x17e   : > { %1940 = vrot.lane.b32.xlu0 %v4225_v12, %s5103_s11  ;;  %2275 = vrot.lane.b32.xlu1 %v4312_v50, %s5104_s18  ;;  %v4313_v32 = vcombine.low %v2195_v14, %v2198_v24  ;;  %v2139_v34 = vsel %vm5337_vm2, %v4289_v18, %v2138_v20  ;;  %v2140_v35 = vrot.slane %v2138_v20, 4  ;;  %v2877_v8 = vrot.slane %v2875_v22, 4  ;;  %v3375_v63 = vld [vmem:[#allocation2 + $0x10] sm:$0xff]  ;;  %s5013_s11 = scalar_lea.vmem %s5012_s20, 4096 }
 0x17f   : > { %v2880_v37 = vrot.slane %v2878_v28, 5  ;;  %v2886_v38 = vrot.slane %v2884_v29, 5  ;;  %v2890_v33 = vrot.slane %v2888_v30, 4  ;;  %v2894_v39 = vshll.u32 %v4406_v16, 16  ;;  %4723 = vmatprep.mubr.bf16.mxu0 %v3375_v63  ;;  %v4384_v50 = vld [vmem:[%s5327_s21 + $0x70] sm:$0xf] }
 0x180   : > { %v2142_v41 = vsel %vm5337_vm2, %v2140_v35, %v2141_v21  ;;  %v2683_v44 = vshrl.u32 %v4380_v23, 16  ;;  %v2686_v45 = vshll.u32 %v4380_v23, 16  ;;  %v2692_v46 = vshll.u32 %v4381_v31, 16  ;;  %v4912_v22 = vld [vmem:[%s5327_s21 + $0x6c] sm:$0xff]   ;;  %v4385_v29 = vld [vmem:[%s5327_s21 + $0x74] sm:$0x1] }
 0x181   : > { %v4305_v48 = vcombine.low %v2139_v34, %v2142_v41  ;;  %v2881_v51 = vor.u32 %v2880_v37, %v2877_v8  ;;  %v2891_v53 = vor.u32 %v2890_v33, %v2886_v38  ;;  %v2896_v54 = vrot.slane %v2894_v39, 5  ;;  %v4469_v8 = vld [vmem:[%s5327_s21 + $0xc4] sm:$0xf] }
 0x182   : > { %2259 = vrot.lane.b32.xlu0 %v4304_v13, %s5104_s18  ;;  %2277 = vrot.lane.b32.xlu1 %v4313_v32, %s5104_s18  ;;  %v2685_v57 = vrot.slane %v2683_v44, 4  ;;  %v2688_v58 = vrot.slane %v2686_v45, 5  ;;  %v2694_v59 = vrot.slane %v2692_v46, 5  ;;  %v2696_v60 = vshrl.u32 %v4381_v31, 16  ;;  %v4468_v31 = vld [vmem:[%s5327_s21 + $0xc0] sm:$0xe] }
 0x183   : > { %v2882_v3 = vrot.slane %v2881_v51, 4  ;;  %v2892_v52 = vrot.slane %v2891_v53, 4  ;;  %v2702_v2 = vshll.u32 %v4382_v40, 16  ;;  %v2899_v27 = vshrl.u32 %v4407_v47, 16  ;;  %v4470_v40 = vld [vmem:[%s5327_s21 + $0xc8] sm:$0x1] }
 0x184   : > { %v2689_v4 = vor.u32 %v2688_v58, %v2685_v57  ;;  %v2698_v49 = vrot.slane %v2696_v60, 4  ;;  %v2902_v6 = vshll.u32 %v4407_v47, 16  ;;  %v2908_v7 = vshll.u32 %v4408_v55, 16  ;;  %v4444_v47 = vld [vmem:[%s5327_s21 + $0x60] sm:$0xe] }
 0x185   : > { %v2887_v19 = vsel %vm5387_vm5, %v2882_v3, %v2886_v38  ;;  %v2897_v9 = vsel %vm5387_vm5, %v2892_v52, %v2896_v54  ;;  %v2704_v10 = vrot.slane %v2702_v2, 5  ;;  %v2901_v11 = vrot.slane %v2899_v27, 4 }
 0x186   : > { %2261 = vrot.lane.b32.xlu0 %v4305_v48, %s5104_s18  ;;  %2453 = vrot.lane.b32.xlu1 %v4909_v56, %s5105_s4  ;;  %v4424_v12 = vcombine.low %v2887_v19, %v2897_v9  ;;  %v2690_v13 = vrot.slane %v2689_v4, 4  ;;  %v2699_v14 = vor.u32 %v2698_v49, %v2694_v59  ;;  %v2904_v15 = vrot.slane %v2902_v6, 5  ;;  %v4445_v48 = vld [vmem:[%s5327_s21 + $0x64] sm:$0xf]  ;;  %v4446_v56 = vld [vmem:[%s5327_s21 + $0x68] sm:$0x1] }
 0x187   : > { %v888_v43 = vpop.permute.xlu0 %887  ;;  %v6305_v16 = vrot.slane %v2908_v7, 5  ;;  %v2912_v18 = vshrl.u32 %v4408_v55, 16  ;;  %v2918_v20 = vshll.u32 %v4409_v1, 16  ;;  %v2707_v21 = vshrl.u32 %v4383_v17, 16  ;;  %v4471_v1 = vld [vmem:[%s5327_s21 + $0xcc] sm:$0xe] }
 0x188   : > { %932 = vst.msk [vmem:[#allocation2 + $0x20] sm:$0xff] %vm927_vm7, %v888_v43  ;;  %v3314_v42 = vpop.permute.xlu1 %3313  ;;  %v2695_v23 = vsel %vm5387_vm5, %v2690_v13, %v2694_v59  ;;  %v2700_v24 = vrot.slane %v2699_v14, 4  ;;  %v2905_v28 = vor.u32 %v2904_v15, %v2901_v11  ;;  %v2710_v30 = vshll.u32 %v4383_v17, 16  ;;  %v4473_v6 = vld [vmem:[%s5327_s21 + $0xd4] sm:$0x1] }
 0x189   : > { %3351 = vst.msk [vmem:[#allocation2 + $0x58] sm:$0xff] %vm3339_vm14, %v3314_v42  ;;  %v2914_v32 = vrot.slane %v2912_v18, 4  ;;  %v2920_v34 = vrot.slane %v2918_v20, 5  ;;  %v2709_v35 = vrot.slane %v2707_v21, 4  ;;  %v2716_v36 = vshll.u32 %v4384_v50, 16 }
 0x18a   : > { %2437 = vrot.lane.b32.xlu0 %v4910_v61, %s5105_s4  ;;  %2455 = vrot.lane.b32.xlu1 %v4911_v62, %s5105_s4  ;;  %v2705_v25 = vsel %vm5387_vm5, %v2700_v24, %v2704_v10  ;;  %v2906_v37 = vrot.slane %v2905_v28, 4  ;;  %v2712_v38 = vrot.slane %v2710_v30, 5  ;;  %v2720_v33 = vshrl.u32 %v4384_v50, 16  ;;  %v4472_v61 = vld [vmem:[%s5327_s21 + $0xd0] sm:$0xf] }
 0x18b   : > { %v3298_v26 = vpop.permute.xlu0 %3297  ;;  %v4416_v43 = vcombine.low %v2695_v23, %v2705_v25  ;;  %v2915_v44 = vor.u32 %v2914_v32, %v6305_v16  ;;  %v2718_v45 = vrot.slane %v2716_v36, 5  ;;  %v2726_v46 = vshll.u32 %v4385_v29, 16  ;;  %v4447_v7 = vld [vmem:[%s5327_s21 + $0x6c] sm:$0xe]  ;;  %v4448_v11 = vld [vmem:[%s5327_s21 + $0x70] sm:$0xf] }
 0x18c   : > { %3343 = vst.msk [vmem:[#allocation2 + $0x18] sm:$0xff] %vm3339_vm14, %v3298_v26  ;;  %v906_v39 = vpop.permute.xlu1 %905  ;;  %v2911_v51 = vsel %vm5387_vm5, %v2906_v37, %v6305_v16  ;;  %v2713_v53 = vor.u32 %v2712_v38, %v2709_v35  ;;  %v2722_v54 = vrot.slane %v2720_v33, 4  ;;  %v4488_v55 = vrot.slane %v4468_v31, 9  ;;  %v4449_v18 = vld [vmem:[%s5327_s21 + $0x74] sm:$0x1]  ;;  %s5007_s21 = scalar_lea.vmem %s6555_s25, 2048 }
 0x18d   : > { %941 = vst.msk [vmem:[#allocation2 + $0x68] sm:$0xff] %vm927_vm7, %v906_v39  ;;  %v2916_v58 = vrot.slane %v2915_v44, 4  ;;  %v2728_v59 = vrot.slane %v2726_v46, 5  ;;  %v3231_v42 = vrot.slane %v4469_v8, 5  ;;  %v3234_v63 = vrot.slane %v4470_v40, 5  ;;  %p5008_p8 = scmp.ne.s32.totalorder %s6555_s25, %s5007_s21  ;;  %p5015_p5 = scmp.lt.s32.totalorder %s5013_s11, %s5007_s21 }
 0x18e   : > { %2439 = vrot.lane.b32.xlu0 %v4912_v22, %s5105_s4  ;;  %2998 = vrot.lane.b32.xlu1 %v4424_v12, %s5106_s8  ;;  %v2714_v17 = vrot.slane %v2713_v53, 4  ;;  %v2723_v3 = vor.u32 %v2722_v54, %v2718_v45  ;;  %v4480_v52 = vrot.slane %v4444_v47, 9  ;;  %v3175_v2 = vrot.slane %v4445_v48, 5 }
 0x18f   : > { %v890_v60 = vpop.permute.xlu0 %889  ;;  %v2921_v62 = vsel %vm5387_vm5, %v2916_v58, %v2920_v34  ;;  %v3232_v4 = vsel %vm5337_vm2, %v4488_v55, %v3231_v42  ;;  %v3233_v49 = vrot.slane %v3231_v42, 4  ;;  %v3178_v26 = vrot.slane %v4446_v56, 5  ;;  %p5009_p1 = pnand %p5008_p8, %p6630_p12  ;;  %p5016_p9 = por %p5015_p5, %p5014_p3 }
 0x190   : > { %v3384_v41 = vld [vmem:[#allocation2 + $0x58] sm:$0xff]  ;;  %933 = vst.msk [vmem:[#allocation2 + $0x28] sm:$0xff] %vm927_vm7, %v890_v60  ;;  %v1228_v27 = vpop.permute.xlu1 %1227  ;;  %v4425_v50 = vcombine.low %v2911_v51, %v2921_v62  ;;  %v2719_v19 = vsel %vm5387_vm5, %v2714_v17, %v2718_v45  ;;  %v2724_v9 = vrot.slane %v2723_v3, 4  ;;  %v3176_v10 = vsel %vm5337_vm2, %v4480_v52, %v3175_v2 }
 0x191   : > { %4740 = vmatmul.mubr.bf16.gmra.mrb[4].mxu1 %v3384_v41  ;;  %1264 = vst.msk [vmem:[#allocation2 + $0x60] sm:$0xff] %vm1251_vm8, %v1228_v27  ;;  %v3235_v12 = vsel %vm5337_vm2, %v3233_v49, %v3234_v63  ;;  %v3177_v13 = vrot.slane %v3175_v2, 4  ;;  %v4489_v15 = vrot.slane %v4471_v1, 9  ;;  %v3238_v16 = vrot.slane %v4472_v61, 5  ;;  %p5010_p10 = pneg %p5009_p1 }
 0x192   : > { %2982 = vrot.lane.b32.xlu0 %v4416_v43, %s5106_s8  ;;  %3000 = vrot.lane.b32.xlu1 %v4425_v50, %s5106_s8  ;;  %v2729_v20 = vsel %vm5387_vm5, %v2724_v9, %v2728_v59  ;;  %v4504_v21 = vcombine.low %v3232_v4, %v3235_v12  ;;  %v3241_v22 = vrot.slane %v4473_v6, 5  ;;  %v4481_v23 = vrot.slane %v4447_v7, 9 }
 0x193   : > { %v3376_v57 = vld [vmem:[#allocation2 + $0x18] sm:$0xff]  ;;  %v1212_v14 = vpop.permute.xlu0 %1211  ;;  %v4417_v28 = vcombine.low %v2719_v19, %v2729_v20  ;;  %v3179_v29 = vsel %vm5337_vm2, %v3177_v13, %v3178_v26  ;;  %v3239_v30 = vsel %vm5337_vm2, %v4489_v15, %v3238_v16  ;;  %v3240_v31 = vrot.slane %v3238_v16, 4  ;;  %p5017_p2 = pnand %p5016_p9, %p5010_p10 }
 0x194   : > { %4724 = vmatmul.mubr.bf16.gmra.mrb[4].mxu0 %v3376_v57  ;;  %1256 = vst.msk [vmem:[#allocation2 + $0x20] sm:$0xff] %vm1251_vm8, %v1212_v14  ;;  %v1230_v24 = vpop.permute.xlu1 %1229  ;;  %v3182_v32 = vrot.slane %v4448_v11, 5  ;;  %v3185_v34 = vrot.slane %v4449_v18, 5  ;;  %v4496_v36 = vcombine.low %v3176_v10, %v3179_v29 }
 0x195   : > { %1265 = vst.msk [vmem:[#allocation2 + $0x68] sm:$0xff] %vm1251_vm8, %v1230_v24  ;;  %v3242_v5 = vsel %vm5337_vm2, %v3240_v31, %v3241_v22 }
 0x196   : > { %2984 = vrot.lane.b32.xlu0 %v4417_v28, %s5106_s8  ;;  %3319 = vrot.lane.b32.xlu1 %v4504_v21, %s5107_s9  ;;  %v4505_v8 = vcombine.low %v3239_v30, %v3242_v5  ;;  %v3184_v25 = vrot.slane %v3182_v32, 4  ;;  %v3183_v38 = vsel %vm5337_vm2, %v4481_v23, %v3182_v32 }
 0x197   : > { %v1214_v35 = vpop.permute.xlu0 %1213 }
 0x198   : > { %1257 = vst.msk [vmem:[#allocation2 + $0x28] sm:$0xff] %vm1251_vm8, %v1214_v35  ;;  %v1406_v37 = vpop.permute.xlu1 %1405  ;;  %v3186_v33 = vsel %vm5337_vm2, %v3184_v25, %v3185_v34  ;;  %v3598_v34 = vlaneseq }
 0x199   : > { %1442 = vst.msk [vmem:[#allocation2 + $0x60] sm:$0xff] %vm1429_vm9, %v1406_v37  ;;  %v4497_v40 = vcombine.low %v3183_v38, %v3186_v33  ;;  %v3372_v38 = vld [vmem:[#allocation8] sm:$0x7] }
 0x19a   : > { %3303 = vrot.lane.b32.xlu0 %v4496_v36, %s5107_s9  ;;  %3321 = vrot.lane.b32.xlu1 %v4505_v8, %s5107_s9  ;;  %v3599_v36 = vshrl.u32 %v3598_v34, 7 }
 0x19b   : > { %v1390_v39 = vpop.permute.xlu0 %1389 }
 0x19c   : > { %1434 = vst.msk [vmem:[#allocation2 + $0x20] sm:$0xff] %vm1429_vm9, %v1390_v39  ;;  %v1408_v41 = vpop.permute.xlu1 %1407  ;;  %v3600_v37 = vsub.s32 0, %v3599_v36 }
 0x19d   : > { %1443 = vst.msk [vmem:[#allocation2 + $0x68] sm:$0xff] %vm1429_vm9, %v1408_v41 }
 0x19e   : > { %3305 = vrot.lane.b32.xlu0 %v4497_v40, %s5107_s9  ;;  %v3636_v40 = vsub.s32 1, %v3599_v36  ;;  %v6424_v41 = vrot.slane %v3372_v38, %v3600_v37 }
 0x19f   : > { %v1392_v43 = vpop.permute.xlu0 %1391 }
 0x1a0   : > { %1435 = vst.msk [vmem:[#allocation2 + $0x28] sm:$0xff] %vm1429_vm9, %v1392_v43  ;;  %v1951_v44 = vpop.permute.xlu1 %1950  ;;  %v3704_v43 = vsub.s32 2, %v3599_v36 }
 0x1a1   : > { %1987 = vst.msk [vmem:[#allocation2 + $0x60] sm:$0xff] %vm1974_vm10, %v1951_v44 }
 0x1a3   : > { %v1935_v0 = vpop.permute.xlu0 %1934 }
 0x1a4   : > { %1979 = vst.msk [vmem:[#allocation2 + $0x20] sm:$0xff] %vm1974_vm10, %v1935_v0  ;;  %v1953_v45 = vpop.permute.xlu1 %1952 }
 0x1a5   : > { %1988 = vst.msk [vmem:[#allocation2 + $0x68] sm:$0xff] %vm1974_vm10, %v1953_v45  ;;  %v6426_v45 = vrot.slane %v3372_v38, %v3636_v40 }
 0x1a8   : > { %v2272_v46 = vpop.permute.xlu1 %2271  ;;  %v1937_v47 = vpop.permute.xlu0 %1936 }
 0x1a9   : > { %2308 = vst.msk [vmem:[#allocation2 + $0x60] sm:$0xff] %vm2295_vm11, %v2272_v46 }
 0x1aa   : > { %1980 = vst.msk [vmem:[#allocation2 + $0x28] sm:$0xff] %vm1974_vm10, %v1937_v47  ;;  %v6428_v47 = vrot.slane %v3372_v38, %v3704_v43 }
 0x1ac   : > { %v2274_v48 = vpop.permute.xlu1 %2273  ;;  %v2256_v51 = vpop.permute.xlu0 %2255 }
 0x1ad   : > { %2309 = vst.msk [vmem:[#allocation2 + $0x68] sm:$0xff] %vm2295_vm11, %v2274_v48  ;;  %2300 = vst.msk [vmem:[#allocation2 + $0x20] sm:$0xff] %vm2295_vm11, %v2256_v51 }
 0x1b0   : > { %v2450_v53 = vpop.permute.xlu1 %2449  ;;  %v2258_v54 = vpop.permute.xlu0 %2257 }
 0x1b1   : > { %2486 = vst.msk [vmem:[#allocation2 + $0x60] sm:$0xff] %vm2473_vm12, %v2450_v53 }
 0x1b2   : > { %2301 = vst.msk [vmem:[#allocation2 + $0x28] sm:$0xff] %vm2295_vm11, %v2258_v54 }
 0x1b4   : > { %v2452_v55 = vpop.permute.xlu1 %2451  ;;  %v2434_v56 = vpop.permute.xlu0 %2433 }
 0x1b5   : > { %2487 = vst.msk [vmem:[#allocation2 + $0x68] sm:$0xff] %vm2473_vm12, %v2452_v55  ;;  %2478 = vst.msk [vmem:[#allocation2 + $0x20] sm:$0xff] %vm2473_vm12, %v2434_v56 }
 0x1b8   : > { %v2995_v57 = vpop.permute.xlu1 %2994  ;;  %v2436_v58 = vpop.permute.xlu0 %2435 }
 0x1b9   : > { %3031 = vst.msk [vmem:[#allocation2 + $0x60] sm:$0xff] %vm3018_vm13, %v2995_v57 }
 0x1ba   : > { %2479 = vst.msk [vmem:[#allocation2 + $0x28] sm:$0xff] %vm2473_vm12, %v2436_v58 }
 0x1bc   : > { %v2997_v59 = vpop.permute.xlu1 %2996  ;;  %v2979_v60 = vpop.permute.xlu0 %2978 }
 0x1bd   : > { %3032 = vst.msk [vmem:[#allocation2 + $0x68] sm:$0xff] %vm3018_vm13, %v2997_v59  ;;  %3023 = vst.msk [vmem:[#allocation2 + $0x20] sm:$0xff] %vm3018_vm13, %v2979_v60 }
 0x1c0   : > { %v3316_v42 = vpop.permute.xlu1 %3315  ;;  %v2981_v63 = vpop.permute.xlu0 %2980 }
 0x1c1   : > { %3352 = vst.msk [vmem:[#allocation2 + $0x60] sm:$0xff] %vm3339_vm14, %v3316_v42 }
 0x1c2   : > { %3024 = vst.msk [vmem:[#allocation2 + $0x28] sm:$0xff] %vm3018_vm13, %v2981_v63 }
 0x1c4   : > { %v3300_v1 = vpop.permute.xlu0 %3299 }
 0x1c5   : > { %3344 = vst.msk [vmem:[#allocation2 + $0x20] sm:$0xff] %vm3339_vm14, %v3300_v1 }
 0x1c8   : > { %v3385_v17 = vld [vmem:[#allocation2 + $0x60] sm:$0xff] }
 0x1c9   : > { %4743 = vmatprep.mubr.bf16.mxu1 %v3385_v17  ;;  %v908_v3 = vpop.permute.xlu1 %907 }
 0x1ca   : > { %942 = vst.msk [vmem:[#allocation2 + $0x70] sm:$0xff] %vm927_vm7, %v908_v3  ;;  %v892_v52 = vpop.permute.xlu0 %891 }
 0x1cb   : > { %934 = vst.msk [vmem:[#allocation2 + $0x30] sm:$0xff] %vm927_vm7, %v892_v52 }
 0x1cc   : > { %v3377_v2 = vld [vmem:[#allocation2 + $0x20] sm:$0xff] }
 0x1cd   : > { %v3318_v27 = vpop.permute.xlu1 %3317  ;;  %4727 = vmatprep.mubr.bf16.mxu0 %v3377_v2 }
 0x1ce   : > { %3353 = vst.msk [vmem:[#allocation2 + $0x68] sm:$0xff] %vm3339_vm14, %v3318_v27  ;;  %v3302_v61 = vpop.permute.xlu0 %3301 }
 0x1cf   : > { %3345 = vst.msk [vmem:[#allocation2 + $0x28] sm:$0xff] %vm3339_vm14, %v3302_v61 }
 0x1d4   : > { %v910_v62 = vpop.permute.xlu1 %909 }
 0x1d5   : > { %943 = vst.msk [vmem:[#allocation2 + $0x78] sm:$0xff] %vm927_vm7, %v910_v62  ;;  %v3386_v4 = vld [vmem:[#allocation2 + $0x68] sm:$0xff] }
 0x1d6   : > { %v3378_v49 = vld [vmem:[#allocation2 + $0x28] sm:$0xff]  ;;  %4744 = vmatmul.mubr.bf16.gmra.mrb[8].mxu1 %v3386_v4 }
 0x1d7   : > { %4728 = vmatmul.mubr.bf16.gmra.mrb[8].mxu0 %v3378_v49 }
 0x1d8   : > { %v894_v26 = vpop.permute.xlu0 %893  ;;  %v1232_v6 = vpop.permute.xlu1 %1231 }
 0x1d9   : > { %935 = vst.msk [vmem:[#allocation2 + $0x38] sm:$0xff] %vm927_vm7, %v894_v26 }
 0x1da   : > { %1266 = vst.msk [vmem:[#allocation2 + $0x70] sm:$0xff] %vm1251_vm8, %v1232_v6 }
 0x1dc   : > { %v1216_v7 = vpop.permute.xlu0 %1215  ;;  %v1234_v50 = vpop.permute.xlu1 %1233 }
 0x1dd   : > { %1258 = vst.msk [vmem:[#allocation2 + $0x30] sm:$0xff] %vm1251_vm8, %v1216_v7  ;;  %1267 = vst.msk [vmem:[#allocation2 + $0x78] sm:$0xff] %vm1251_vm8, %v1234_v50 }
 0x1e0   : > { %v1218_v19 = vpop.permute.xlu0 %1217  ;;  %v1410_v9 = vpop.permute.xlu1 %1409 }
 0x1e1   : > { %1259 = vst.msk [vmem:[#allocation2 + $0x38] sm:$0xff] %vm1251_vm8, %v1218_v19 }
 0x1e2   : > { %1444 = vst.msk [vmem:[#allocation2 + $0x70] sm:$0xff] %vm1429_vm9, %v1410_v9 }
 0x1e4   : > { %v1394_v10 = vpop.permute.xlu0 %1393  ;;  %v1412_v11 = vpop.permute.xlu1 %1411 }
 0x1e5   : > { %1436 = vst.msk [vmem:[#allocation2 + $0x30] sm:$0xff] %vm1429_vm9, %v1394_v10  ;;  %1445 = vst.msk [vmem:[#allocation2 + $0x78] sm:$0xff] %vm1429_vm9, %v1412_v11 }
 0x1e8   : > { %v1396_v12 = vpop.permute.xlu0 %1395  ;;  %v1955_v13 = vpop.permute.xlu1 %1954 }
 0x1e9   : > { %1437 = vst.msk [vmem:[#allocation2 + $0x38] sm:$0xff] %vm1429_vm9, %v1396_v12 }
 0x1ea   : > { %1989 = vst.msk [vmem:[#allocation2 + $0x70] sm:$0xff] %vm1974_vm10, %v1955_v13 }
 0x1ec   : > { %v1939_v14 = vpop.permute.xlu0 %1938  ;;  %v1957_v15 = vpop.permute.xlu1 %1956 }
 0x1ed   : > { %1981 = vst.msk [vmem:[#allocation2 + $0x30] sm:$0xff] %vm1974_vm10, %v1939_v14  ;;  %1990 = vst.msk [vmem:[#allocation2 + $0x78] sm:$0xff] %vm1974_vm10, %v1957_v15 }
 0x1f0   : > { %v1941_v16 = vpop.permute.xlu0 %1940  ;;  %v2276_v18 = vpop.permute.xlu1 %2275 }
 0x1f1   : > { %1982 = vst.msk [vmem:[#allocation2 + $0x38] sm:$0xff] %vm1974_vm10, %v1941_v16 }
 0x1f2   : > { %2310 = vst.msk [vmem:[#allocation2 + $0x70] sm:$0xff] %vm2295_vm11, %v2276_v18 }
 0x1f4   : > { %v2260_v20 = vpop.permute.xlu0 %2259  ;;  %v2278_v21 = vpop.permute.xlu1 %2277 }
 0x1f5   : > { %2302 = vst.msk [vmem:[#allocation2 + $0x30] sm:$0xff] %vm2295_vm11, %v2260_v20  ;;  %2311 = vst.msk [vmem:[#allocation2 + $0x78] sm:$0xff] %vm2295_vm11, %v2278_v21 }
 0x1f8   : > { %v2262_v22 = vpop.permute.xlu0 %2261  ;;  %v2454_v23 = vpop.permute.xlu1 %2453 }
 0x1f9   : > { %2303 = vst.msk [vmem:[#allocation2 + $0x38] sm:$0xff] %vm2295_vm11, %v2262_v22 }
 0x1fa   : > { %2488 = vst.msk [vmem:[#allocation2 + $0x70] sm:$0xff] %vm2473_vm12, %v2454_v23 }
 0x1fc   : > { %v2438_v24 = vpop.permute.xlu0 %2437  ;;  %v2456_v28 = vpop.permute.xlu1 %2455 }
 0x1fd   : > { %2480 = vst.msk [vmem:[#allocation2 + $0x30] sm:$0xff] %vm2473_vm12, %v2438_v24  ;;  %2489 = vst.msk [vmem:[#allocation2 + $0x78] sm:$0xff] %vm2473_vm12, %v2456_v28 }
 0x200   : > { %v2440_v29 = vpop.permute.xlu0 %2439  ;;  %v2999_v30 = vpop.permute.xlu1 %2998 }
 0x201   : > { %2481 = vst.msk [vmem:[#allocation2 + $0x38] sm:$0xff] %vm2473_vm12, %v2440_v29 }
 0x202   : > { %3033 = vst.msk [vmem:[#allocation2 + $0x70] sm:$0xff] %vm3018_vm13, %v2999_v30 }
 0x204   : > { %v2983_v31 = vpop.permute.xlu0 %2982  ;;  %v3001_v32 = vpop.permute.xlu1 %3000 }
 0x205   : > { %3025 = vst.msk [vmem:[#allocation2 + $0x30] sm:$0xff] %vm3018_vm13, %v2983_v31  ;;  %3034 = vst.msk [vmem:[#allocation2 + $0x78] sm:$0xff] %vm3018_vm13, %v3001_v32 }
 0x208   : > { %v2985_v5 = vpop.permute.xlu0 %2984  ;;  %v3320_v35 = vpop.permute.xlu1 %3319 }
 0x209   : > { %3026 = vst.msk [vmem:[#allocation2 + $0x38] sm:$0xff] %vm3018_vm13, %v2985_v5 }
 0x20a   : > { %3354 = vst.msk [vmem:[#allocation2 + $0x70] sm:$0xff] %vm3339_vm14, %v3320_v35 }
 0x20c   : > { %v3304_v8 = vpop.permute.xlu0 %3303  ;;  %v3322_v25 = vpop.permute.xlu1 %3321 }
 0x20d   : > { %3346 = vst.msk [vmem:[#allocation2 + $0x30] sm:$0xff] %vm3339_vm14, %v3304_v8  ;;  %3355 = vst.msk [vmem:[#allocation2 + $0x78] sm:$0xff] %vm3339_vm14, %v3322_v25 }
 0x210   : > { %v3306_v33 = vpop.permute.xlu0 %3305 }
 0x211   : > { %v3387_v39 = vld [vmem:[#allocation2 + $0x70] sm:$0xff]  ;;  %3347 = vst.msk [vmem:[#allocation2 + $0x38] sm:$0xff] %vm3339_vm14, %v3306_v33 }
 0x212   : > { %4747 = vmatprep.mubr.bf16.mxu1 %v3387_v39  ;;  %v4737_v46 = vpop.f32.mrb[0].mxu1 }
 0x213   : > { %v3620_v48 = vmul.f32 %v4737_v46, %v6424_v41  ;;  %v3535_v51 = vpop.f32.mrb[1].mxu1 }
 0x214   : > { %v3379_v44 = vld [vmem:[#allocation2 + $0x30] sm:$0xff]  ;;  %v3388_v0 = vld [vmem:[#allocation2 + $0x78] sm:$0xff]  ;;  %v3618_v53 = vmul.f32 %v6424_v41, %v3535_v51  ;;  %v4738_v54 = vpop.f32.mrb[2].mxu1 }
 0x215   : > { %4731 = vmatprep.mubr.bf16.mxu0 %v3379_v44  ;;  %4748 = vmatmul.mubr.bf16.gmra.mrb[12].mxu1 %v3388_v0  ;;  %v3656_v57 = vadd.f32 %v6426_v45, %v3620_v48  ;;  %v3621_v58 = vmul.f32 %v4738_v54, %v6424_v41  ;;  %v3538_v59 = vpop.f32.mrb[3].mxu1 }
 0x216   : > { %v4721_v56 = vpop.f32.mrb[0].mxu0  ;;  %v3654_v2 = vadd.f32 %v6426_v45, %v3618_v53  ;;  %v3619_v49 = vmul.f32 %v6424_v41, %v3538_v59 }
 0x217   : > { %v3604_v60 = vmul.f32 %v4721_v56, %v6424_v41  ;;  %v3471_v42 = vpop.f32.mrb[1].mxu0  ;;  %v3724_v63 = vmul.f32 %v6428_v47, %v3656_v57  ;;  %v3657_v3 = vadd.f32 %v6426_v45, %v3621_v58  ;;  %vm3688_vm15 = vcmp.ge.f32.partialorder %v3656_v57, 0.0 }
 0x218   : > { %v3380_v55 = vld [vmem:[#allocation2 + $0x38] sm:$0xff]  ;;  %v3602_v1 = vmul.f32 %v6424_v41, %v3471_v42  ;;  %v4722_v17 = vpop.f32.mrb[2].mxu0  ;;  %vm3686_vm3 = vcmp.ge.f32.partialorder %v3654_v2, 0.0  ;;  %v3655_v13 = vadd.f32 %v6426_v45, %v3619_v49  ;;  %v3722_v15 = vmul.f32 %v6428_v47, %v3654_v2 }
 0x219   : > { %4732 = vmatmul.mubr.bf16.gmra.mrb[12].mxu0 %v3380_v55  ;;  %v3640_v52 = vadd.f32 %v6426_v45, %v3604_v60  ;;  %v3605_v27 = vmul.f32 %v4722_v17, %v6424_v41  ;;  %v3474_v61 = vpop.f32.mrb[3].mxu0  ;;  %vm3689_vm0 = vcmp.ge.f32.partialorder %v3657_v3, 0.0  ;;  %v3725_v4 = vmul.f32 %v6428_v47, %v3657_v3 }
 0x21a   : > { %v3638_v62 = vadd.f32 %v6426_v45, %v3602_v1  ;;  %v3756_v7 = vsel %vm3688_vm15, %v3656_v57, %v3724_v63  ;;  %v3603_v19 = vmul.f32 %v6424_v41, %v3474_v61  ;;  %vm3687_vm6 = vcmp.ge.f32.partialorder %v3655_v13, 0.0 }
 0x21b   : > { %v3708_v26 = vmul.f32 %v6428_v47, %v3640_v52  ;;  %v3641_v6 = vadd.f32 %v6426_v45, %v3605_v27  ;;  %vm3672_vm1 = vcmp.ge.f32.partialorder %v3640_v52, 0.0  ;;  %v3757_v50 = vsel %vm3689_vm0, %v3657_v3, %v3725_v4 }
 0x21c   : > { %v4632_v10 = vpack.c.bf16 %v3757_v50, %v3756_v7  ;;  %v3706_v11 = vmul.f32 %v6428_v47, %v3638_v62  ;;  %v3639_v12 = vadd.f32 %v6426_v45, %v3603_v19  ;;  %vm3670_vm4 = vcmp.ge.f32.partialorder %v3638_v62, 0.0 }
 0x21d   : > { %vm3673_vm2 = vcmp.ge.f32.partialorder %v3641_v6, 0.0  ;;  %v3709_v9 = vmul.f32 %v6428_v47, %v3641_v6  ;;  %v3740_v14 = vsel %vm3672_vm1, %v3640_v52, %v3708_v26  ;;  %v3723_v21 = vmul.f32 %v6428_v47, %v3655_v13 }
 0x21e   : > { %4672 = vst [vmem:[%s6453_s30 + $0x48] sm:$0xff] %v4632_v10   ;;  %vm3671_vm5 = vcmp.ge.f32.partialorder %v3639_v12, 0.0  ;;  %v3707_v20 = vmul.f32 %v6428_v47, %v3639_v12  ;;  %v3738_v22 = vsel %vm3670_vm4, %v3638_v62, %v3706_v11  ;;  %v3754_v24 = vsel %vm3686_vm3, %v3654_v2, %v3722_v15 }
 0x21f   : > { %v3741_v16 = vsel %vm3673_vm2, %v3641_v6, %v3709_v9  ;;  %v3755_v29 = vsel %vm3687_vm6, %v3655_v13, %v3723_v21 }
 0x220   : > { %v4592_v18 = vpack.c.bf16 %v3741_v16, %v3740_v14  ;;  %v3739_v23 = vsel %vm3671_vm5, %v3639_v12, %v3707_v20  ;;  %v4627_v30 = vpack.c.bf16 %v3755_v29, %v3754_v24 }
 0x221   : > { %v4587_v28 = vpack.c.bf16 %v3739_v23, %v3738_v22 }
 0x222   : > { %4664 = vst [vmem:[%s6453_s30 + $0x8] sm:$0xff] %v4592_v18   ;;  %4671 = vst [vmem:[%s6453_s30 + $0x40] sm:$0xff] %v4627_v30  }
 0x223   : > { %4588 = vst [vmem:[%s6453_s30] sm:$0xff] %v4587_v28  }
 0x264   : > { %v4741_v31 = vpop.f32.mrb[4].mxu1 }
 0x265   : > { %v3624_v32 = vmul.f32 %v4741_v31, %v6424_v41  ;;  %v3551_v34 = vpop.f32.mrb[5].mxu1 }
 0x266   : > { %v3622_v35 = vmul.f32 %v6424_v41, %v3551_v34  ;;  %v4742_v36 = vpop.f32.mrb[6].mxu1 }
 0x267   : > { %v4725_v5 = vpop.f32.mrb[4].mxu0  ;;  %v3660_v25 = vadd.f32 %v6426_v45, %v3624_v32  ;;  %v3625_v38 = vmul.f32 %v4742_v36, %v6424_v41  ;;  %v3554_v33 = vpop.f32.mrb[7].mxu1 }
 0x268   : > { %v3608_v8 = vmul.f32 %v4725_v5, %v6424_v41  ;;  %v3487_v37 = vpop.f32.mrb[5].mxu0  ;;  %v3658_v44 = vadd.f32 %v6426_v45, %v3622_v35  ;;  %v3623_v53 = vmul.f32 %v6424_v41, %v3554_v33 }
 0x269   : > { %v3606_v39 = vmul.f32 %v6424_v41, %v3487_v37  ;;  %v4726_v40 = vpop.f32.mrb[6].mxu0  ;;  %v3728_v48 = vmul.f32 %v6428_v47, %v3660_v25  ;;  %v3661_v51 = vadd.f32 %v6426_v45, %v3625_v38  ;;  %vm3692_vm7 = vcmp.ge.f32.partialorder %v3660_v25, 0.0 }
 0x26a   : > { %v3644_v43 = vadd.f32 %v6426_v45, %v3608_v8  ;;  %v3609_v0 = vmul.f32 %v4726_v40, %v6424_v41  ;;  %v3490_v46 = vpop.f32.mrb[7].mxu0  ;;  %vm3690_vm10 = vcmp.ge.f32.partialorder %v3658_v44, 0.0  ;;  %v3726_v60 = vmul.f32 %v6428_v47, %v3658_v44 }
 0x26b   : > { %v3642_v55 = vadd.f32 %v6426_v45, %v3606_v39  ;;  %vm3693_vm9 = vcmp.ge.f32.partialorder %v3661_v51, 0.0  ;;  %v3729_v58 = vmul.f32 %v6428_v47, %v3661_v51  ;;  %v3760_v59 = vsel %vm3692_vm7, %v3660_v25, %v3728_v48 }
 0x26c   : > { %v3712_v54 = vmul.f32 %v6428_v47, %v3644_v43  ;;  %v3645_v56 = vadd.f32 %v6426_v45, %v3609_v0  ;;  %vm3676_vm8 = vcmp.ge.f32.partialorder %v3644_v43, 0.0  ;;  %v3607_v42 = vmul.f32 %v6424_v41, %v3490_v46 }
 0x26d   : > { %v3659_v63 = vadd.f32 %v6426_v45, %v3623_v53  ;;  %v3710_v17 = vmul.f32 %v6428_v47, %v3642_v55  ;;  %v3761_v52 = vsel %vm3693_vm9, %v3661_v51, %v3729_v58  ;;  %vm3674_vm13 = vcmp.ge.f32.partialorder %v3642_v55, 0.0 }
 0x26e   : > { %vm3677_vm11 = vcmp.ge.f32.partialorder %v3645_v56, 0.0  ;;  %v3713_v57 = vmul.f32 %v6428_v47, %v3645_v56  ;;  %v3744_v1 = vsel %vm3676_vm8, %v3644_v43, %v3712_v54  ;;  %v4642_v27 = vpack.c.bf16 %v3761_v52, %v3760_v59 }
 0x26f   : > { %v3643_v61 = vadd.f32 %v6426_v45, %v3607_v42  ;;  %vm3691_vm12 = vcmp.ge.f32.partialorder %v3659_v63, 0.0  ;;  %v3727_v62 = vmul.f32 %v6428_v47, %v3659_v63  ;;  %v3758_v49 = vsel %vm3690_vm10, %v3658_v44, %v3726_v60 }
 0x270   : > { %v3745_v3 = vsel %vm3677_vm11, %v3645_v56, %v3713_v57  ;;  %4674 = vst [vmem:[%s6453_s30 + $0x58] sm:$0xff] %v4642_v27   ;;  %v3742_v6 = vsel %vm3674_vm13, %v3642_v55, %v3710_v17 }
 0x271   : > { %v4602_v2 = vpack.c.bf16 %v3745_v3, %v3744_v1  ;;  %vm3675_vm14 = vcmp.ge.f32.partialorder %v3643_v61, 0.0  ;;  %v3711_v4 = vmul.f32 %v6428_v47, %v3643_v61  ;;  %v3759_v26 = vsel %vm3691_vm12, %v3659_v63, %v3727_v62 }
 0x272   : > { %v4637_v50 = vpack.c.bf16 %v3759_v26, %v3758_v49 }
 0x273   : > { %4666 = vst [vmem:[%s6453_s30 + $0x18] sm:$0xff] %v4602_v2   ;;  %v3743_v7 = vsel %vm3675_vm14, %v3643_v61, %v3711_v4 }
 0x274   : > { %v4597_v19 = vpack.c.bf16 %v3743_v7, %v3742_v6  ;;  %4673 = vst [vmem:[%s6453_s30 + $0x50] sm:$0xff] %v4637_v50  }
 0x276   : > { %4665 = vst [vmem:[%s6453_s30 + $0x10] sm:$0xff] %v4597_v19  }
 0x2a9   : > { %v4745_v9 = vpop.f32.mrb[8].mxu1 }
 0x2aa   : > { %v4729_v10 = vpop.f32.mrb[8].mxu0  ;;  %v3628_v11 = vmul.f32 %v4745_v9, %v6424_v41  ;;  %v3567_v12 = vpop.f32.mrb[9].mxu1 }
 0x2ab   : > { %v3612_v13 = vmul.f32 %v4729_v10, %v6424_v41  ;;  %v3503_v14 = vpop.f32.mrb[9].mxu0  ;;  %v3626_v15 = vmul.f32 %v6424_v41, %v3567_v12  ;;  %v4746_v16 = vpop.f32.mrb[10].mxu1 }
 0x2ac   : > { %v3664_v18 = vadd.f32 %v6426_v45, %v3628_v11  ;;  %v3610_v20 = vmul.f32 %v6424_v41, %v3503_v14  ;;  %v4730_v21 = vpop.f32.mrb[10].mxu0  ;;  %v3629_v22 = vmul.f32 %v4746_v16, %v6424_v41  ;;  %v3570_v23 = vpop.f32.mrb[11].mxu1 }
 0x2ad   : > { %v3648_v24 = vadd.f32 %v6426_v45, %v3612_v13  ;;  %v3662_v28 = vadd.f32 %v6426_v45, %v3626_v15  ;;  %v3613_v29 = vmul.f32 %v4730_v21, %v6424_v41  ;;  %v3506_v30 = vpop.f32.mrb[11].mxu0  ;;  %v3627_v5 = vmul.f32 %v6424_v41, %v3570_v23 }
 0x2ae   : > { %v3665_v31 = vadd.f32 %v6426_v45, %v3629_v22  ;;  %v3732_v32 = vmul.f32 %v6428_v47, %v3664_v18  ;;  %v3646_v34 = vadd.f32 %v6426_v45, %v3610_v20  ;;  %vm3696_vm15 = vcmp.ge.f32.partialorder %v3664_v18, 0.0 }
 0x2af   : > { %v3716_v35 = vmul.f32 %v6428_v47, %v3648_v24  ;;  %v3649_v36 = vadd.f32 %v6426_v45, %v3613_v29  ;;  %vm3680_vm0 = vcmp.ge.f32.partialorder %v3648_v24, 0.0  ;;  %vm3694_vm1 = vcmp.ge.f32.partialorder %v3662_v28, 0.0 }
 0x2b0   : > { %vm3697_vm2 = vcmp.ge.f32.partialorder %v3665_v31, 0.0  ;;  %v3733_v8 = vmul.f32 %v6428_v47, %v3665_v31  ;;  %v3730_v25 = vmul.f32 %v6428_v47, %v3662_v28  ;;  %v3611_v38 = vmul.f32 %v6424_v41, %v3506_v30 }
 0x2b1   : > { %vm3681_vm3 = vcmp.ge.f32.partialorder %v3649_v36, 0.0  ;;  %v3717_v37 = vmul.f32 %v6428_v47, %v3649_v36  ;;  %v3764_v33 = vsel %vm3696_vm15, %v3664_v18, %v3732_v32  ;;  %v3714_v39 = vmul.f32 %v6428_v47, %v3646_v34 }
 0x2b2   : > { %v3765_v40 = vsel %vm3697_vm2, %v3665_v31, %v3733_v8  ;;  %v3663_v43 = vadd.f32 %v6426_v45, %v3627_v5  ;;  %v3748_v44 = vsel %vm3680_vm0, %v3648_v24, %v3716_v35  ;;  %v3647_v48 = vadd.f32 %v6426_v45, %v3611_v38 }
 0x2b3   : > { %v3749_v0 = vsel %vm3681_vm3, %v3649_v36, %v3717_v37  ;;  %v4652_v46 = vpack.c.bf16 %v3765_v40, %v3764_v33  ;;  %vm3678_vm4 = vcmp.ge.f32.partialorder %v3646_v34, 0.0  ;;  %v3762_v55 = vsel %vm3694_vm1, %v3662_v28, %v3730_v25 }
 0x2b4   : > { %v4612_v51 = vpack.c.bf16 %v3749_v0, %v3748_v44  ;;  %vm3695_vm5 = vcmp.ge.f32.partialorder %v3663_v43, 0.0  ;;  %v3731_v53 = vmul.f32 %v6428_v47, %v3663_v43  ;;  %vm3679_vm6 = vcmp.ge.f32.partialorder %v3647_v48, 0.0 }
 0x2b5   : > { %4676 = vst [vmem:[%s6453_s30 + $0x68] sm:$0xff] %v4652_v46   ;;  %v3715_v54 = vmul.f32 %v6428_v47, %v3647_v48  ;;  %v3746_v57 = vsel %vm3678_vm4, %v3646_v34, %v3714_v39 }
 0x2b6   : > { %4668 = vst [vmem:[%s6453_s30 + $0x28] sm:$0xff] %v4612_v51   ;;  %v3763_v56 = vsel %vm3695_vm5, %v3663_v43, %v3731_v53 }
 0x2b7   : > { %v3747_v58 = vsel %vm3679_vm6, %v3647_v48, %v3715_v54  ;;  %v4647_v59 = vpack.c.bf16 %v3763_v56, %v3762_v55 }
 0x2b8   : > { %v4607_v60 = vpack.c.bf16 %v3747_v58, %v3746_v57 }
 0x2b9   : > { %4675 = vst [vmem:[%s6453_s30 + $0x60] sm:$0xff] %v4647_v59  }
 0x2ba   : > { %4667 = vst [vmem:[%s6453_s30 + $0x20] sm:$0xff] %v4607_v60  }
 0x2e8   : > { %v4749_v42 = vpop.f32.mrb[12].mxu1 }
 0x2e9   : > { %v3632_v63 = vmul.f32 %v4749_v42, %v6424_v41  ;;  %v3583_v1 = vpop.f32.mrb[13].mxu1 }
 0x2ea   : > { %v3630_v17 = vmul.f32 %v6424_v41, %v3583_v1  ;;  %v4750_v3 = vpop.f32.mrb[14].mxu1 }
 0x2eb   : > { %v3668_v52 = vadd.f32 %v6426_v45, %v3632_v63  ;;  %v3633_v2 = vmul.f32 %v4750_v3, %v6424_v41  ;;  %v3586_v27 = vpop.f32.mrb[15].mxu1 }
 0x2ec   : > { %v4733_v61 = vpop.f32.mrb[12].mxu0  ;;  %v3666_v62 = vadd.f32 %v6426_v45, %v3630_v17  ;;  %v3631_v4 = vmul.f32 %v6424_v41, %v3586_v27 }
 0x2ed   : > { %v3616_v49 = vmul.f32 %v4733_v61, %v6424_v41  ;;  %v3736_v26 = vmul.f32 %v6428_v47, %v3668_v52  ;;  %v3519_v6 = vpop.f32.mrb[13].mxu0  ;;  %v3669_v7 = vadd.f32 %v6426_v45, %v3633_v2  ;;  %vm3700_vm7 = vcmp.ge.f32.partialorder %v3668_v52, 0.0 }
 0x2ee   : > { %v3614_v50 = vmul.f32 %v6424_v41, %v3519_v6  ;;  %v4734_v19 = vpop.f32.mrb[14].mxu0  ;;  %v3667_v9 = vadd.f32 %v6426_v45, %v3631_v4  ;;  %vm3698_vm8 = vcmp.ge.f32.partialorder %v3666_v62, 0.0  ;;  %v3734_v14 = vmul.f32 %v6428_v47, %v3666_v62 }
 0x2ef   : > { %v3652_v10 = vadd.f32 %v6426_v45, %v3616_v49  ;;  %v3617_v11 = vmul.f32 %v4734_v19, %v6424_v41  ;;  %vm3701_vm9 = vcmp.ge.f32.partialorder %v3669_v7, 0.0  ;;  %v3522_v12 = vpop.f32.mrb[15].mxu0  ;;  %v3737_v15 = vmul.f32 %v6428_v47, %v3669_v7 }
 0x2f0   : > { %v3650_v13 = vadd.f32 %v6426_v45, %v3614_v50  ;;  %v3615_v16 = vmul.f32 %v6424_v41, %v3522_v12  ;;  %v3768_v20 = vsel %vm3700_vm7, %v3668_v52, %v3736_v26  ;;  %vm3699_vm11 = vcmp.ge.f32.partialorder %v3667_v9, 0.0 }
 0x2f1   : > { %vm3684_vm10 = vcmp.ge.f32.partialorder %v3652_v10, 0.0  ;;  %v3720_v18 = vmul.f32 %v6428_v47, %v3652_v10  ;;  %v3653_v21 = vadd.f32 %v6426_v45, %v3617_v11  ;;  %v3769_v23 = vsel %vm3701_vm9, %v3669_v7, %v3737_v15 }
 0x2f2   : > { %v3718_v22 = vmul.f32 %v6428_v47, %v3650_v13  ;;  %v3651_v24 = vadd.f32 %v6426_v45, %v3615_v16  ;;  %vm3682_vm12 = vcmp.ge.f32.partialorder %v3650_v13, 0.0  ;;  %v4662_v29 = vpack.c.bf16 %v3769_v23, %v3768_v20 }
 0x2f3   : > { %vm3685_vm13 = vcmp.ge.f32.partialorder %v3653_v21, 0.0  ;;  %v3721_v28 = vmul.f32 %v6428_v47, %v3653_v21  ;;  %v3735_v30 = vmul.f32 %v6428_v47, %v3667_v9  ;;  %v3752_v31 = vsel %vm3684_vm10, %v3652_v10, %v3720_v18 }
 0x2f4   : > { %vm3683_vm14 = vcmp.ge.f32.partialorder %v3651_v24, 0.0  ;;  %v3719_v41 = vmul.f32 %v6428_v47, %v3651_v24  ;;  %v3766_v45 = vsel %vm3698_vm8, %v3666_v62, %v3734_v14  ;;  %4678 = vst [vmem:[%s6453_s30 + $0x78] sm:$0xff] %v4662_v29   ;;  %v3750_v34 = vsel %vm3682_vm12, %v3650_v13, %v3718_v22 }
 0x2f5   : > { %v3753_v32 = vsel %vm3685_vm13, %v3653_v21, %v3721_v28  ;;  %v3767_v36 = vsel %vm3699_vm11, %v3667_v9, %v3735_v30 }
 0x2f6   : > { %v4622_v5 = vpack.c.bf16 %v3753_v32, %v3752_v31  ;;  %v3751_v35 = vsel %vm3683_vm14, %v3651_v24, %v3719_v41  ;;  %v4657_v8 = vpack.c.bf16 %v3767_v36, %v3766_v45 }
 0x2f7   : > { %v4617_v47 = vpack.c.bf16 %v3751_v35, %v3750_v34 }
 0x2f8   : > { %4670 = vst [vmem:[%s6453_s30 + $0x38] sm:$0xff] %v4622_v5   ;;  %4677 = vst [vmem:[%s6453_s30 + $0x70] sm:$0xff] %v4657_v8  }
 0x2f9   : > { %4669 = vst [vmem:[%s6453_s30 + $0x30] sm:$0xff] %v4617_v47  }
 0x2fa   : > { %5020 = shalt.err (!%p5017_p2)
}
 0x2fb   : > { %s5021_s18 = scalar_lea.hbm %s6553_s6, 2048  ;;  %s5025_s9 = scalar_lea.hbm %s6611_s3, 4096 }
 0x2fc   : > { %p5022_p0 = scmp.ne.s32.totalorder %s6553_s6, %s5021_s18  ;;  %p5026_p6 = scmp.lt.u32.totalorder %s6553_s6, %s6611_s3 }
 0x2fd   : > { %p5027_p7 = scmp.lt.u32.totalorder %s5025_s9, %s5021_s18  ;;  %p5029_p8 = scmp.lt.u32.totalorder %s5021_s18, %s6553_s6 }
 0x2fe   : > { %p5023_p4 = pnand %p5022_p0, %p6630_p12 }
 0x2ff   : > { %p5028_p11 = por %p5027_p7, %p5026_p6 }
 0x300   : > { %p5024_p13 = pneg %p5023_p4 }
 0x301   : > { %p5030_p1 = por %p5029_p8, %p5028_p11 }
 0x303   : > { %p5031_p10 = pnand %p5030_p1, %p5024_p13 }
 0x305   : > { %5034 = shalt.err (!%p5031_p10)
}
 0x306   : > { %s5110_s26 = smov 64  }
 0x307   : > { %4780 = dma.vmem_to_hbm [thread:$0]  (%p6630_p12), %s6555_s25, 2048, %s6553_s6, %s3931_s7, %s5110_s26, %s5110_s26, %s5102_s24  }
 0x308 PF: > { %s3960_s15 = sand.u32 1, %s5073_s12   ;;  %p6631_p3 = scmp.ne.s32.totalorder %s6619_s23, 0 }
 0x309   : > { %p6632_p5 = scmp.ge.s32.totalorder %s5093_s17, 2  ;;  %s3961_s29 = scalar_lea.sflag [#allocation5], %s3960_s15 }
 0x30b   : > { %p4794_p9 = pnand %p6632_p5, %p6631_p3 }
 0x30d   : > { %5068 = dma.done.wait (!%p4794_p9), %s3961_s29, 2048  }
 0x30e   : > { %5070 = vsyncadd (!%p4794_p9), %s3961_s29, 4294965248  ;;  %s20_s17 = sadd.s32 1, %s5093_s17   ;;  %s6633_s12 = smov %s5077_s13 }
 0x30f   : > { %p17_p2 = scmp.ge.s32.totalorder %s20_s17, 4   ;;  %s6634_s13 = smov %s5081_s14 }
 0x310   : > { %s6635_s14 = smov %s5279_s5  ;;  %s6636_s15 = smov %s5089_s16 }
 0x311   : > { %s6637_s16 = smov %s6639_s19  ;;  %19 = sbr.rel (!%p17_p2) target bundleno = 7 (0x7), region = 91 }
 0x318   :  { %3966 = vsyncpa [#allocation4], 1 }
 0x319   :  { %3968 = vsyncpa [#allocation4 + $0x1], 1 }
 0x31a   :  { %3969 = vsyncpa [#allocation7], 1 }
 0x31b   :  { %3970 = vsyncpa [#allocation5], 1 }
 0x31c   :  { %3972 = vsyncpa [#allocation5 + $0x1], 1 }

</bundles_post_ra>
